<compile_context>
chip_gen: v7x
topology: tpu7x:2x2x1
jax: 0.10.0
libtpu: 0.0.40
codegen_flags: <defaults>
</compile_context>

<pallas_src>
import math

import jax
import jax.numpy as jnp
from jax.experimental import pallas as pl
from jax.experimental.pallas import tpu as pltpu

# ---------------------------------------------------------------------------
# Model configuration (matches the PyTorch __init__)
# ---------------------------------------------------------------------------
LAYER_SIZES = [1, 5, 9, 15, 25, 25, 25, 15, 9, 5, 1]   # 10 linear layers
NUM_LAYERS = len(LAYER_SIZES) - 1                       # = 10
FEAT_PAD = 32                                           # feature (sublane) pad
WEIGHT_DTYPE = jnp.float32   # keep f32 on all generations (perf review)
MAX_TILE_N = 1024            # whole 10-layer chain stays vreg-resident


# ---------------------------------------------------------------------------
# Pallas kernel: the entire MLP hot path.
# ---------------------------------------------------------------------------
def _sigmoid(z):
    # exp on the EUP + exact reciprocal (no approx, so the strict 1e-5 check
    # against the f32 reference holds); avoids a full VALU divide chain.
    return pl.reciprocal(1.0 + jnp.exp(-z), approx=False)


def mlp_kernel(x_ref, w_ref, b_ref, o_ref):
    # x_ref: (1, TILE_N) f32            -- batch on lanes, single input feature
    # w_ref: (10, 32, 32) f32           -- layers 0..8 stored (out, in), zero
    #                                      padded; layer 9 stored transposed as
    #                                      a column (in-features down sublanes)
    # b_ref: (10, 32, 1)  f32           -- per-layer bias, zero padded
    # o_ref: (1, TILE_N) f32            -- lane-dense output row
    x = x_ref[...]                                      # (1, TILE_N)

    # Layer 0 (1 -> 5): outer-product broadcast on the VPU (no MXU matmul).
    # Slice the single valid weight column straight off the ref.
    w0_col = w_ref[0, :, 0:1]                           # (32, 1)
    h = _sigmoid(w0_col * x + b_ref[0])                 # (32, TILE_N)

    # Layers 1..8: 32-deep MXU matmuls; (out, in) layout puts out-features on
    # sublanes and the contraction on lanes (MXU LHS layout -> no relayout).
    for layer in range(1, NUM_LAYERS - 1):
        z = jnp.dot(w_ref[layer], h,
                    preferred_element_type=jnp.float32) + b_ref[layer]
        h = _sigmoid(z)

    # Layer 9 (5 -> 1): VPU multiply + XLU sublane reduction (no MXU push/pop
    # on the serial chain, no sublane-0 extraction).  Padded rows of the
    # transposed weight column are zero, killing the sigmoid(0)=0.5 pad rows.
    w_last = w_ref[NUM_LAYERS - 1, :, 0:1]              # (32, 1)
    b_last = b_ref[NUM_LAYERS - 1, 0:1, 0:1]            # (1, 1)
    o_ref[...] = jnp.sum(w_last * h, axis=0, keepdims=True) + b_last


# ---------------------------------------------------------------------------
# Generation-aware tile / grid selection.
# ---------------------------------------------------------------------------
def _num_tensorcores_per_device():
    """TensorCores a 'parallel' Pallas grid axis can shard over on one device."""
    try:
        kind = jax.devices()[0].device_kind.lower()
    except Exception:
        return 1
    return 2 if "v7" in kind else 1        # v7x: 2 TCs/chip; v5e/v6e: 1


def _pick_tiling(n, num_tc, max_tile=MAX_TILE_N):
    """As few, as wide grid steps as possible; step count a multiple of the
    TensorCore count so v7x always gets an even 'parallel' split."""
    per_core = pl.cdiv(n, num_tc)
    tile = min(max_tile, max(128, pl.cdiv(per_core, 128) * 128))
    steps = pl.cdiv(n, tile)
    steps = pl.cdiv(steps, num_tc) * num_tc
    return tile, steps


def mlp_forward(x, w_stack, b_stack, *, tile_n=None):
    """x: (N, 1) float32.  Returns (N, 1) float32."""
    n = x.shape[0]
    x_row = x.reshape(1, n).astype(jnp.float32)         # lane-dense input row

    num_tc = _num_tensorcores_per_device()
    if tile_n is None:
        tile_n, steps = _pick_tiling(n, num_tc)
    else:
        tile_n = max(128, pl.cdiv(tile_n, 128) * 128)   # round up, never assert
        steps = pl.cdiv(pl.cdiv(n, tile_n), num_tc) * num_tc

    n_pad = steps * tile_n
    if n_pad != n:
        x_row = jnp.pad(x_row, ((0, 0), (0, n_pad - n)))

    out_row = pl.pallas_call(
        mlp_kernel,
        out_shape=jax.ShapeDtypeStruct((1, n_pad), jnp.float32),
        grid=(steps,),
        in_specs=[
            # Activations stream tile-by-tile over the batch (lane) axis.
            pl.BlockSpec((1, tile_n), lambda i: (0, i)),
            # Weights / biases: constant block index -> VMEM-resident across steps.
            pl.BlockSpec((NUM_LAYERS, FEAT_PAD, FEAT_PAD), lambda i: (0, 0, 0)),
            pl.BlockSpec((NUM_LAYERS, FEAT_PAD, 1), lambda i: (0, 0, 0)),
        ],
        out_specs=pl.BlockSpec((1, tile_n), lambda i: (0, i)),
        compiler_params=pltpu.CompilerParams(
            dimension_semantics=("parallel",)),
    )(x_row, w_stack, b_stack)

    if n_pad != n:
        out_row = out_row[:, :n]
    return out_row.reshape(n, 1)


# ---------------------------------------------------------------------------
# Deterministic parameter initialization (PyTorch nn.Linear default scheme:
# U(-1/sqrt(fan_in), 1/sqrt(fan_in)) for both weight and bias).
# Layers 0..8 stored (out, in) zero-padded to (32, 32); the final layer is
# stored transposed (in-features down sublanes) for the VPU/XLU output path.
# ---------------------------------------------------------------------------
def init_params(key):
    w_stack = jnp.zeros((NUM_LAYERS, FEAT_PAD, FEAT_PAD), dtype=jnp.float32)
    b_stack = jnp.zeros((NUM_LAYERS, FEAT_PAD, 1), dtype=jnp.float32)
    ws, bs = [], []  # unpadded copies for the pure-JAX reference
    for layer in range(NUM_LAYERS):
        fan_in = LAYER_SIZES[layer]
        fan_out = LAYER_SIZES[layer + 1]
        bound = 1.0 / math.sqrt(fan_in)
        key, kw, kb = jax.random.split(key, 3)
        w = jax.random.uniform(kw, (fan_out, fan_in), jnp.float32, -bound, bound)
        b = jax.random.uniform(kb, (fan_out,), jnp.float32, -bound, bound)
        ws.append(w)
        bs.append(b)
        if layer == NUM_LAYERS - 1:
            # Final (5 -> 1) layer: store w.T down the sublanes at column 0.
            w_stack = w_stack.at[layer, :fan_in, 0].set(w[0, :])
        else:
            w_stack = w_stack.at[layer, :fan_out, :fan_in].set(w)
        b_stack = b_stack.at[layer, :fan_out, 0].set(b)
    return w_stack.astype(WEIGHT_DTYPE), b_stack, ws, bs


def reference_forward(x, ws, bs):
    h = x
    for layer in range(NUM_LAYERS):
        z = h @ ws[layer].T + bs[layer][None, :]
        h = jax.nn.sigmoid(z) if layer < NUM_LAYERS - 1 else z
    return h


# ---------------------------------------------------------------------------
if __name__ == "__main__":
    key = jax.random.PRNGKey(0)
    w_stack, b_stack, ws, bs = init_params(key)

    # Collocation points of the original script: np.linspace(0, Lb, 1000),
    # with Lb fixed to 2.0 instead of the interactive input().
    N = 1000
    Lb = 2.0
    x = jnp.linspace(0.0, Lb, N, dtype=jnp.float32).reshape(N, 1)

    out = mlp_forward(x, w_stack, b_stack)
    out = jax.block_until_ready(out)

    ref = reference_forward(x, ws, bs)
    assert out.shape == (N, 1)
    assert jnp.allclose(out, ref, atol=1e-5, rtol=1e-5), "mismatch vs reference"

    print("KERNEL_OK")
</pallas_src>

<mosaic_0001>
module attributes {stable_mosaic.version = 11 : i64} {
  func.func @mlp_kernel(%arg0: i32, %arg1: memref<1x1024xf32, #tpu.memory_space<vmem>>, %arg2: memref<10x32x32xf32, #tpu.memory_space<vmem>>, %arg3: memref<10x32x1xf32, #tpu.memory_space<vmem>>, %arg4: memref<1x1024xf32, #tpu.memory_space<vmem>>) attributes {dimension_semantics = [#tpu.dimension_semantics<parallel>], iteration_bounds = array<i64: 1>, scalar_prefetch = 0 : i64, scratch_operands = 0 : i64, tpu.core_type = #tpu.core_type<tc>, window_params = [{transform_indices = @transform_0, window_bounds = array<i64: 1, 1024>}, {pipeline_mode = #tpu.pipeline_mode<synchronous>, transform_indices = @transform_1, window_bounds = array<i64: 10, 32, 32>}, {pipeline_mode = #tpu.pipeline_mode<synchronous>, transform_indices = @transform_2, window_bounds = array<i64: 10, 32, 1>}, {transform_indices = @transform_3, window_bounds = array<i64: 1, 1024>}]} {
    %c0 = arith.constant 0 : index
    %c0_0 = arith.constant 0 : index
    %0 = vector.load %arg1[%c0, %c0_0] : memref<1x1024xf32, #tpu.memory_space<vmem>>, vector<1x1024xf32>
    %c0_1 = arith.constant 0 : index
    %c0_2 = arith.constant 0 : index
    %c0_3 = arith.constant 0 : index
    %1 = vector.load %arg2[%c0_1, %c0_2, %c0_3] : memref<10x32x32xf32, #tpu.memory_space<vmem>>, vector<1x32x1xf32>
    %2 = vector.shape_cast %1 : vector<1x32x1xf32> to vector<32x1xf32>
    %3 = vector.broadcast %2 : vector<32x1xf32> to vector<32x1024xf32>
    %4 = vector.broadcast %0 : vector<1x1024xf32> to vector<32x1024xf32>
    %5 = arith.mulf %3, %4 : vector<32x1024xf32>
    %c0_4 = arith.constant 0 : index
    %c0_5 = arith.constant 0 : index
    %c0_6 = arith.constant 0 : index
    %6 = vector.load %arg3[%c0_4, %c0_5, %c0_6] : memref<10x32x1xf32, #tpu.memory_space<vmem>>, vector<1x32x1xf32>
    %7 = vector.shape_cast %6 : vector<1x32x1xf32> to vector<32x1xf32>
    %8 = vector.broadcast %7 : vector<32x1xf32> to vector<32x1024xf32>
    %9 = arith.addf %5, %8 : vector<32x1024xf32>
    %cst = arith.constant 0.000000e+00 : f32
    %10 = vector.broadcast %cst : f32 to vector<32x1024xf32>
    %11 = arith.subf %10, %9 : vector<32x1024xf32>
    %12 = math.exp %11 : vector<32x1024xf32>
    %cst_7 = arith.constant 1.000000e+00 : f32
    %13 = vector.broadcast %cst_7 : f32 to vector<32x1024xf32>
    %14 = arith.addf %13, %12 : vector<32x1024xf32>
    %15 = tpu.reciprocal %14 : vector<32x1024xf32> -> vector<32x1024xf32>
    %c1 = arith.constant 1 : index
    %c0_8 = arith.constant 0 : index
    %c0_9 = arith.constant 0 : index
    %16 = vector.load %arg2[%c1, %c0_8, %c0_9] : memref<10x32x32xf32, #tpu.memory_space<vmem>>, vector<1x32x32xf32>
    %17 = vector.shape_cast %16 : vector<1x32x32xf32> to vector<32x32xf32>
    %cst_10 = arith.constant dense<0.000000e+00> : vector<32x1024xf32>
    %18 = tpu.matmul %17, %15, %cst_10 {dimension_numbers = #tpu.dot_dimension_numbers<[1], [0], [0], [1], [0, 0, 1, 1], [], []>} : vector<32x32xf32>, vector<32x1024xf32>, vector<32x1024xf32> -> vector<32x1024xf32>
    %c1_11 = arith.constant 1 : index
    %c0_12 = arith.constant 0 : index
    %c0_13 = arith.constant 0 : index
    %19 = vector.load %arg3[%c1_11, %c0_12, %c0_13] : memref<10x32x1xf32, #tpu.memory_space<vmem>>, vector<1x32x1xf32>
    %20 = vector.shape_cast %19 : vector<1x32x1xf32> to vector<32x1xf32>
    %21 = vector.broadcast %20 : vector<32x1xf32> to vector<32x1024xf32>
    %22 = arith.addf %18, %21 : vector<32x1024xf32>
    %cst_14 = arith.constant 0.000000e+00 : f32
    %23 = vector.broadcast %cst_14 : f32 to vector<32x1024xf32>
    %24 = arith.subf %23, %22 : vector<32x1024xf32>
    %25 = math.exp %24 : vector<32x1024xf32>
    %cst_15 = arith.constant 1.000000e+00 : f32
    %26 = vector.broadcast %cst_15 : f32 to vector<32x1024xf32>
    %27 = arith.addf %26, %25 : vector<32x1024xf32>
    %28 = tpu.reciprocal %27 : vector<32x1024xf32> -> vector<32x1024xf32>
    %c2 = arith.constant 2 : index
    %c0_16 = arith.constant 0 : index
    %c0_17 = arith.constant 0 : index
    %29 = vector.load %arg2[%c2, %c0_16, %c0_17] : memref<10x32x32xf32, #tpu.memory_space<vmem>>, vector<1x32x32xf32>
    %30 = vector.shape_cast %29 : vector<1x32x32xf32> to vector<32x32xf32>
    %cst_18 = arith.constant dense<0.000000e+00> : vector<32x1024xf32>
    %31 = tpu.matmul %30, %28, %cst_18 {dimension_numbers = #tpu.dot_dimension_numbers<[1], [0], [0], [1], [0, 0, 1, 1], [], []>} : vector<32x32xf32>, vector<32x1024xf32>, vector<32x1024xf32> -> vector<32x1024xf32>
    %c2_19 = arith.constant 2 : index
    %c0_20 = arith.constant 0 : index
    %c0_21 = arith.constant 0 : index
    %32 = vector.load %arg3[%c2_19, %c0_20, %c0_21] : memref<10x32x1xf32, #tpu.memory_space<vmem>>, vector<1x32x1xf32>
    %33 = vector.shape_cast %32 : vector<1x32x1xf32> to vector<32x1xf32>
    %34 = vector.broadcast %33 : vector<32x1xf32> to vector<32x1024xf32>
    %35 = arith.addf %31, %34 : vector<32x1024xf32>
    %cst_22 = arith.constant 0.000000e+00 : f32
    %36 = vector.broadcast %cst_22 : f32 to vector<32x1024xf32>
    %37 = arith.subf %36, %35 : vector<32x1024xf32>
    %38 = math.exp %37 : vector<32x1024xf32>
    %cst_23 = arith.constant 1.000000e+00 : f32
    %39 = vector.broadcast %cst_23 : f32 to vector<32x1024xf32>
    %40 = arith.addf %39, %38 : vector<32x1024xf32>
    %41 = tpu.reciprocal %40 : vector<32x1024xf32> -> vector<32x1024xf32>
    %c3 = arith.constant 3 : index
    %c0_24 = arith.constant 0 : index
    %c0_25 = arith.constant 0 : index
    %42 = vector.load %arg2[%c3, %c0_24, %c0_25] : memref<10x32x32xf32, #tpu.memory_space<vmem>>, vector<1x32x32xf32>
    %43 = vector.shape_cast %42 : vector<1x32x32xf32> to vector<32x32xf32>
    %cst_26 = arith.constant dense<0.000000e+00> : vector<32x1024xf32>
    %44 = tpu.matmul %43, %41, %cst_26 {dimension_numbers = #tpu.dot_dimension_numbers<[1], [0], [0], [1], [0, 0, 1, 1], [], []>} : vector<32x32xf32>, vector<32x1024xf32>, vector<32x1024xf32> -> vector<32x1024xf32>
    %c3_27 = arith.constant 3 : index
    %c0_28 = arith.constant 0 : index
    %c0_29 = arith.constant 0 : index
    %45 = vector.load %arg3[%c3_27, %c0_28, %c0_29] : memref<10x32x1xf32, #tpu.memory_space<vmem>>, vector<1x32x1xf32>
    %46 = vector.shape_cast %45 : vector<1x32x1xf32> to vector<32x1xf32>
    %47 = vector.broadcast %46 : vector<32x1xf32> to vector<32x1024xf32>
    %48 = arith.addf %44, %47 : vector<32x1024xf32>
    %cst_30 = arith.constant 0.000000e+00 : f32
    %49 = vector.broadcast %cst_30 : f32 to vector<32x1024xf32>
    %50 = arith.subf %49, %48 : vector<32x1024xf32>
    %51 = math.exp %50 : vector<32x1024xf32>
    %cst_31 = arith.constant 1.000000e+00 : f32
    %52 = vector.broadcast %cst_31 : f32 to vector<32x1024xf32>
    %53 = arith.addf %52, %51 : vector<32x1024xf32>
    %54 = tpu.reciprocal %53 : vector<32x1024xf32> -> vector<32x1024xf32>
    %c4 = arith.constant 4 : index
    %c0_32 = arith.constant 0 : index
    %c0_33 = arith.constant 0 : index
    %55 = vector.load %arg2[%c4, %c0_32, %c0_33] : memref<10x32x32xf32, #tpu.memory_space<vmem>>, vector<1x32x32xf32>
    %56 = vector.shape_cast %55 : vector<1x32x32xf32> to vector<32x32xf32>
    %cst_34 = arith.constant dense<0.000000e+00> : vector<32x1024xf32>
    %57 = tpu.matmul %56, %54, %cst_34 {dimension_numbers = #tpu.dot_dimension_numbers<[1], [0], [0], [1], [0, 0, 1, 1], [], []>} : vector<32x32xf32>, vector<32x1024xf32>, vector<32x1024xf32> -> vector<32x1024xf32>
    %c4_35 = arith.constant 4 : index
    %c0_36 = arith.constant 0 : index
    %c0_37 = arith.constant 0 : index
    %58 = vector.load %arg3[%c4_35, %c0_36, %c0_37] : memref<10x32x1xf32, #tpu.memory_space<vmem>>, vector<1x32x1xf32>
    %59 = vector.shape_cast %58 : vector<1x32x1xf32> to vector<32x1xf32>
    %60 = vector.broadcast %59 : vector<32x1xf32> to vector<32x1024xf32>
    %61 = arith.addf %57, %60 : vector<32x1024xf32>
    %cst_38 = arith.constant 0.000000e+00 : f32
    %62 = vector.broadcast %cst_38 : f32 to vector<32x1024xf32>
    %63 = arith.subf %62, %61 : vector<32x1024xf32>
    %64 = math.exp %63 : vector<32x1024xf32>
    %cst_39 = arith.constant 1.000000e+00 : f32
    %65 = vector.broadcast %cst_39 : f32 to vector<32x1024xf32>
    %66 = arith.addf %65, %64 : vector<32x1024xf32>
    %67 = tpu.reciprocal %66 : vector<32x1024xf32> -> vector<32x1024xf32>
    %c5 = arith.constant 5 : index
    %c0_40 = arith.constant 0 : index
    %c0_41 = arith.constant 0 : index
    %68 = vector.load %arg2[%c5, %c0_40, %c0_41] : memref<10x32x32xf32, #tpu.memory_space<vmem>>, vector<1x32x32xf32>
    %69 = vector.shape_cast %68 : vector<1x32x32xf32> to vector<32x32xf32>
    %cst_42 = arith.constant dense<0.000000e+00> : vector<32x1024xf32>
    %70 = tpu.matmul %69, %67, %cst_42 {dimension_numbers = #tpu.dot_dimension_numbers<[1], [0], [0], [1], [0, 0, 1, 1], [], []>} : vector<32x32xf32>, vector<32x1024xf32>, vector<32x1024xf32> -> vector<32x1024xf32>
    %c5_43 = arith.constant 5 : index
    %c0_44 = arith.constant 0 : index
    %c0_45 = arith.constant 0 : index
    %71 = vector.load %arg3[%c5_43, %c0_44, %c0_45] : memref<10x32x1xf32, #tpu.memory_space<vmem>>, vector<1x32x1xf32>
    %72 = vector.shape_cast %71 : vector<1x32x1xf32> to vector<32x1xf32>
    %73 = vector.broadcast %72 : vector<32x1xf32> to vector<32x1024xf32>
    %74 = arith.addf %70, %73 : vector<32x1024xf32>
    %cst_46 = arith.constant 0.000000e+00 : f32
    %75 = vector.broadcast %cst_46 : f32 to vector<32x1024xf32>
    %76 = arith.subf %75, %74 : vector<32x1024xf32>
    %77 = math.exp %76 : vector<32x1024xf32>
    %cst_47 = arith.constant 1.000000e+00 : f32
    %78 = vector.broadcast %cst_47 : f32 to vector<32x1024xf32>
    %79 = arith.addf %78, %77 : vector<32x1024xf32>
    %80 = tpu.reciprocal %79 : vector<32x1024xf32> -> vector<32x1024xf32>
    %c6 = arith.constant 6 : index
    %c0_48 = arith.constant 0 : index
    %c0_49 = arith.constant 0 : index
    %81 = vector.load %arg2[%c6, %c0_48, %c0_49] : memref<10x32x32xf32, #tpu.memory_space<vmem>>, vector<1x32x32xf32>
    %82 = vector.shape_cast %81 : vector<1x32x32xf32> to vector<32x32xf32>
    %cst_50 = arith.constant dense<0.000000e+00> : vector<32x1024xf32>
    %83 = tpu.matmul %82, %80, %cst_50 {dimension_numbers = #tpu.dot_dimension_numbers<[1], [0], [0], [1], [0, 0, 1, 1], [], []>} : vector<32x32xf32>, vector<32x1024xf32>, vector<32x1024xf32> -> vector<32x1024xf32>
    %c6_51 = arith.constant 6 : index
    %c0_52 = arith.constant 0 : index
    %c0_53 = arith.constant 0 : index
    %84 = vector.load %arg3[%c6_51, %c0_52, %c0_53] : memref<10x32x1xf32, #tpu.memory_space<vmem>>, vector<1x32x1xf32>
    %85 = vector.shape_cast %84 : vector<1x32x1xf32> to vector<32x1xf32>
    %86 = vector.broadcast %85 : vector<32x1xf32> to vector<32x1024xf32>
    %87 = arith.addf %83, %86 : vector<32x1024xf32>
    %cst_54 = arith.constant 0.000000e+00 : f32
    %88 = vector.broadcast %cst_54 : f32 to vector<32x1024xf32>
    %89 = arith.subf %88, %87 : vector<32x1024xf32>
    %90 = math.exp %89 : vector<32x1024xf32>
    %cst_55 = arith.constant 1.000000e+00 : f32
    %91 = vector.broadcast %cst_55 : f32 to vector<32x1024xf32>
    %92 = arith.addf %91, %90 : vector<32x1024xf32>
    %93 = tpu.reciprocal %92 : vector<32x1024xf32> -> vector<32x1024xf32>
    %c7 = arith.constant 7 : index
    %c0_56 = arith.constant 0 : index
    %c0_57 = arith.constant 0 : index
    %94 = vector.load %arg2[%c7, %c0_56, %c0_57] : memref<10x32x32xf32, #tpu.memory_space<vmem>>, vector<1x32x32xf32>
    %95 = vector.shape_cast %94 : vector<1x32x32xf32> to vector<32x32xf32>
    %cst_58 = arith.constant dense<0.000000e+00> : vector<32x1024xf32>
    %96 = tpu.matmul %95, %93, %cst_58 {dimension_numbers = #tpu.dot_dimension_numbers<[1], [0], [0], [1], [0, 0, 1, 1], [], []>} : vector<32x32xf32>, vector<32x1024xf32>, vector<32x1024xf32> -> vector<32x1024xf32>
    %c7_59 = arith.constant 7 : index
    %c0_60 = arith.constant 0 : index
    %c0_61 = arith.constant 0 : index
    %97 = vector.load %arg3[%c7_59, %c0_60, %c0_61] : memref<10x32x1xf32, #tpu.memory_space<vmem>>, vector<1x32x1xf32>
    %98 = vector.shape_cast %97 : vector<1x32x1xf32> to vector<32x1xf32>
    %99 = vector.broadcast %98 : vector<32x1xf32> to vector<32x1024xf32>
    %100 = arith.addf %96, %99 : vector<32x1024xf32>
    %cst_62 = arith.constant 0.000000e+00 : f32
    %101 = vector.broadcast %cst_62 : f32 to vector<32x1024xf32>
    %102 = arith.subf %101, %100 : vector<32x1024xf32>
    %103 = math.exp %102 : vector<32x1024xf32>
    %cst_63 = arith.constant 1.000000e+00 : f32
    %104 = vector.broadcast %cst_63 : f32 to vector<32x1024xf32>
    %105 = arith.addf %104, %103 : vector<32x1024xf32>
    %106 = tpu.reciprocal %105 : vector<32x1024xf32> -> vector<32x1024xf32>
    %c8 = arith.constant 8 : index
    %c0_64 = arith.constant 0 : index
    %c0_65 = arith.constant 0 : index
    %107 = vector.load %arg2[%c8, %c0_64, %c0_65] : memref<10x32x32xf32, #tpu.memory_space<vmem>>, vector<1x32x32xf32>
    %108 = vector.shape_cast %107 : vector<1x32x32xf32> to vector<32x32xf32>
    %cst_66 = arith.constant dense<0.000000e+00> : vector<32x1024xf32>
    %109 = tpu.matmul %108, %106, %cst_66 {dimension_numbers = #tpu.dot_dimension_numbers<[1], [0], [0], [1], [0, 0, 1, 1], [], []>} : vector<32x32xf32>, vector<32x1024xf32>, vector<32x1024xf32> -> vector<32x1024xf32>
    %c8_67 = arith.constant 8 : index
    %c0_68 = arith.constant 0 : index
    %c0_69 = arith.constant 0 : index
    %110 = vector.load %arg3[%c8_67, %c0_68, %c0_69] : memref<10x32x1xf32, #tpu.memory_space<vmem>>, vector<1x32x1xf32>
    %111 = vector.shape_cast %110 : vector<1x32x1xf32> to vector<32x1xf32>
    %112 = vector.broadcast %111 : vector<32x1xf32> to vector<32x1024xf32>
    %113 = arith.addf %109, %112 : vector<32x1024xf32>
    %cst_70 = arith.constant 0.000000e+00 : f32
    %114 = vector.broadcast %cst_70 : f32 to vector<32x1024xf32>
    %115 = arith.subf %114, %113 : vector<32x1024xf32>
    %116 = math.exp %115 : vector<32x1024xf32>
    %cst_71 = arith.constant 1.000000e+00 : f32
    %117 = vector.broadcast %cst_71 : f32 to vector<32x1024xf32>
    %118 = arith.addf %117, %116 : vector<32x1024xf32>
    %119 = tpu.reciprocal %118 : vector<32x1024xf32> -> vector<32x1024xf32>
    %c9 = arith.constant 9 : index
    %c0_72 = arith.constant 0 : index
    %c0_73 = arith.constant 0 : index
    %120 = vector.load %arg2[%c9, %c0_72, %c0_73] : memref<10x32x32xf32, #tpu.memory_space<vmem>>, vector<1x32x1xf32>
    %121 = vector.shape_cast %120 : vector<1x32x1xf32> to vector<32x1xf32>
    %c9_74 = arith.constant 9 : index
    %c0_75 = arith.constant 0 : index
    %c0_76 = arith.constant 0 : index
    %122 = vector.load %arg3[%c9_74, %c0_75, %c0_76] : memref<10x32x1xf32, #tpu.memory_space<vmem>>, vector<1x1x1xf32>
    %123 = vector.shape_cast %122 : vector<1x1x1xf32> to vector<1x1xf32>
    %124 = vector.broadcast %121 : vector<32x1xf32> to vector<32x1024xf32>
    %125 = arith.mulf %124, %119 : vector<32x1024xf32>
    %cst_77 = arith.constant dense<0.000000e+00> : vector<1024xf32>
    %126 = vector.multi_reduction <add>, %125, %cst_77 [0] : vector<32x1024xf32> to vector<1024xf32>
    %127 = vector.shape_cast %126 : vector<1024xf32> to vector<1x1024xf32>
    %128 = vector.broadcast %123 : vector<1x1xf32> to vector<1x1024xf32>
    %129 = arith.addf %127, %128 : vector<1x1024xf32>
    %c0_78 = arith.constant 0 : index
    %c0_79 = arith.constant 0 : index
    %130 = vector.load %arg4[%c0_78, %c0_79] : memref<1x1024xf32, #tpu.memory_space<vmem>>, vector<1x1024xf32>
    tpu.vector_store %arg4[%c0_78, %c0_79], %129 {strides = array<i32>} : memref<1x1024xf32, #tpu.memory_space<vmem>>, vector<1x1024xf32>,
    return
  }
  func.func @transform_0(%arg0: i32) -> (i32, i32) {
    %c0_i32 = arith.constant 0 : i32
    %c0_i32_0 = arith.constant 0 : i32
    return %c0_i32, %arg0 : i32, i32
  }
  func.func @transform_1(%arg0: i32) -> (i32, i32, i32) {
    %c0_i32 = arith.constant 0 : i32
    %c0_i32_0 = arith.constant 0 : i32
    %c0_i32_1 = arith.constant 0 : i32
    %c0_i32_2 = arith.constant 0 : i32
    return %c0_i32, %c0_i32_0, %c0_i32_1 : i32, i32, i32
  }
  func.func @transform_2(%arg0: i32) -> (i32, i32, i32) {
    %c0_i32 = arith.constant 0 : i32
    %c0_i32_0 = arith.constant 0 : i32
    %c0_i32_1 = arith.constant 0 : i32
    %c0_i32_2 = arith.constant 0 : i32
    return %c0_i32, %c0_i32_0, %c0_i32_1 : i32, i32, i32
  }
  func.func @transform_3(%arg0: i32) -> (i32, i32) {
    %c0_i32 = arith.constant 0 : i32
    %c0_i32_0 = arith.constant 0 : i32
    return %c0_i32, %arg0 : i32, i32
  }
}

</mosaic_0001>

<bundles_post_ra>
// kernel: tpu_custom_call.1
= control target key start
LH: loop header
LB: loop body
LE: loop exit
PB: predicated region body
PF: predicated region fallthrough
CT: control target
= control target key end

     0   :  { %v6646_v2 = vmov 0   ;;  %s8035_s0 = inlined_call_operand.vmem [shape: f32[1,1024], index: 0, kind: input, shape index: {}]   ;;  %s8036_s1 = inlined_call_operand.vmem [shape: f32[10,32,32], index: 1, kind: input, shape index: {}]   ;;  %s8037_s2 = inlined_call_operand.vmem [shape: f32[10,32,1], index: 2, kind: input, shape index: {}]   ;;  %s8038_s3 = inlined_call_operand.hbm [shape: f32[1,1024], index: 3, kind: output, shape index: {}]  }
   0x1   :  { %v113_v0 = vld [vmem:[%s8037_s2] sm:$0xff]  ;;  %5469 = vset.pattern.permute.xlu1 %v6646_v2  ;;  %5468 = vset.pattern.permute.xlu0 %v6646_v2  ;;  %v114_v3 = vld [vmem:[%s8037_s2 + $0x8] sm:$0xff]  ;;  %v19_v5 = vld [vmem:[%s8036_s1 + $0x18] sm:$0xff] }
   0x2   :  { %v16_v1 = vld [vmem:[%s8036_s1] sm:$0xff]  ;;  %119 = vperm.xlu1 %5469, %v113_v0   ;;  %v17_v4 = vld [vmem:[%s8036_s1 + $0x8] sm:$0xff]  ;;  %v18_v6 = vld [vmem:[%s8036_s1 + $0x10] sm:$0xff] }
   0x3   :  { %22 = vperm.xlu0 %5468, %v16_v1   ;;  %v116_v7 = vld [vmem:[%s8037_s2 + $0x18] sm:$0xff]  ;;  %v115_v8 = vld [vmem:[%s8037_s2 + $0x10] sm:$0xff]  ;;  %v5016_v9 = vld [vmem:[%s8037_s2 + $0x28] sm:$0xff] }
   0x4   :  { %v5015_v10 = vld [vmem:[%s8037_s2 + $0x20] sm:$0xff] }
   0x6   :  { %124 = vperm.xlu1 %5469, %v114_v3  }
   0x7   :  { %27 = vperm.xlu0 %5468, %v17_v4  }
   0xa   :  { %37 = vperm.xlu1 %5469, %v19_v5  }
   0xb   :  { %32 = vperm.xlu0 %5468, %v18_v6  }
   0xe   :  { %134 = vperm.xlu1 %5469, %v116_v7  }
   0xf   :  { %129 = vperm.xlu0 %5468, %v115_v8  }
  0x10   :  { %8 = vsyncpa [#allocation3], 0  ;;  %v5018_v11 = vld [vmem:[%s8037_s2 + $0x38] sm:$0xff]  ;;  %v5017_v12 = vld [vmem:[%s8037_s2 + $0x30] sm:$0xff]  ;;  %v6647_v43 = vmov 0.0   ;;  %v41_v47 = vlaneseq  ;;  %vm359_vm0 = vcmask 261120  }
  0x11   :  { %v5040_v13 = vld [vmem:[%s8037_s2 + $0x48] sm:$0xff]  ;;  %v5039_v14 = vld [vmem:[%s8037_s2 + $0x40] sm:$0xff]  ;;  %v5042_v15 = vld [vmem:[%s8037_s2 + $0x58] sm:$0xff]  ;;  %436 = vmatprep.mubr.f32.mxu0 %v6647_v43  ;;  %525 = vmatprep.mubr.f32.mxu1 %v6647_v43 }
  0x12   :  { %346 = vperm.xlu1 %5469, %v5016_v9   ;;  %v5041_v16 = vld [vmem:[%s8037_s2 + $0x50] sm:$0xff]  ;;  %v5064_v17 = vld [vmem:[%s8037_s2 + $0x68] sm:$0xff]  ;;  %v5063_v18 = vld [vmem:[%s8037_s2 + $0x60] sm:$0xff]  ;;  %v6807_v48 = vshrl.u32 %v41_v47, 7 }
  0x13   :  { %341 = vperm.xlu0 %5468, %v5015_v10   ;;  %v5066_v19 = vld [vmem:[%s8037_s2 + $0x78] sm:$0xff]  ;;  %v5065_v20 = vld [vmem:[%s8037_s2 + $0x70] sm:$0xff]  ;;  %v5088_v21 = vld [vmem:[%s8037_s2 + $0x88] sm:$0xff] }
  0x14   :  { %v5087_v22 = vld [vmem:[%s8037_s2 + $0x80] sm:$0xff]  ;;  %v5090_v23 = vld [vmem:[%s8037_s2 + $0x98] sm:$0xff]  ;;  %v5089_v24 = vld [vmem:[%s8037_s2 + $0x90] sm:$0xff]  ;;  %v47_v49 = vsub.s32 1, %v6807_v48  ;;  %v55_v50 = vsub.s32 3, %v6807_v48  ;;  %v43_v52 = vsub.s32 0, %v6807_v48 }
  0x15   :  { %v5112_v25 = vld [vmem:[%s8037_s2 + $0xa8] sm:$0xff]  ;;  %v5111_v26 = vld [vmem:[%s8037_s2 + $0xa0] sm:$0xff]  ;;  %v5114_v27 = vld [vmem:[%s8037_s2 + $0xb8] sm:$0xff]  ;;  %v51_v53 = vsub.s32 2, %v6807_v48  ;;  %v59_v2 = vsub.s32 4, %v6807_v48  ;;  %v67_v3 = vsub.s32 6, %v6807_v48 }
  0x16   :  { %356 = vperm.xlu1 %5469, %v5018_v11   ;;  %v5113_v28 = vld [vmem:[%s8037_s2 + $0xb0] sm:$0xff]  ;;  %v5136_v29 = vld [vmem:[%s8037_s2 + $0xc8] sm:$0xff]  ;;  %v5135_v30 = vld [vmem:[%s8037_s2 + $0xc0] sm:$0xff] }
  0x17   :  { %351 = vperm.xlu0 %5468, %v5017_v12   ;;  %v5138_v31 = vld [vmem:[%s8037_s2 + $0xd8] sm:$0xff]  ;;  %v5137_v32 = vld [vmem:[%s8037_s2 + $0xd0] sm:$0xff]  ;;  %v5160_v33 = vld [vmem:[%s8037_s2 + $0xe8] sm:$0xff] }
  0x18   :  { %v5159_v34 = vld [vmem:[%s8037_s2 + $0xe0] sm:$0xff]  ;;  %v5162_v35 = vld [vmem:[%s8037_s2 + $0xf8] sm:$0xff]  ;;  %v5161_v36 = vld [vmem:[%s8037_s2 + $0xf0] sm:$0xff] }
  0x19   :  { %v5184_v37 = vld [vmem:[%s8037_s2 + $0x108] sm:$0xff]  ;;  %v5183_v38 = vld [vmem:[%s8037_s2 + $0x100] sm:$0xff]  ;;  %v5186_v39 = vld [vmem:[%s8037_s2 + $0x118] sm:$0xff] }
  0x1a   :  { %905 = vperm.xlu1 %5469, %v5040_v13   ;;  %v5185_v40 = vld [vmem:[%s8037_s2 + $0x110] sm:$0xff]  ;;  %v5204_v41 = vld [vmem:[%s8036_s1 + $0x128] sm:$0xff]  ;;  %v5203_v42 = vld [vmem:[%s8036_s1 + $0x120] sm:$0xff] }
  0x1b   :  { %900 = vperm.xlu0 %5468, %v5039_v14   ;;  %v5206_v44 = vld [vmem:[%s8036_s1 + $0x138] sm:$0xff]  ;;  %v5205_v45 = vld [vmem:[%s8036_s1 + $0x130] sm:$0xff]  ;;  %v5207_v46 = vld [vmem:[%s8037_s2 + $0x120] sm:$0x1] }
  0x1c   :  { %v6814_v51 = vld [vmem:[%s8035_s0] sm:$0xff] }
  0x1d   :  { %v48_v54 = vrot.slane %v6814_v51, %v47_v49  ;;  %v56_v55 = vrot.slane %v6814_v51, %v55_v50  ;;  %v6821_v56 = vrot.slane %v6814_v51, %v43_v52  ;;  %v6828_v59 = vrot.slane %v6814_v51, %v51_v53 }
  0x1e   :  { %915 = vperm.xlu1 %5469, %v5042_v15   ;;  %v6851_v11 = vrot.slane %v6814_v51, %v59_v2  ;;  %v6854_v12 = vrot.slane %v6814_v51, %v67_v3 }
  0x1f   :  { %910 = vperm.xlu0 %5468, %v5041_v16  }
  0x22   :  { %1463 = vperm.xlu1 %5469, %v5064_v17  }
  0x23   :  { %1458 = vperm.xlu0 %5468, %v5063_v18  }
  0x26   :  { %1473 = vperm.xlu1 %5469, %v5066_v19  }
  0x27   :  { %1468 = vperm.xlu0 %5468, %v5065_v20  }
  0x2a   :  { %2021 = vperm.xlu1 %5469, %v5088_v21  }
  0x2b   :  { %2016 = vperm.xlu0 %5468, %v5087_v22  }
  0x2e   :  { %2031 = vperm.xlu1 %5469, %v5090_v23  }
  0x2f   :  { %2026 = vperm.xlu0 %5468, %v5089_v24  }
  0x32   :  { %2579 = vperm.xlu1 %5469, %v5112_v25  }
  0x33   :  { %2574 = vperm.xlu0 %5468, %v5111_v26  }
  0x36   :  { %2589 = vperm.xlu1 %5469, %v5114_v27  }
  0x37   :  { %2584 = vperm.xlu0 %5468, %v5113_v28  }
  0x3a   :  { %3137 = vperm.xlu1 %5469, %v5136_v29  }
  0x3b   :  { %3132 = vperm.xlu0 %5468, %v5135_v30  }
  0x3e   :  { %3147 = vperm.xlu1 %5469, %v5138_v31  }
  0x3f   :  { %3142 = vperm.xlu0 %5468, %v5137_v32  }
  0x42   :  { %3695 = vperm.xlu1 %5469, %v5160_v33  }
  0x43   :  { %3690 = vperm.xlu0 %5468, %v5159_v34  }
  0x46   :  { %3705 = vperm.xlu1 %5469, %v5162_v35  }
  0x47   :  { %3700 = vperm.xlu0 %5468, %v5161_v36  }
  0x4a   :  { %4253 = vperm.xlu1 %5469, %v5184_v37  }
  0x4b   :  { %4248 = vperm.xlu0 %5468, %v5183_v38  }
  0x4e   :  { %4263 = vperm.xlu1 %5469, %v5186_v39  }
  0x4f   :  { %4258 = vperm.xlu0 %5468, %v5185_v40  }
  0x52   :  { %4808 = vperm.xlu1 %5469, %v5204_v41  }
  0x53   :  { %4803 = vperm.xlu0 %5468, %v5203_v42  }
  0x56   :  { %4818 = vperm.xlu1 %5469, %v5206_v44  }
  0x57   :  { %4813 = vperm.xlu0 %5468, %v5205_v45  }
  0x5b   :  { %4927 = vperm.xlu0 %5468, %v5207_v46  }
  0x81   :  { %v6823_v57 = vpop.permute.xlu1 %119 }
  0x82   :  { %v6825_v58 = vpop.permute.xlu0 %22 }
  0x83   :  { %v82_v60 = vmul.f32 %v48_v54, %v6825_v58  ;;  %v84_v61 = vmul.f32 %v56_v55, %v6825_v58  ;;  %v81_v62 = vmul.f32 %v6821_v56, %v6825_v58  ;;  %v83_v4 = vmul.f32 %v6828_v59, %v6825_v58 }
  0x85   :  { %v6834_v63 = vpop.permute.xlu1 %124  ;;  %v138_v1 = vadd.f32 %v6823_v57, %v82_v60  ;;  %v140_v7 = vadd.f32 %v6823_v57, %v84_v61  ;;  %v137_v8 = vadd.f32 %v6823_v57, %v81_v62  ;;  %v139_v14 = vadd.f32 %v6823_v57, %v83_v4 }
  0x86   :  { %v6836_v0 = vpop.permute.xlu0 %27 }
  0x87   :  { %v90_v5 = vmul.f32 %v48_v54, %v6836_v0  ;;  %v170_v6 = vsub.f32 0.0, %v138_v1  ;;  %v92_v13 = vmul.f32 %v56_v55, %v6836_v0  ;;  %v172_v17 = vsub.f32 0.0, %v140_v7 }
  0x88   :  { %v89_v18 = vmul.f32 %v6821_v56, %v6836_v0  ;;  %v169_v22 = vsub.f32 0.0, %v137_v8  ;;  %v171_v61 = vsub.f32 0.0, %v139_v14  ;;  %v63_v7 = vsub.s32 5, %v6807_v48 }
  0x89   :  { %v6846_v9 = vpop.permute.xlu1 %37  ;;  %v146_v15 = vadd.f32 %v6834_v63, %v90_v5  ;;  %v203_v16 = vmul.f32 1.442695, %v170_v6  ;;  %v148_v35 = vadd.f32 %v6834_v63, %v92_v13  ;;  %v207_v39 = vmul.f32 1.442695, %v172_v17 }
  0x8a   :  { %v6848_v10 = vpop.permute.xlu0 %32  ;;  %v106_v19 = vmul.f32 %v48_v54, %v6846_v9  ;;  %v109_v20 = vmul.f32 %v6851_v11, %v6846_v9  ;;  %v111_v21 = vmul.f32 %v6854_v12, %v6846_v9  ;;  %v108_v23 = vmul.f32 %v56_v55, %v6846_v9 }
  0x8b   :  { %v97_v24 = vmul.f32 %v6821_v56, %v6848_v10  ;;  %v98_v25 = vmul.f32 %v48_v54, %v6848_v10  ;;  %v101_v26 = vmul.f32 %v6851_v11, %v6848_v10  ;;  %v100_v29 = vmul.f32 %v56_v55, %v6848_v10 }
  0x8c   :  { %v103_v30 = vmul.f32 %v6854_v12, %v6848_v10  ;;  %v178_v34 = vsub.f32 0.0, %v146_v15  ;;  %5470 = vpow2.f32 %v203_v16  ;;  %v180_v42 = vsub.f32 0.0, %v148_v35 }
  0x8d   :  { %v6872_v27 = vpop.permute.xlu1 %134  ;;  %v145_v44 = vadd.f32 %v6834_v63, %v89_v18  ;;  %5472 = vpow2.f32 %v207_v39  ;;  %v201_v54 = vmul.f32 1.442695, %v169_v22  ;;  %v91_v55 = vmul.f32 %v6828_v59, %v6836_v0 }
  0x8e   :  { %v6874_v28 = vpop.permute.xlu0 %129  ;;  %v165_v31 = vadd.f32 %v6872_v27, %v109_v20  ;;  %v167_v32 = vadd.f32 %v6872_v27, %v111_v21  ;;  %v219_v41 = vmul.f32 1.442695, %v178_v34  ;;  %v223_v50 = vmul.f32 1.442695, %v180_v42 }
  0x8f   :  { %v157_v33 = vadd.f32 %v6874_v28, %v101_v26  ;;  %v159_v38 = vadd.f32 %v6874_v28, %v103_v30  ;;  %v177_v52 = vsub.f32 0.0, %v145_v44  ;;  %v154_v62 = vadd.f32 %v6874_v28, %v98_v25 }
  0x90   :  { %v197_v36 = vsub.f32 0.0, %v165_v31  ;;  %v199_v37 = vsub.f32 0.0, %v167_v32  ;;  %5474 = vpow2.f32 %v219_v41  ;;  %v147_v1 = vadd.f32 %v6834_v63, %v91_v55 }
  0x91   :  { %v189_v40 = vsub.f32 0.0, %v157_v33  ;;  %v191_v47 = vsub.f32 0.0, %v159_v38  ;;  %v217_v60 = vmul.f32 1.442695, %v177_v52  ;;  %v162_v2 = vadd.f32 %v6872_v27, %v106_v19 }
  0x92   :  { %v257_v45 = vmul.f32 1.442695, %v197_v36  ;;  %v261_v46 = vmul.f32 1.442695, %v199_v37  ;;  %v156_v3 = vadd.f32 %v6874_v28, %v100_v29  ;;  %v205_v4 = vmul.f32 1.442695, %v171_v61 }
  0x93   :  { %v241_v49 = vmul.f32 1.442695, %v189_v40  ;;  %v245_v53 = vmul.f32 1.442695, %v191_v47  ;;  %v186_v5 = vsub.f32 0.0, %v154_v62  ;;  %v164_v6 = vadd.f32 %v6872_v27, %v108_v23 }
  0x94   :  { %5476 = vpow2.f32 %v257_v45  ;;  %v179_v8 = vsub.f32 0.0, %v147_v1  ;;  %v194_v14 = vsub.f32 0.0, %v162_v2  ;;  %v188_v15 = vsub.f32 0.0, %v156_v3 }
  0x95   :  { %5478 = vpow2.f32 %v261_v46  ;;  %v153_v16 = vadd.f32 %v6874_v28, %v97_v24  ;;  %v235_v19 = vmul.f32 1.442695, %v186_v5  ;;  %v71_v20 = vsub.s32 7, %v6807_v48 }
  0x96   :  { %5480 = vpow2.f32 %v241_v49  ;;  %v5471_v13 = vpop.eup %5470  ;;  %v221_v18 = vmul.f32 1.442695, %v179_v8  ;;  %v105_v21 = vmul.f32 %v6821_v56, %v6846_v9  ;;  %v196_v22 = vsub.f32 0.0, %v164_v6 }
  0x97   :  { %5482 = vpow2.f32 %v245_v53  ;;  %v266_v17 = vadd.f32 1.0, %v5471_v13  ;;  %v5473_v23 = vpop.eup %5472  ;;  %v6898_v25 = vrot.slane %v6814_v51, %v63_v7  ;;  %v185_v26 = vsub.f32 0.0, %v153_v16 }
  0x98   :  { %5484 = vpow2.f32 %v223_v50  ;;  %v268_v30 = vadd.f32 1.0, %v5473_v23  ;;  %v251_v24 = vmul.f32 1.442695, %v194_v14  ;;  %v161_v31 = vadd.f32 %v6872_v27, %v105_v21 }
  0x99   :  { %5486 = vpow2.f32 %v201_v54  ;;  %v99_v33 = vmul.f32 %v6828_v59, %v6848_v10  ;;  %v239_v34 = vmul.f32 1.442695, %v188_v15  ;;  %v6908_v36 = vrot.slane %v6814_v51, %v71_v20 }
  0x9a   :  { %5488 = vpow2.f32 %v217_v60  ;;  %v5475_v29 = vpop.eup %5474  ;;  %v107_v37 = vmul.f32 %v6828_v59, %v6846_v9  ;;  %v255_v38 = vmul.f32 1.442695, %v196_v22  ;;  %v233_v40 = vmul.f32 1.442695, %v185_v26 }
  0x9b   :  { %5490 = vpow2.f32 %v205_v4  ;;  %v274_v56 = vadd.f32 1.0, %v5475_v29  ;;  %v155_v41 = vadd.f32 %v6874_v28, %v99_v33  ;;  %v193_v44 = vsub.f32 0.0, %v161_v31 }
  0x9c   :  { %5492 = vrcp.f32 %v266_v17  ;;  %v163_v45 = vadd.f32 %v6872_v27, %v107_v37  ;;  %v85_v51 = vmul.f32 %v6851_v11, %v6825_v58  ;;  %v86_v59 = vmul.f32 %v6898_v25, %v6825_v58 }
  0x9d   :  { %5494 = vpow2.f32 %v221_v18  ;;  %v87_v47 = vmul.f32 %v6854_v12, %v6825_v58  ;;  %v88_v50 = vmul.f32 %v6908_v36, %v6825_v58  ;;  %v94_v52 = vmul.f32 %v6898_v25, %v6836_v0 }
  0x9e   :  { %v6901_v32 = vpop.eup %5476  ;;  %5496 = vpow2.f32 %v235_v19  ;;  %v96_v55 = vmul.f32 %v6908_v36, %v6836_v0  ;;  %v187_v61 = vsub.f32 0.0, %v155_v41  ;;  %v249_v2 = vmul.f32 1.442695, %v193_v44 }
  0x9f   :  { %v6905_v35 = vpop.eup %5478  ;;  %5498 = vrcp.f32 %v268_v30  ;;  %v195_v3 = vsub.f32 0.0, %v163_v45  ;;  %v93_v58 = vmul.f32 %v6851_v11, %v6836_v0  ;;  %v142_v6 = vadd.f32 %v6823_v57, %v86_v59 }
  0xa0   :  { %v6912_v39 = vpop.eup %5480  ;;  %5500 = vrcp.f32 %v274_v56  ;;  %v141_v8 = vadd.f32 %v6823_v57, %v85_v51  ;;  %v150_v13 = vadd.f32 %v6834_v63, %v94_v52  ;;  %v144_v14 = vadd.f32 %v6823_v57, %v88_v50 }
  0xa1   :  { %v6915_v42 = vpop.eup %5482  ;;  %5502 = vpow2.f32 %v251_v24  ;;  %v95_v16 = vmul.f32 %v6854_v12, %v6836_v0  ;;  %v237_v18 = vmul.f32 1.442695, %v187_v61  ;;  %v253_v20 = vmul.f32 1.442695, %v195_v3 }
  0xa2   :  { %v5485_v46 = vpop.eup %5484  ;;  %5504 = vpow2.f32 %v239_v34  ;;  %v152_v21 = vadd.f32 %v6834_v63, %v96_v55  ;;  %v149_v23 = vadd.f32 %v6834_v63, %v93_v58  ;;  %v174_v26 = vsub.f32 0.0, %v142_v6 }
  0xa3   :  { %v5487_v49 = vpop.eup %5486  ;;  %v276_v53 = vadd.f32 1.0, %v5485_v46  ;;  %5506 = vpow2.f32 %v255_v38  ;;  %v143_v30 = vadd.f32 %v6823_v57, %v87_v47  ;;  %v182_v0 = vsub.f32 0.0, %v150_v13 }
  0xa4   :  { %v5489_v54 = vpop.eup %5488  ;;  %v265_v60 = vadd.f32 1.0, %v5487_v49  ;;  %5508 = vpow2.f32 %v233_v40  ;;  %v173_v31 = vsub.f32 0.0, %v141_v8  ;;  %v176_v56 = vsub.f32 0.0, %v144_v14 }
  0xa5   :  { %v5491_v62 = vpop.eup %5490  ;;  %5510 = vrcp.f32 %v276_v53  ;;  %v273_v1 = vadd.f32 1.0, %v5489_v54  ;;  %v151_v37 = vadd.f32 %v6834_v63, %v95_v16  ;;  %v184_v40 = vsub.f32 0.0, %v152_v21 }
  0xa6   :  { %v5493_v4 = vpop.eup %5492  ;;  %5512 = vrcp.f32 %v265_v60  ;;  %v267_v5 = vadd.f32 1.0, %v5491_v62  ;;  %v181_v44 = vsub.f32 0.0, %v149_v23  ;;  %v211_v57 = vmul.f32 1.442695, %v174_v26 }
  0xa7   :  { %v5495_v7 = vpop.eup %5494  ;;  %5514 = vrcp.f32 %v273_v1  ;;  %v102_v51 = vmul.f32 %v6898_v25, %v6848_v10  ;;  %v227_v47 = vmul.f32 1.442695, %v182_v0  ;;  %v110_v63 = vmul.f32 %v6898_v25, %v6846_v9 }
  0xa8   :  { %v5497_v15 = vpop.eup %5496  ;;  %v275_v17 = vadd.f32 1.0, %v5495_v7  ;;  %5516 = vrcp.f32 %v267_v5  ;;  %v215_v52 = vmul.f32 1.442695, %v176_v56  ;;  %v231_v54 = vmul.f32 1.442695, %v184_v40 }
  0xa9   :  { %v5499_v11 = vpop.eup %5498  ;;  %v282_v19 = vadd.f32 1.0, %v5497_v15  ;;  %5518 = vpow2.f32 %v249_v2  ;;  %v158_v55 = vadd.f32 %v6874_v28, %v102_v51  ;;  %v166_v62 = vadd.f32 %v6872_v27, %v110_v63 }
  0xaa   :  { %v5501_v22 = vpop.eup %5500  ;;  %5520 = vrcp.f32 %v275_v17  ;;  %v175_v2 = vsub.f32 0.0, %v143_v30  ;;  %v209_v3 = vmul.f32 1.442695, %v173_v31  ;;  %v183_v25 = vsub.f32 0.0, %v151_v37 }
  0xab   :  { %v5503_v29 = vpop.eup %5502  ;;  %v5208_v24 = vpack.c.bf16 %v5501_v22, %v5493_v4  ;;  %5522 = vrcp.f32 %v282_v19  ;;  %v225_v5 = vmul.f32 1.442695, %v181_v44  ;;  %v104_v7 = vmul.f32 %v6908_v36, %v6848_v10 }
  0xac   :  { %v5505_v12 = vpop.eup %5504  ;;  %v290_v33 = vadd.f32 1.0, %v5503_v29  ;;  %5524 = vpow2.f32 %v237_v18  ;;  %v190_v13 = vsub.f32 0.0, %v158_v55  ;;  %v198_v15 = vsub.f32 0.0, %v166_v62 }
  0xad   :  { %v5507_v34 = vpop.eup %5506  ;;  %5209 = vmatprep.subr.bf16.mxu0 %v5208_v24  ;;  %v284_v38 = vadd.f32 1.0, %v5505_v12  ;;  %5526 = vpow2.f32 %v253_v20  ;;  %v213_v18 = vmul.f32 1.442695, %v175_v2  ;;  %v112_v20 = vmul.f32 %v6908_v36, %v6846_v9 }
  0xae   :  { %v5509_v41 = vpop.eup %5508  ;;  %5528 = vrcp.f32 %v290_v33  ;;  %v292_v45 = vadd.f32 1.0, %v5507_v34  ;;  %v229_v10 = vmul.f32 1.442695, %v183_v25  ;;  %v243_v26 = vmul.f32 1.442695, %v190_v13 }
  0xaf   :  { %v5511_v46 = vpop.eup %5510  ;;  %5530 = vrcp.f32 %v284_v38  ;;  %v281_v59 = vadd.f32 1.0, %v5509_v41  ;;  %v259_v30 = vmul.f32 1.442695, %v198_v15  ;;  %v168_v24 = vadd.f32 %v6872_v27, %v112_v20 }
  0xb0   :  { %v5513_v49 = vpop.eup %5512  ;;  %v5216_v50 = vpack.c.bf16 %v5511_v46, %v5499_v11  ;;  %5532 = vrcp.f32 %v292_v45  ;;  %v160_v11 = vadd.f32 %v6874_v28, %v104_v7  ;;  %v285_v63 = vadd.f32 1.0, %v6912_v39  ;;  %v6966_v39 = vld [vmem:[%s8036_s1 + $0x28] sm:$0xff] }
  0xb1   :  { %v5515_v53 = vpop.eup %5514  ;;  %5534 = vrcp.f32 %v281_v59  ;;  %v200_v34 = vsub.f32 0.0, %v168_v24  ;;  %v293_v2 = vadd.f32 1.0, %v6901_v32  ;;  %v6978_v32 = vld [vmem:[%s8036_s1 + $0x30] sm:$0xff]  ;;  %v287_v7 = vadd.f32 1.0, %v6915_v42  ;;  %v5014_v42 = vld [vmem:[%s8036_s1 + $0x38] sm:$0xff] }
  0xb2   :  { %v5517_v60 = vpop.eup %5516  ;;  %5217 = vmatprep.subr.bf16.mxu1 %v5216_v50  ;;  %v5210_v61 = vpack.c.bf16 %v5515_v53, %v5513_v49  ;;  %5536 = vpow2.f32 %v211_v57  ;;  %v192_v28 = vsub.f32 0.0, %v160_v11 }
  0xb3   :  { %v5519_v1 = vpop.eup %5518  ;;  %5538 = vpow2.f32 %v227_v47  ;;  %v263_v51 = vmul.f32 1.442695, %v200_v34  ;;  %v6957_v47 = vld [vmem:[%s8036_s1 + $0x20] sm:$0xff] }
  0xb4   :  { %v5521_v4 = vpop.eup %5520  ;;  %5211 = vmatpush1.bf16.msra.mxu0 %v5210_v61  ;;  %v289_v58 = vadd.f32 1.0, %v5519_v1  ;;  %5540 = vpow2.f32 %v215_v52  ;;  %v247_v40 = vmul.f32 1.442695, %v192_v28 }
  0xb5   :  { %v5523_v6 = vpop.eup %5522  ;;  %v5218_v8 = vpack.c.bf16 %v5521_v4, %v5517_v60  ;;  %5542 = vpow2.f32 %v231_v54 }
  0xb6   :  { %v5525_v14 = vpop.eup %5524  ;;  %5544 = vrcp.f32 %v289_v58 }
  0xb7   :  { %v5527_v16 = vpop.eup %5526  ;;  %5219 = vmatpush1.bf16.msra.mxu1 %v5218_v8  ;;  %v283_v17 = vadd.f32 1.0, %v5525_v14  ;;  %5546 = vpow2.f32 %v209_v3 }
  0xb8   :  { %v5529_v19 = vpop.eup %5528  ;;  %v291_v21 = vadd.f32 1.0, %v5527_v16  ;;  %5548 = vpow2.f32 %v225_v5  ;;  %v295_v16 = vadd.f32 1.0, %v6905_v35 }
  0xb9   :  { %v5531_v22 = vpop.eup %5530  ;;  %v5212_v23 = vpack.c.bf16 %v5529_v19, %v5523_v6  ;;  %5550 = vrcp.f32 %v283_v17 }
  0xba   :  { %v5533_v29 = vpop.eup %5532  ;;  %5552 = vrcp.f32 %v291_v21 }
  0xbb   :  { %v5535_v0 = vpop.eup %5534  ;;  %5213 = vmatprep.subr.bf16.mxu0 %v5212_v23  ;;  %v5220_v12 = vpack.c.bf16 %v5533_v29, %v5531_v22  ;;  %5554 = vpow2.f32 %v213_v18 }
  0xbc   :  { %v5537_v31 = vpop.eup %5536  ;;  %5556 = vpow2.f32 %v229_v10 }
  0xbd   :  { %v5539_v9 = vpop.eup %5538  ;;  %5221 = vmatprep.subr.bf16.mxu1 %v5220_v12  ;;  %v270_v36 = vadd.f32 1.0, %v5537_v31  ;;  %5558 = vpow2.f32 %v243_v26 }
  0xbe   :  { %v5541_v33 = vpop.eup %5540  ;;  %v278_v56 = vadd.f32 1.0, %v5539_v9  ;;  %5560 = vpow2.f32 %v259_v30 }
  0xbf   :  { %v5543_v37 = vpop.eup %5542  ;;  %5562 = vrcp.f32 %v270_v36  ;;  %v272_v38 = vadd.f32 1.0, %v5541_v33  ;;  %v7020_v36 = vpop.permute.xlu0 %341 }
  0xc0   :  { %v5545_v27 = vpop.eup %5544  ;;  %5564 = vrcp.f32 %v278_v56  ;;  %v280_v41 = vadd.f32 1.0, %v5543_v37 }
  0xc1   :  { %v5547_v44 = vpop.eup %5546  ;;  %v5214_v45 = vpack.c.bf16 %v5545_v27, %v5535_v0  ;;  %5566 = vrcp.f32 %v272_v38  ;;  %v7024_v38 = vpop.permute.xlu1 %346 }
  0xc2   :  { %v5549_v57 = vpop.eup %5548  ;;  %5568 = vrcp.f32 %v280_v41  ;;  %v269_v46 = vadd.f32 1.0, %v5547_v44 }
  0xc3   :  { %v5551_v59 = vpop.eup %5550  ;;  %5215 = vmatpush1.bf16.msra.mxu0 %v5214_v45  ;;  %v277_v49 = vadd.f32 1.0, %v5549_v57  ;;  %5570 = vpow2.f32 %v247_v40 }
  0xc4   :  { %v5553_v50 = vpop.eup %5552  ;;  %5572 = vrcp.f32 %v269_v46 }
  0xc5   :  { %v5555_v52 = vpop.eup %5554  ;;  %v5222_v53 = vpack.c.bf16 %v5553_v50, %v5551_v59  ;;  %5574 = vrcp.f32 %v277_v49  ;;  %v7030_v50 = vpop.permute.xlu0 %351 }
  0xc6   :  { %v5557_v54 = vpop.eup %5556  ;;  %5019 = vmatmul.mubr.msk.f32.vlgmr.msra.gmra.mrb[0].mxu0 %vm359_vm0, %v6957_v47  ;;  %v271_v55 = vadd.f32 1.0, %v5555_v52  ;;  %5576 = vpow2.f32 %v263_v51 }
  0xc7   :  { %v5559_v60 = vpop.eup %5558  ;;  %5223 = vmatpush1.bf16.msra.mxu1 %v5222_v53  ;;  %v279_v61 = vadd.f32 1.0, %v5557_v54  ;;  %442 = vmatprep.mubr.f32.mxu0 %v6647_v43  ;;  %5578 = vrcp.f32 %v285_v63 }
  0xc8   :  { %v5561_v62 = vpop.eup %5560  ;;  %5580 = vrcp.f32 %v271_v55  ;;  %v286_v1 = vadd.f32 1.0, %v5559_v60 }
  0xc9   :  { %v5563_v3 = vpop.eup %5562  ;;  %5582 = vrcp.f32 %v279_v61  ;;  %v294_v4 = vadd.f32 1.0, %v5561_v62 }
  0xca   :  { %v5565_v25 = vpop.eup %5564  ;;  %5023 = vmatmul.mubr.msk.f32.vlgmr.msra.gmra.mrb[0].mxu1 %vm359_vm0, %v6957_v47  ;;  %5584 = vrcp.f32 %v286_v1  ;;  %5020 = vmatmul.mubr.msk.f32.gmra.mrb[2].mxu0 %vm359_vm0, %v6966_v39 }
  0xcb   :  { %v5567_v58 = vpop.eup %5566  ;;  %v5224_v5 = vpack.c.bf16 %v5565_v25, %v5563_v3  ;;  %5586 = vrcp.f32 %v294_v4  ;;  %531 = vmatprep.mubr.f32.mxu1 %v6647_v43  ;;  %448 = vmatprep.mubr.f32.mxu0 %v6647_v43 }
  0xcc   :  { %v5569_v6 = vpop.eup %5568  ;;  %5588 = vrcp.f32 %v293_v2 }
  0xcd   :  { %v5571_v8 = vpop.eup %5570  ;;  %5225 = vmatprep.subr.bf16.mxu0 %v5224_v5  ;;  %v5232_v13 = vpack.c.bf16 %v5569_v6, %v5567_v58  ;;  %5590 = vrcp.f32 %v287_v7 }
  0xce   :  { %v5573_v14 = vpop.eup %5572  ;;  %v288_v15 = vadd.f32 1.0, %v5571_v8  ;;  %5024 = vmatmul.mubr.msk.f32.gmra.mrb[2].mxu1 %vm359_vm0, %v6966_v39  ;;  %5021 = vmatmul.mubr.msk.f32.gmra.mrb[4].mxu0 %vm359_vm0, %v6978_v32 }
  0xcf   :  { %v5575_v17 = vpop.eup %5574  ;;  %5233 = vmatprep.subr.bf16.mxu1 %v5232_v13  ;;  %537 = vmatprep.mubr.f32.mxu1 %v6647_v43 }
  0xd0   :  { %v5577_v18 = vpop.eup %5576  ;;  %v5226_v11 = vpack.c.bf16 %v5575_v17, %v5573_v14  ;;  %454 = vmatprep.mubr.f32.mxu0 %v6647_v43  ;;  %5592 = vrcp.f32 %v288_v15 }
  0xd1   :  { %v5579_v19 = vpop.eup %5578  ;;  %v296_v20 = vadd.f32 1.0, %v5577_v18  ;;  %5594 = vrcp.f32 %v295_v16 }
  0xd2   :  { %v5581_v35 = vpop.eup %5580  ;;  %5227 = vmatpush1.bf16.msra.mxu0 %v5226_v11  ;;  %5025 = vmatmul.mubr.msk.f32.gmra.mrb[4].mxu1 %vm359_vm0, %v6978_v32 }
  0xd3   :  { %v5583_v21 = vpop.eup %5582  ;;  %5596 = vrcp.f32 %v296_v20  ;;  %543 = vmatprep.mubr.f32.mxu1 %v6647_v43  ;;  %5022 = vmatmul.mubr.msk.f32.gmra.mrb[6].mxu0 %vm359_vm0, %v5014_v42 }
  0xd4   :  { %v5585_v10 = vpop.eup %5584  ;;  %v5234_v22 = vpack.c.bf16 %v5583_v21, %v5581_v35  ;;  %614 = vmatprep.mubr.f32.mxu0 %v6647_v43 }
  0xd5   :  { %v5587_v23 = vpop.eup %5586 }
  0xd6   :  { %v5589_v26 = vpop.eup %5588  ;;  %5235 = vmatpush1.bf16.msra.mxu1 %v5234_v22  ;;  %v5228_v29 = vpack.c.bf16 %v5587_v23, %v5585_v10 }
  0xd7   :  { %v5230_v30 = vpack.c.bf16 %v5589_v26, %v5579_v19  ;;  %5026 = vmatmul.mubr.msk.f32.gmra.mrb[6].mxu1 %vm359_vm0, %v5014_v42  ;;  %v5591_v24 = vpop.eup %5590 }
  0xd8   :  { %5229 = vmatprep.subr.bf16.mxu0 %v5228_v29  ;;  %703 = vmatprep.mubr.f32.mxu1 %v6647_v43 }
  0xd9   :  { %5231 = vmatpush1.bf16.msra.mxu0 %v5230_v30 }
  0xda   :  { %v5593_v0 = vpop.eup %5592 }
  0xdb   :  { %v5595_v12 = vpop.eup %5594 }
  0xdc   :  { %5027 = vmatmul.mubr.msk.f32.vlgmr.msra.gmra.mrb[8].mxu0 %vm359_vm0, %v6957_v47  ;;  %v5238_v9 = vpack.c.bf16 %v5595_v12, %v5591_v24 }
  0xdd   :  { %v5597_v28 = vpop.eup %5596  ;;  %620 = vmatprep.mubr.f32.mxu0 %v6647_v43 }
  0xde   :  { %v5236_v31 = vpack.c.bf16 %v5597_v28, %v5593_v0 }
  0xe0   :  { %5237 = vmatprep.subr.bf16.mxu1 %v5236_v31  ;;  %5028 = vmatmul.mubr.msk.f32.gmra.mrb[10].mxu0 %vm359_vm0, %v6966_v39 }
  0xe1   :  { %5239 = vmatpush1.bf16.msra.mxu1 %v5238_v9  ;;  %626 = vmatprep.mubr.f32.mxu0 %v6647_v43 }
  0xe4   :  { %5031 = vmatmul.mubr.msk.f32.vlgmr.msra.gmra.mrb[8].mxu1 %vm359_vm0, %v6957_v47  ;;  %5029 = vmatmul.mubr.msk.f32.gmra.mrb[12].mxu0 %vm359_vm0, %v6978_v32 }
  0xe5   :  { %709 = vmatprep.mubr.f32.mxu1 %v6647_v43  ;;  %632 = vmatprep.mubr.f32.mxu0 %v6647_v43 }
  0xe8   :  { %5032 = vmatmul.mubr.msk.f32.gmra.mrb[10].mxu1 %vm359_vm0, %v6966_v39  ;;  %5030 = vmatmul.mubr.msk.f32.gmra.mrb[14].mxu0 %vm359_vm0, %v5014_v42 }
  0xe9   :  { %715 = vmatprep.mubr.f32.mxu1 %v6647_v43  ;;  %994 = vmatprep.mubr.f32.mxu0 %v6647_v43 }
  0xec   :  { %5033 = vmatmul.mubr.msk.f32.gmra.mrb[12].mxu1 %vm359_vm0, %v6978_v32 }
  0xed   :  { %721 = vmatprep.mubr.f32.mxu1 %v6647_v43 }
  0xf0   :  { %5034 = vmatmul.mubr.msk.f32.gmra.mrb[14].mxu1 %vm359_vm0, %v5014_v42  ;;  %v7037_v42 = vpop.permute.xlu1 %356 }
  0xf1   :  { %1083 = vmatprep.mubr.f32.mxu1 %v6647_v43 }
 0x199   :  { %v438_v33 = vpop.f32.mrb[0].mxu0 }
 0x19a   :  { %v439_v56 = vadd.f32 %v438_v33, %v7020_v36  ;;  %v440_v34 = vpop.f32.mrb[1].mxu0 }
 0x19b   :  { %v441_v37 = vadd.f32 %v440_v34, %v7020_v36 }
 0x19c   :  { %v728_v40 = vsub.f32 0.0, %v439_v56 }
 0x19d   :  { %v527_v27 = vpop.f32.mrb[0].mxu1  ;;  %v729_v41 = vsub.f32 0.0, %v441_v37  ;;  %v444_v44 = vpop.f32.mrb[2].mxu0 }
 0x19e   :  { %v760_v45 = vmul.f32 1.442695, %v728_v40  ;;  %v528_v57 = vadd.f32 %v527_v27, %v7020_v36  ;;  %v529_v46 = vpop.f32.mrb[1].mxu1  ;;  %v445_v51 = vadd.f32 %v444_v44, %v7024_v38  ;;  %v446_v59 = vpop.f32.mrb[3].mxu0 }
 0x19f   :  { %v762_v47 = vmul.f32 1.442695, %v729_v41  ;;  %v530_v49 = vadd.f32 %v529_v46, %v7020_v36  ;;  %v447_v63 = vadd.f32 %v446_v59, %v7024_v38 }
 0x1a0   :  { %5598 = vpow2.f32 %v760_v45  ;;  %v730_v52 = vsub.f32 0.0, %v528_v57  ;;  %v736_v53 = vsub.f32 0.0, %v445_v51 }
 0x1a1   :  { %5600 = vpow2.f32 %v762_v47  ;;  %v731_v54 = vsub.f32 0.0, %v530_v49  ;;  %v533_v55 = vpop.f32.mrb[2].mxu1  ;;  %v737_v60 = vsub.f32 0.0, %v447_v63  ;;  %v450_v61 = vpop.f32.mrb[4].mxu0 }
 0x1a2   :  { %v764_v39 = vmul.f32 1.442695, %v730_v52  ;;  %v776_v62 = vmul.f32 1.442695, %v736_v53  ;;  %v534_v1 = vadd.f32 %v533_v55, %v7024_v38  ;;  %v535_v2 = vpop.f32.mrb[3].mxu1  ;;  %v451_v3 = vadd.f32 %v450_v61, %v7030_v50  ;;  %v452_v4 = vpop.f32.mrb[5].mxu0 }
 0x1a3   :  { %v766_v25 = vmul.f32 1.442695, %v731_v54  ;;  %v778_v58 = vmul.f32 1.442695, %v737_v60  ;;  %v536_v5 = vadd.f32 %v535_v2, %v7024_v38  ;;  %v453_v32 = vadd.f32 %v452_v4, %v7030_v50 }
 0x1a4   :  { %5602 = vpow2.f32 %v764_v39  ;;  %v738_v6 = vsub.f32 0.0, %v534_v1  ;;  %v744_v7 = vsub.f32 0.0, %v451_v3 }
 0x1a5   :  { %5604 = vpow2.f32 %v766_v25  ;;  %v739_v8 = vsub.f32 0.0, %v536_v5  ;;  %v539_v13 = vpop.f32.mrb[4].mxu1  ;;  %v745_v14 = vsub.f32 0.0, %v453_v32 }
 0x1a6   :  { %5606 = vpow2.f32 %v776_v62  ;;  %v780_v15 = vmul.f32 1.442695, %v738_v6  ;;  %v792_v16 = vmul.f32 1.442695, %v744_v7  ;;  %v540_v17 = vadd.f32 %v539_v13, %v7030_v50  ;;  %v541_v18 = vpop.f32.mrb[5].mxu1  ;;  %v456_v11 = vpop.f32.mrb[6].mxu0 }
 0x1a7   :  { %5608 = vpow2.f32 %v778_v58  ;;  %v782_v19 = vmul.f32 1.442695, %v739_v8  ;;  %v794_v20 = vmul.f32 1.442695, %v745_v14  ;;  %v542_v35 = vadd.f32 %v541_v18, %v7030_v50  ;;  %v458_v21 = vpop.f32.mrb[7].mxu0 }
 0x1a8   :  { %5610 = vpow2.f32 %v780_v15  ;;  %v746_v10 = vsub.f32 0.0, %v540_v17  ;;  %v457_v22 = vadd.f32 %v456_v11, %v7037_v42  ;;  %v459_v27 = vadd.f32 %v458_v21, %v7037_v42 }
 0x1a9   :  { %5612 = vpow2.f32 %v782_v19  ;;  %v747_v23 = vsub.f32 0.0, %v542_v35 }
 0x1aa   :  { %v5599_v26 = vpop.eup %5598  ;;  %5614 = vpow2.f32 %v792_v16  ;;  %v796_v29 = vmul.f32 1.442695, %v746_v10  ;;  %v752_v30 = vsub.f32 0.0, %v457_v22  ;;  %v545_v24 = vpop.f32.mrb[6].mxu1  ;;  %v753_v54 = vsub.f32 0.0, %v459_v27 }
 0x1ab   :  { %v5601_v0 = vpop.eup %5600  ;;  %v824_v12 = vadd.f32 1.0, %v5599_v26  ;;  %5616 = vpow2.f32 %v794_v20  ;;  %v798_v28 = vmul.f32 1.442695, %v747_v23  ;;  %v547_v31 = vpop.f32.mrb[7].mxu1  ;;  %v546_v34 = vadd.f32 %v545_v24, %v7037_v42 }
 0x1ac   :  { %v825_v9 = vadd.f32 1.0, %v5601_v0  ;;  %5618 = vpow2.f32 %v796_v29  ;;  %v808_v33 = vmul.f32 1.442695, %v752_v30  ;;  %v548_v59 = vadd.f32 %v547_v31, %v7037_v42 }
 0x1ad   :  { %5620 = vrcp.f32 %v824_v12  ;;  %v754_v63 = vsub.f32 0.0, %v546_v34  ;;  %v810_v8 = vmul.f32 1.442695, %v753_v54 }
 0x1ae   :  { %v5603_v56 = vpop.eup %5602  ;;  %5622 = vrcp.f32 %v825_v9  ;;  %v755_v4 = vsub.f32 0.0, %v548_v59 }
 0x1af   :  { %v5605_v37 = vpop.eup %5604  ;;  %v826_v40 = vadd.f32 1.0, %v5603_v56  ;;  %5624 = vpow2.f32 %v798_v28  ;;  %v616_v41 = vpop.f32.mrb[8].mxu0  ;;  %v812_v5 = vmul.f32 1.442695, %v754_v63 }
 0x1b0   :  { %v5607_v44 = vpop.eup %5606  ;;  %v827_v45 = vadd.f32 1.0, %v5605_v37  ;;  %5626 = vpow2.f32 %v808_v33  ;;  %v618_v57 = vpop.f32.mrb[9].mxu0  ;;  %v617_v55 = vadd.f32 %v616_v41, %v7020_v36  ;;  %v814_v35 = vmul.f32 1.442695, %v755_v4 }
 0x1b1   :  { %v5609_v46 = vpop.eup %5608  ;;  %5628 = vrcp.f32 %v826_v40  ;;  %v832_v51 = vadd.f32 1.0, %v5607_v44  ;;  %v619_v62 = vadd.f32 %v618_v57, %v7020_v36 }
 0x1b2   :  { %v5611_v47 = vpop.eup %5610  ;;  %5630 = vrcp.f32 %v827_v45  ;;  %v833_v49 = vadd.f32 1.0, %v5609_v46  ;;  %v732_v13 = vsub.f32 0.0, %v617_v55 }
 0x1b3   :  { %v5613_v52 = vpop.eup %5612  ;;  %5632 = vrcp.f32 %v832_v51  ;;  %v834_v53 = vadd.f32 1.0, %v5611_v47  ;;  %v622_v60 = vpop.f32.mrb[10].mxu0  ;;  %v733_v18 = vsub.f32 0.0, %v619_v62 }
 0x1b4   :  { %v5615_v61 = vpop.eup %5614  ;;  %5634 = vrcp.f32 %v833_v49  ;;  %v835_v39 = vadd.f32 1.0, %v5613_v52  ;;  %v624_v1 = vpop.f32.mrb[11].mxu0  ;;  %v623_v32 = vadd.f32 %v622_v60, %v7024_v38  ;;  %v768_v0 = vmul.f32 1.442695, %v732_v13 }
 0x1b5   :  { %v5617_v2 = vpop.eup %5616  ;;  %5636 = vrcp.f32 %v834_v53  ;;  %v840_v3 = vadd.f32 1.0, %v5615_v61  ;;  %v625_v10 = vadd.f32 %v624_v1, %v7024_v38  ;;  %v770_v56 = vmul.f32 1.442695, %v733_v18 }
 0x1b6   :  { %v5619_v25 = vpop.eup %5618  ;;  %5638 = vrcp.f32 %v835_v39  ;;  %v841_v58 = vadd.f32 1.0, %v5617_v2  ;;  %v740_v29 = vsub.f32 0.0, %v623_v32 }
 0x1b7   :  { %v7047_v6 = vpop.eup %5620  ;;  %5640 = vrcp.f32 %v840_v3  ;;  %v842_v7 = vadd.f32 1.0, %v5619_v25  ;;  %v705_v14 = vpop.f32.mrb[8].mxu1  ;;  %v741_v27 = vsub.f32 0.0, %v625_v10 }
 0x1b8   :  { %v628_v15 = vpop.f32.mrb[12].mxu0  ;;  %v5623_v16 = vpop.eup %5622  ;;  %5642 = vrcp.f32 %v841_v58  ;;  %v706_v17 = vadd.f32 %v705_v14, %v7020_v36  ;;  %v784_v46 = vmul.f32 1.442695, %v740_v29 }
 0x1b9   :  { %v707_v11 = vpop.f32.mrb[9].mxu1  ;;  %v7050_v19 = vpop.f32.mrb[13].mxu0  ;;  %5644 = vrcp.f32 %v842_v7  ;;  %v629_v44 = vadd.f32 %v628_v15, %v7030_v50  ;;  %v786_v61 = vmul.f32 1.442695, %v741_v27 }
 0x1ba   :  { %v5625_v20 = vpop.eup %5624  ;;  %v708_v21 = vadd.f32 %v707_v11, %v7020_v36  ;;  %5646 = vpow2.f32 %v812_v5  ;;  %v734_v26 = vsub.f32 0.0, %v706_v17  ;;  %v631_v18 = vadd.f32 %v7050_v19, %v7030_v50 }
 0x1bb   :  { %v5627_v22 = vpop.eup %5626  ;;  %v843_v23 = vadd.f32 1.0, %v5625_v20  ;;  %5648 = vpow2.f32 %v810_v8  ;;  %v711_v28 = vpop.f32.mrb[10].mxu1  ;;  %v748_v39 = vsub.f32 0.0, %v629_v44 }
 0x1bc   :  { %v5629_v30 = vpop.eup %5628  ;;  %v848_v24 = vadd.f32 1.0, %v5627_v22  ;;  %v735_v12 = vsub.f32 0.0, %v708_v21  ;;  %v7054_v31 = vpop.f32.mrb[14].mxu0  ;;  %v772_v33 = vmul.f32 1.442695, %v734_v26  ;;  %v712_v36 = vadd.f32 %v711_v28, %v7024_v38 }
 0x1bd   :  { %v5631_v9 = vpop.eup %5630  ;;  %5650 = vrcp.f32 %v843_v23  ;;  %v713_v34 = vpop.f32.mrb[11].mxu1  ;;  %v800_v8 = vmul.f32 1.442695, %v748_v39  ;;  %v635_v19 = vadd.f32 %v7054_v31, %v7037_v42  ;;  %v7087_v39 = vld [vmem:[%s8036_s1 + $0x40] sm:$0xff] }
 0x1be   :  { %v7057_v37 = vpop.f32.mrb[15].mxu0  ;;  %v5633_v40 = vpop.eup %5632  ;;  %5652 = vrcp.f32 %v848_v24  ;;  %v714_v41 = vadd.f32 %v713_v34, %v7024_v38  ;;  %v774_v57 = vmul.f32 1.442695, %v735_v12  ;;  %v742_v51 = vsub.f32 0.0, %v712_v36 }
 0x1bf   :  { %v5635_v45 = vpop.eup %5634  ;;  %5654 = vpow2.f32 %v814_v35  ;;  %v717_v49 = vpop.f32.mrb[12].mxu1  ;;  %v5242_v52 = vpack.c.bf16 %v5633_v40, %v7047_v6  ;;  %v749_v24 = vsub.f32 0.0, %v631_v18  ;;  %v756_v44 = vsub.f32 0.0, %v635_v19 }
 0x1c0   :  { %v5637_v59 = vpop.eup %5636  ;;  %5656 = vpow2.f32 %v768_v0  ;;  %v743_v47 = vsub.f32 0.0, %v714_v41  ;;  %v5240_v63 = vpack.c.bf16 %v5635_v45, %v5623_v16  ;;  %v788_v54 = vmul.f32 1.442695, %v742_v51  ;;  %v719_v38 = vpop.f32.mrb[13].mxu1 }
 0x1c1   :  { %v5639_v53 = vpop.eup %5638  ;;  %5658 = vpow2.f32 %v772_v33  ;;  %v718_v55 = vadd.f32 %v717_v49, %v7030_v50  ;;  %v5250_v58 = vpack.c.bf16 %v5637_v59, %v5629_v30  ;;  %v720_v21 = vadd.f32 %v719_v38, %v7030_v50 }
 0x1c2   :  { %v7063_v60 = vpop.eup %5640  ;;  %5660 = vpow2.f32 %v770_v56  ;;  %5241 = vmatprep.subr.bf16.mxu0 %v5240_v63  ;;  %v790_v1 = vmul.f32 1.442695, %v743_v47  ;;  %v5248_v3 = vpack.c.bf16 %v5639_v53, %v5631_v9  ;;  %v637_v56 = vadd.f32 %v7057_v37, %v7037_v42 }
 0x1c3   :  { %v7065_v62 = vpop.eup %5642  ;;  %5662 = vpow2.f32 %v774_v57  ;;  %v750_v2 = vsub.f32 0.0, %v718_v55  ;;  %5243 = vmatpush1.bf16.msra.mxu0 %v5242_v52  ;;  %v723_v25 = vpop.f32.mrb[14].mxu1  ;;  %v751_v28 = vsub.f32 0.0, %v720_v21  ;;  %v802_v41 = vmul.f32 1.442695, %v749_v24 }
 0x1c4   :  { %v7067_v4 = vpop.eup %5644  ;;  %5664 = vpow2.f32 %v784_v46  ;;  %v725_v32 = vpop.f32.mrb[15].mxu1  ;;  %5249 = vmatprep.subr.bf16.mxu1 %v5248_v3  ;;  %v724_v9 = vadd.f32 %v723_v25, %v7037_v42  ;;  %v757_v47 = vsub.f32 0.0, %v637_v56  ;;  %v816_v53 = vmul.f32 1.442695, %v756_v44  ;;  %v7095_v25 = vld [vmem:[%s8036_s1 + $0x48] sm:$0xff] }
 0x1c5   :  { %v5647_v5 = vpop.eup %5646  ;;  %5666 = vpow2.f32 %v788_v54  ;;  %5251 = vmatpush1.bf16.msra.mxu1 %v5250_v58  ;;  %v804_v15 = vmul.f32 1.442695, %v750_v2  ;;  %v726_v40 = vadd.f32 %v725_v32, %v7037_v42  ;;  %v806_v46 = vmul.f32 1.442695, %v751_v28 }
 0x1c6   :  { %v5649_v6 = vpop.eup %5648  ;;  %v850_v7 = vadd.f32 1.0, %v5647_v5  ;;  %5668 = vpow2.f32 %v786_v61  ;;  %v758_v51 = vsub.f32 0.0, %v724_v9 }
 0x1c7   :  { %v7069_v13 = vpop.eup %5650  ;;  %v849_v14 = vadd.f32 1.0, %v5649_v6  ;;  %5670 = vpow2.f32 %v790_v1  ;;  %v759_v63 = vsub.f32 0.0, %v726_v40 }
 0x1c8   :  { %v5653_v16 = vpop.eup %5652  ;;  %5672 = vrcp.f32 %v850_v7  ;;  %v820_v55 = vmul.f32 1.442695, %v758_v51 }
 0x1c9   :  { %v5655_v17 = vpop.eup %5654  ;;  %5674 = vrcp.f32 %v849_v14  ;;  %v5246_v11 = vpack.c.bf16 %v5653_v16, %v7063_v60  ;;  %v818_v60 = vmul.f32 1.442695, %v757_v47  ;;  %v822_v2 = vmul.f32 1.442695, %v759_v63 }
 0x1ca   :  { %v5657_v20 = vpop.eup %5656  ;;  %v851_v35 = vadd.f32 1.0, %v5655_v17  ;;  %5676 = vpow2.f32 %v800_v8 }
 0x1cb   :  { %v5659_v10 = vpop.eup %5658  ;;  %v828_v22 = vadd.f32 1.0, %v5657_v20  ;;  %5678 = vpow2.f32 %v804_v15 }
 0x1cc   :  { %v5661_v23 = vpop.eup %5660  ;;  %5680 = vrcp.f32 %v851_v35  ;;  %v830_v26 = vadd.f32 1.0, %v5659_v10 }
 0x1cd   :  { %v5663_v29 = vpop.eup %5662  ;;  %5682 = vrcp.f32 %v828_v22  ;;  %v829_v30 = vadd.f32 1.0, %v5661_v23  ;;  %v5038_v22 = vld [vmem:[%s8036_s1 + $0x58] sm:$0xff] }
 0x1ce   :  { %v5665_v0 = vpop.eup %5664  ;;  %5684 = vrcp.f32 %v830_v26  ;;  %v831_v12 = vadd.f32 1.0, %v5663_v29 }
 0x1cf   :  { %v5667_v50 = vpop.eup %5666  ;;  %5686 = vrcp.f32 %v829_v30  ;;  %v836_v33 = vadd.f32 1.0, %v5665_v0 }
 0x1d0   :  { %v5669_v36 = vpop.eup %5668  ;;  %5688 = vrcp.f32 %v831_v12  ;;  %v838_v34 = vadd.f32 1.0, %v5667_v50 }
 0x1d1   :  { %v5671_v27 = vpop.eup %5670  ;;  %5690 = vrcp.f32 %v836_v33  ;;  %v837_v31 = vadd.f32 1.0, %v5669_v36 }
 0x1d2   :  { %v5673_v45 = vpop.eup %5672  ;;  %5692 = vrcp.f32 %v838_v34  ;;  %v839_v57 = vadd.f32 1.0, %v5671_v27 }
 0x1d3   :  { %v5675_v59 = vpop.eup %5674  ;;  %5694 = vrcp.f32 %v837_v31  ;;  %v5254_v37 = vpack.c.bf16 %v5673_v45, %v7067_v4  ;;  %v7140_v31 = vpop.permute.xlu0 %900 }
 0x1d4   :  { %v5677_v49 = vpop.eup %5676  ;;  %5696 = vrcp.f32 %v839_v57  ;;  %v5244_v42 = vpack.c.bf16 %v5675_v59, %v7065_v62 }
 0x1d5   :  { %v5679_v52 = vpop.eup %5678  ;;  %5698 = vpow2.f32 %v802_v41  ;;  %v844_v8 = vadd.f32 1.0, %v5677_v49 }
 0x1d6   :  { %v5681_v54 = vpop.eup %5680  ;;  %5700 = vpow2.f32 %v806_v46  ;;  %5245 = vmatprep.subr.bf16.mxu0 %v5244_v42  ;;  %v846_v15 = vadd.f32 1.0, %v5679_v52  ;;  %v7144_v46 = vpop.permute.xlu1 %905 }
 0x1d7   :  { %v5683_v38 = vpop.eup %5682  ;;  %v5252_v61 = vpack.c.bf16 %v5681_v54, %v7069_v13  ;;  %5247 = vmatpush1.bf16.msra.mxu0 %v5246_v11  ;;  %5702 = vpow2.f32 %v816_v53  ;;  %v5037_v11 = vld [vmem:[%s8036_s1 + $0x50] sm:$0xff] }
 0x1d8   :  { %v5685_v1 = vpop.eup %5684  ;;  %5704 = vpow2.f32 %v820_v55 }
 0x1d9   :  { %v5687_v62 = vpop.eup %5686  ;;  %5253 = vmatprep.subr.bf16.mxu1 %v5252_v61  ;;  %5706 = vpow2.f32 %v818_v60 }
 0x1da   :  { %v5689_v3 = vpop.eup %5688  ;;  %5255 = vmatpush1.bf16.msra.mxu1 %v5254_v37  ;;  %5043 = vmatmul.mubr.msk.f32.vlgmr.msra.gmra.mrb[16].mxu0 %vm359_vm0, %v7087_v39  ;;  %5708 = vpow2.f32 %v822_v2 }
 0x1db   :  { %v5691_v4 = vpop.eup %5690  ;;  %1000 = vmatprep.mubr.f32.mxu0 %v6647_v43  ;;  %5710 = vrcp.f32 %v844_v8 }
 0x1dc   :  { %v5693_v58 = vpop.eup %5692  ;;  %v5258_v5 = vpack.c.bf16 %v5691_v4, %v5683_v38  ;;  %5712 = vrcp.f32 %v846_v15 }
 0x1dd   :  { %v5695_v32 = vpop.eup %5694  ;;  %5047 = vmatmul.mubr.msk.f32.vlgmr.msra.gmra.mrb[16].mxu1 %vm359_vm0, %v7087_v39  ;;  %v5266_v6 = vpack.c.bf16 %v5693_v58, %v5685_v1 }
 0x1de   :  { %v5697_v7 = vpop.eup %5696  ;;  %1089 = vmatprep.mubr.f32.mxu1 %v6647_v43  ;;  %5044 = vmatmul.mubr.msk.f32.gmra.mrb[18].mxu0 %vm359_vm0, %v7095_v25  ;;  %v5256_v13 = vpack.c.bf16 %v5695_v32, %v5687_v62 }
 0x1df   :  { %v5699_v14 = vpop.eup %5698  ;;  %v5264_v16 = vpack.c.bf16 %v5697_v7, %v5689_v3  ;;  %1006 = vmatprep.mubr.f32.mxu0 %v6647_v43 }
 0x1e0   :  { %v5701_v17 = vpop.eup %5700  ;;  %v845_v18 = vadd.f32 1.0, %v5699_v14  ;;  %5257 = vmatprep.subr.bf16.mxu0 %v5256_v13 }
 0x1e1   :  { %v847_v20 = vadd.f32 1.0, %v5701_v17  ;;  %5048 = vmatmul.mubr.msk.f32.gmra.mrb[18].mxu1 %vm359_vm0, %v7095_v25  ;;  %5265 = vmatprep.subr.bf16.mxu1 %v5264_v16  ;;  %v5703_v35 = vpop.eup %5702 }
 0x1e2   :  { %5259 = vmatpush1.bf16.msra.mxu0 %v5258_v5  ;;  %5267 = vmatpush1.bf16.msra.mxu1 %v5266_v6  ;;  %v5705_v21 = vpop.eup %5704  ;;  %5714 = vrcp.f32 %v845_v18  ;;  %v852_v10 = vadd.f32 1.0, %v5703_v35 }
 0x1e3   :  { %1095 = vmatprep.mubr.f32.mxu1 %v6647_v43  ;;  %5045 = vmatmul.mubr.msk.f32.gmra.mrb[20].mxu0 %vm359_vm0, %v5037_v11  ;;  %v5707_v23 = vpop.eup %5706  ;;  %5716 = vrcp.f32 %v847_v20  ;;  %v854_v26 = vadd.f32 1.0, %v5705_v21  ;;  %v7157_v21 = vpop.permute.xlu1 %915 }
 0x1e4   :  { %1012 = vmatprep.mubr.f32.mxu0 %v6647_v43  ;;  %v5709_v29 = vpop.eup %5708  ;;  %5718 = vrcp.f32 %v852_v10  ;;  %v853_v30 = vadd.f32 1.0, %v5707_v23 }
 0x1e5   :  { %5049 = vmatmul.mubr.msk.f32.gmra.mrb[20].mxu1 %vm359_vm0, %v5037_v11  ;;  %5720 = vrcp.f32 %v854_v26  ;;  %v855_v24 = vadd.f32 1.0, %v5709_v29  ;;  %v5711_v19 = vpop.eup %5710 }
 0x1e6   :  { %1101 = vmatprep.mubr.f32.mxu1 %v6647_v43  ;;  %5722 = vrcp.f32 %v853_v30  ;;  %v5713_v0 = vpop.eup %5712 }
 0x1e7   :  { %5046 = vmatmul.mubr.msk.f32.gmra.mrb[22].mxu0 %vm359_vm0, %v5038_v22  ;;  %5724 = vrcp.f32 %v855_v24 }
 0x1e8   :  { %1172 = vmatprep.mubr.f32.mxu0 %v6647_v43 }
 0x1e9   :  { %5050 = vmatmul.mubr.msk.f32.gmra.mrb[22].mxu1 %vm359_vm0, %v5038_v22 }
 0x1ea   :  { %1261 = vmatprep.mubr.f32.mxu1 %v6647_v43 }
 0x1ec   :  { %v5715_v12 = vpop.eup %5714 }
 0x1ed   :  { %v5717_v28 = vpop.eup %5716 }
 0x1ee   :  { %v5719_v9 = vpop.eup %5718 }
 0x1ef   :  { %v5721_v50 = vpop.eup %5720  ;;  %v5262_v33 = vpack.c.bf16 %v5719_v9, %v5711_v19 }
 0x1f0   :  { %v5723_v56 = vpop.eup %5722  ;;  %v5270_v36 = vpack.c.bf16 %v5721_v50, %v5713_v0 }
 0x1f1   :  { %v5725_v34 = vpop.eup %5724  ;;  %v5260_v40 = vpack.c.bf16 %v5723_v56, %v5715_v12 }
 0x1f2   :  { %v5268_v27 = vpack.c.bf16 %v5725_v34, %v5717_v28 }
 0x1f3   :  { %5261 = vmatprep.subr.bf16.mxu0 %v5260_v40 }
 0x1f4   :  { %5269 = vmatprep.subr.bf16.mxu1 %v5268_v27  ;;  %5263 = vmatpush1.bf16.msra.mxu0 %v5262_v33 }
 0x1f5   :  { %5271 = vmatpush1.bf16.msra.mxu1 %v5270_v36 }
 0x1f7   :  { %5051 = vmatmul.mubr.msk.f32.vlgmr.msra.gmra.mrb[24].mxu0 %vm359_vm0, %v7087_v39 }
 0x1f8   :  { %5055 = vmatmul.mubr.msk.f32.vlgmr.msra.gmra.mrb[24].mxu1 %vm359_vm0, %v7087_v39  ;;  %1178 = vmatprep.mubr.f32.mxu0 %v6647_v43 }
 0x1f9   :  { %1267 = vmatprep.mubr.f32.mxu1 %v6647_v43 }
 0x1fb   :  { %5052 = vmatmul.mubr.msk.f32.gmra.mrb[26].mxu0 %vm359_vm0, %v7095_v25 }
 0x1fc   :  { %5056 = vmatmul.mubr.msk.f32.gmra.mrb[26].mxu1 %vm359_vm0, %v7095_v25  ;;  %1184 = vmatprep.mubr.f32.mxu0 %v6647_v43  ;;  %v7151_v25 = vpop.permute.xlu0 %910 }
 0x1fd   :  { %1273 = vmatprep.mubr.f32.mxu1 %v6647_v43 }
 0x1ff   :  { %5053 = vmatmul.mubr.msk.f32.gmra.mrb[28].mxu0 %vm359_vm0, %v5037_v11 }
 0x200   :  { %5057 = vmatmul.mubr.msk.f32.gmra.mrb[28].mxu1 %vm359_vm0, %v5037_v11  ;;  %1190 = vmatprep.mubr.f32.mxu0 %v6647_v43 }
 0x201   :  { %1279 = vmatprep.mubr.f32.mxu1 %v6647_v43 }
 0x203   :  { %5054 = vmatmul.mubr.msk.f32.gmra.mrb[30].mxu0 %vm359_vm0, %v5038_v22 }
 0x204   :  { %5058 = vmatmul.mubr.msk.f32.gmra.mrb[30].mxu1 %vm359_vm0, %v5038_v22  ;;  %1552 = vmatprep.mubr.f32.mxu0 %v6647_v43 }
 0x205   :  { %1641 = vmatprep.mubr.f32.mxu1 %v6647_v43 }
 0x2ad   :  { %v996_v41 = vpop.f32.mrb[16].mxu0 }
 0x2ae   :  { %v997_v44 = vadd.f32 %v996_v41, %v7140_v31  ;;  %v998_v45 = vpop.f32.mrb[17].mxu0 }
 0x2af   :  { %v999_v57 = vadd.f32 %v998_v45, %v7140_v31 }
 0x2b0   :  { %v1286_v51 = vsub.f32 0.0, %v997_v44  ;;  %v1085_v59 = vpop.f32.mrb[16].mxu1 }
 0x2b1   :  { %v1086_v47 = vadd.f32 %v1085_v59, %v7140_v31  ;;  %v1287_v37 = vsub.f32 0.0, %v999_v57  ;;  %v1087_v49 = vpop.f32.mrb[17].mxu1  ;;  %v1002_v63 = vpop.f32.mrb[18].mxu0 }
 0x2b2   :  { %v1318_v42 = vmul.f32 1.442695, %v1286_v51  ;;  %v1088_v52 = vadd.f32 %v1087_v49, %v7140_v31  ;;  %v1003_v53 = vadd.f32 %v1002_v63, %v7144_v46  ;;  %v1004_v54 = vpop.f32.mrb[19].mxu0 }
 0x2b3   :  { %v1288_v55 = vsub.f32 0.0, %v1086_v47  ;;  %v1320_v38 = vmul.f32 1.442695, %v1287_v37  ;;  %v1005_v60 = vadd.f32 %v1004_v54, %v7144_v46 }
 0x2b4   :  { %5726 = vpow2.f32 %v1318_v42  ;;  %v1289_v61 = vsub.f32 0.0, %v1088_v52  ;;  %v1294_v39 = vsub.f32 0.0, %v1003_v53  ;;  %v1091_v1 = vpop.f32.mrb[18].mxu1 }
 0x2b5   :  { %v1322_v2 = vmul.f32 1.442695, %v1288_v55  ;;  %5728 = vpow2.f32 %v1320_v38  ;;  %v1092_v62 = vadd.f32 %v1091_v1, %v7144_v46  ;;  %v1295_v3 = vsub.f32 0.0, %v1005_v60  ;;  %v1093_v4 = vpop.f32.mrb[19].mxu1 }
 0x2b6   :  { %v1324_v58 = vmul.f32 1.442695, %v1289_v61  ;;  %v1334_v5 = vmul.f32 1.442695, %v1294_v39  ;;  %v1094_v32 = vadd.f32 %v1093_v4, %v7144_v46  ;;  %v1008_v6 = vpop.f32.mrb[20].mxu0 }
 0x2b7   :  { %5730 = vpow2.f32 %v1322_v2  ;;  %v1296_v7 = vsub.f32 0.0, %v1092_v62  ;;  %v1336_v8 = vmul.f32 1.442695, %v1295_v3  ;;  %v1009_v13 = vadd.f32 %v1008_v6, %v7151_v25  ;;  %v1010_v14 = vpop.f32.mrb[21].mxu0 }
 0x2b8   :  { %5732 = vpow2.f32 %v1324_v58  ;;  %v1297_v15 = vsub.f32 0.0, %v1094_v32  ;;  %v1097_v16 = vpop.f32.mrb[20].mxu1  ;;  %v1011_v17 = vadd.f32 %v1010_v14, %v7151_v25 }
 0x2b9   :  { %5734 = vpow2.f32 %v1334_v5  ;;  %v1338_v18 = vmul.f32 1.442695, %v1296_v7  ;;  %v1302_v11 = vsub.f32 0.0, %v1009_v13  ;;  %v1098_v20 = vadd.f32 %v1097_v16, %v7151_v25  ;;  %v1099_v35 = vpop.f32.mrb[21].mxu1 }
 0x2ba   :  { %5736 = vpow2.f32 %v1336_v8  ;;  %v1340_v10 = vmul.f32 1.442695, %v1297_v15  ;;  %v1303_v22 = vsub.f32 0.0, %v1011_v17  ;;  %v1100_v23 = vadd.f32 %v1099_v35, %v7151_v25  ;;  %v1014_v26 = vpop.f32.mrb[22].mxu0 }
 0x2bb   :  { %5738 = vpow2.f32 %v1338_v18  ;;  %v1350_v29 = vmul.f32 1.442695, %v1302_v11  ;;  %v1304_v30 = vsub.f32 0.0, %v1098_v20  ;;  %v1015_v24 = vadd.f32 %v1014_v26, %v7157_v21  ;;  %v1016_v19 = vpop.f32.mrb[23].mxu0 }
 0x2bc   :  { %5740 = vpow2.f32 %v1340_v10  ;;  %v1352_v0 = vmul.f32 1.442695, %v1303_v22  ;;  %v1305_v12 = vsub.f32 0.0, %v1100_v23  ;;  %v1103_v28 = vpop.f32.mrb[22].mxu1  ;;  %v1017_v37 = vadd.f32 %v1016_v19, %v7157_v21 }
 0x2bd   :  { %5742 = vpow2.f32 %v1350_v29  ;;  %v1354_v9 = vmul.f32 1.442695, %v1304_v30  ;;  %v1310_v50 = vsub.f32 0.0, %v1015_v24  ;;  %v1105_v33 = vpop.f32.mrb[23].mxu1  ;;  %v1104_v51 = vadd.f32 %v1103_v28, %v7157_v21 }
 0x2be   :  { %v5727_v56 = vpop.eup %5726  ;;  %5744 = vpow2.f32 %v1352_v0  ;;  %v1356_v36 = vmul.f32 1.442695, %v1305_v12  ;;  %v1106_v53 = vadd.f32 %v1105_v33, %v7157_v21  ;;  %v1311_v39 = vsub.f32 0.0, %v1017_v37 }
 0x2bf   :  { %v5729_v34 = vpop.eup %5728  ;;  %v1382_v40 = vadd.f32 1.0, %v5727_v56  ;;  %5746 = vpow2.f32 %v1354_v9  ;;  %v1366_v27 = vmul.f32 1.442695, %v1310_v50  ;;  %v1312_v38 = vsub.f32 0.0, %v1104_v51 }
 0x2c0   :  { %v1383_v41 = vadd.f32 1.0, %v5729_v34  ;;  %5748 = vpow2.f32 %v1356_v36  ;;  %v1313_v4 = vsub.f32 0.0, %v1106_v53  ;;  %v1368_v8 = vmul.f32 1.442695, %v1311_v39 }
 0x2c1   :  { %v5731_v44 = vpop.eup %5730  ;;  %5750 = vrcp.f32 %v1382_v40  ;;  %v1370_v32 = vmul.f32 1.442695, %v1312_v38 }
 0x2c2   :  { %v5733_v45 = vpop.eup %5732  ;;  %v1384_v57 = vadd.f32 1.0, %v5731_v44  ;;  %5752 = vrcp.f32 %v1383_v41  ;;  %v1372_v16 = vmul.f32 1.442695, %v1313_v4 }
 0x2c3   :  { %v5735_v59 = vpop.eup %5734  ;;  %v1385_v47 = vadd.f32 1.0, %v5733_v45  ;;  %5754 = vpow2.f32 %v1366_v27 }
 0x2c4   :  { %v5737_v49 = vpop.eup %5736  ;;  %5756 = vrcp.f32 %v1384_v57  ;;  %v1390_v63 = vadd.f32 1.0, %v5735_v59 }
 0x2c5   :  { %v5739_v42 = vpop.eup %5738  ;;  %5758 = vrcp.f32 %v1385_v47  ;;  %v1391_v52 = vadd.f32 1.0, %v5737_v49 }
 0x2c6   :  { %v5741_v54 = vpop.eup %5740  ;;  %5760 = vrcp.f32 %v1390_v63  ;;  %v1392_v55 = vadd.f32 1.0, %v5739_v42 }
 0x2c7   :  { %v5743_v60 = vpop.eup %5742  ;;  %5762 = vrcp.f32 %v1391_v52  ;;  %v1393_v61 = vadd.f32 1.0, %v5741_v54 }
 0x2c8   :  { %v5745_v1 = vpop.eup %5744  ;;  %5764 = vrcp.f32 %v1392_v55  ;;  %v1398_v2 = vadd.f32 1.0, %v5743_v60 }
 0x2c9   :  { %v5747_v62 = vpop.eup %5746  ;;  %5766 = vrcp.f32 %v1393_v61  ;;  %v1399_v3 = vadd.f32 1.0, %v5745_v1 }
 0x2ca   :  { %v5749_v58 = vpop.eup %5748  ;;  %5768 = vrcp.f32 %v1398_v2  ;;  %v1400_v5 = vadd.f32 1.0, %v5747_v62  ;;  %v1174_v14 = vpop.f32.mrb[24].mxu0 }
 0x2cb   :  { %v7164_v6 = vpop.eup %5750  ;;  %5770 = vrcp.f32 %v1399_v3  ;;  %v1401_v7 = vadd.f32 1.0, %v5749_v58  ;;  %v1175_v17 = vadd.f32 %v1174_v14, %v7140_v31  ;;  %v1263_v18 = vpop.f32.mrb[24].mxu1 }
 0x2cc   :  { %v5753_v13 = vpop.eup %5752  ;;  %5772 = vrcp.f32 %v1400_v5  ;;  %v1176_v11 = vpop.f32.mrb[25].mxu0  ;;  %v1264_v10 = vadd.f32 %v1263_v18, %v7140_v31 }
 0x2cd   :  { %v5755_v15 = vpop.eup %5754  ;;  %5774 = vrcp.f32 %v1401_v7  ;;  %v1177_v22 = vadd.f32 %v1176_v11, %v7140_v31  ;;  %v1265_v23 = vpop.f32.mrb[25].mxu1  ;;  %v1290_v29 = vsub.f32 0.0, %v1175_v17 }
 0x2ce   :  { %v7167_v20 = vpop.eup %5756  ;;  %v1406_v35 = vadd.f32 1.0, %v5755_v15  ;;  %5776 = vpow2.f32 %v1370_v32  ;;  %v1266_v30 = vadd.f32 %v1265_v23, %v7140_v31  ;;  %v1292_v19 = vsub.f32 0.0, %v1264_v10  ;;  %v1180_v12 = vpop.f32.mrb[26].mxu0 }
 0x2cf   :  { %v7171_v26 = vpop.eup %5758  ;;  %5778 = vpow2.f32 %v1368_v8  ;;  %v1291_v0 = vsub.f32 0.0, %v1177_v22  ;;  %v1326_v9 = vmul.f32 1.442695, %v1290_v29  ;;  %v1181_v33 = vadd.f32 %v1180_v12, %v7144_v46  ;;  %v1269_v56 = vpop.f32.mrb[26].mxu1 }
 0x2d0   :  { %v7174_v24 = vpop.eup %5760  ;;  %5780 = vrcp.f32 %v1406_v35  ;;  %v1293_v50 = vsub.f32 0.0, %v1266_v30  ;;  %v1182_v36 = vpop.f32.mrb[27].mxu0  ;;  %v1330_v40 = vmul.f32 1.442695, %v1292_v19  ;;  %v1270_v31 = vadd.f32 %v1269_v56, %v7144_v46 }
 0x2d1   :  { %v5763_v28 = vpop.eup %5762  ;;  %5782 = vpow2.f32 %v1372_v16  ;;  %v1328_v27 = vmul.f32 1.442695, %v1291_v0  ;;  %v1183_v41 = vadd.f32 %v1182_v36, %v7144_v46  ;;  %v1271_v44 = vpop.f32.mrb[27].mxu1  ;;  %v1298_v51 = vsub.f32 0.0, %v1181_v33 }
 0x2d2   :  { %v7177_v34 = vpop.eup %5764  ;;  %5784 = vpow2.f32 %v1326_v9  ;;  %v1332_v57 = vmul.f32 1.442695, %v1293_v50  ;;  %v1272_v59 = vadd.f32 %v1271_v44, %v7144_v46  ;;  %v1300_v37 = vsub.f32 0.0, %v1270_v31  ;;  %v1186_v63 = vpop.f32.mrb[28].mxu0 }
 0x2d3   :  { %v5767_v45 = vpop.eup %5766  ;;  %5786 = vpow2.f32 %v1330_v40  ;;  %v1299_v49 = vsub.f32 0.0, %v1183_v41  ;;  %v5272_v42 = vpack.c.bf16 %v5763_v28, %v5753_v13  ;;  %v1342_v53 = vmul.f32 1.442695, %v1298_v51  ;;  %v1275_v38 = vpop.f32.mrb[28].mxu1 }
 0x2d4   :  { %v7182_v47 = vpop.eup %5768  ;;  %5788 = vpow2.f32 %v1328_v27  ;;  %v1301_v54 = vsub.f32 0.0, %v1272_v59  ;;  %v1187_v55 = vadd.f32 %v1186_v63, %v7151_v25  ;;  %v1188_v60 = vpop.f32.mrb[29].mxu0  ;;  %v1346_v46 = vmul.f32 1.442695, %v1300_v37 }
 0x2d5   :  { %v7184_v52 = vpop.eup %5770  ;;  %5790 = vpow2.f32 %v1332_v57  ;;  %v1344_v39 = vmul.f32 1.442695, %v1299_v49  ;;  %v1276_v1 = vadd.f32 %v1275_v38, %v7151_v25  ;;  %v1277_v2 = vpop.f32.mrb[29].mxu1  ;;  %5273 = vmatprep.subr.bf16.mxu0 %v5272_v42  ;;  %v5280_v7 = vpack.c.bf16 %v5767_v45, %v7171_v26 }
 0x2d6   :  { %v7187_v61 = vpop.eup %5772  ;;  %5792 = vpow2.f32 %v1342_v53  ;;  %v1348_v3 = vmul.f32 1.442695, %v1301_v54  ;;  %v1306_v4 = vsub.f32 0.0, %v1187_v55  ;;  %v1192_v32 = vpop.f32.mrb[30].mxu0  ;;  %v1189_v22 = vadd.f32 %v1188_v60, %v7151_v25 }
 0x2d7   :  { %v7190_v62 = vpop.eup %5774  ;;  %5794 = vpow2.f32 %v1346_v46  ;;  %v1308_v5 = vsub.f32 0.0, %v1276_v1  ;;  %v1281_v15 = vpop.f32.mrb[30].mxu1  ;;  %5281 = vmatprep.subr.bf16.mxu1 %v5280_v7  ;;  %v1278_v26 = vadd.f32 %v1277_v2, %v7151_v25  ;;  %v5274_v0 = vpack.c.bf16 %v7174_v24, %v7164_v6 }
 0x2d8   :  { %v5777_v58 = vpop.eup %5776  ;;  %5796 = vpow2.f32 %v1344_v39  ;;  %v1358_v14 = vmul.f32 1.442695, %v1306_v4  ;;  %v1194_v16 = vpop.f32.mrb[31].mxu0  ;;  %v1307_v9 = vsub.f32 0.0, %v1189_v22  ;;  %v1193_v50 = vadd.f32 %v1192_v32, %v7157_v21 }
 0x2d9   :  { %v5779_v8 = vpop.eup %5778  ;;  %v1408_v13 = vadd.f32 1.0, %v5777_v58  ;;  %5798 = vpow2.f32 %v1348_v3  ;;  %v1283_v11 = vpop.f32.mrb[31].mxu1  ;;  %v1362_v10 = vmul.f32 1.442695, %v1308_v5  ;;  %v1309_v36 = vsub.f32 0.0, %v1278_v26  ;;  %5275 = vmatpush1.bf16.msra.mxu0 %v5274_v0 }
 0x2da   :  { %v7193_v17 = vpop.eup %5780  ;;  %v1407_v18 = vadd.f32 1.0, %v5779_v8  ;;  %v1282_v25 = vadd.f32 %v1281_v15, %v7157_v21  ;;  %v5282_v31 = vpack.c.bf16 %v7177_v34, %v7167_v20  ;;  %v1195_v44 = vadd.f32 %v1194_v16, %v7157_v21  ;;  %v7221_v8 = vld [vmem:[%s8036_s1 + $0x68] sm:$0xff] }
 0x2db   :  { %v5783_v35 = vpop.eup %5782  ;;  %5800 = vrcp.f32 %v1408_v13  ;;  %v5278_v6 = vpack.c.bf16 %v7193_v17, %v7182_v47  ;;  %v1314_v51 = vsub.f32 0.0, %v1193_v50  ;;  %v1284_v59 = vadd.f32 %v1283_v11, %v7157_v21 }
 0x2dc   :  { %5802 = vrcp.f32 %v1407_v18  ;;  %v1409_v23 = vadd.f32 1.0, %v5783_v35  ;;  %v5785_v29 = vpop.eup %5784  ;;  %5283 = vmatpush1.bf16.msra.mxu1 %v5282_v31  ;;  %v1360_v63 = vmul.f32 1.442695, %v1307_v9  ;;  %v1364_v47 = vmul.f32 1.442695, %v1309_v36 }
 0x2dd   :  { %5804 = vpow2.f32 %v1358_v14  ;;  %v5787_v30 = vpop.eup %5786  ;;  %v1386_v19 = vadd.f32 1.0, %v5785_v29  ;;  %v1316_v42 = vsub.f32 0.0, %v1282_v25  ;;  %v1315_v54 = vsub.f32 0.0, %v1195_v44  ;;  %v5061_v29 = vld [vmem:[%s8036_s1 + $0x70] sm:$0xff] }
 0x2de   :  { %5806 = vrcp.f32 %v1409_v23  ;;  %v5789_v12 = vpop.eup %5788  ;;  %v1388_v28 = vadd.f32 1.0, %v5787_v30  ;;  %v1374_v60 = vmul.f32 1.442695, %v1314_v51  ;;  %v1317_v46 = vsub.f32 0.0, %v1284_v59 }
 0x2df   :  { %5808 = vpow2.f32 %v1362_v10  ;;  %v5791_v33 = vpop.eup %5790  ;;  %v1387_v56 = vadd.f32 1.0, %v5789_v12  ;;  %v1378_v2 = vmul.f32 1.442695, %v1316_v42  ;;  %v1376_v58 = vmul.f32 1.442695, %v1315_v54 }
 0x2e0   :  { %5810 = vrcp.f32 %v1386_v19  ;;  %v5793_v40 = vpop.eup %5792  ;;  %v1389_v27 = vadd.f32 1.0, %v5791_v33  ;;  %v1380_v32 = vmul.f32 1.442695, %v1317_v46 }
 0x2e1   :  { %5812 = vrcp.f32 %v1388_v28  ;;  %v5795_v24 = vpop.eup %5794  ;;  %v1394_v41 = vadd.f32 1.0, %v5793_v40  ;;  %v5062_v28 = vld [vmem:[%s8036_s1 + $0x78] sm:$0xff] }
 0x2e2   :  { %5814 = vrcp.f32 %v1387_v56  ;;  %v5797_v45 = vpop.eup %5796  ;;  %v1396_v57 = vadd.f32 1.0, %v5795_v24 }
 0x2e3   :  { %5816 = vrcp.f32 %v1389_v27  ;;  %v5799_v37 = vpop.eup %5798  ;;  %v1395_v49 = vadd.f32 1.0, %v5797_v45 }
 0x2e4   :  { %5818 = vrcp.f32 %v1394_v41  ;;  %v1397_v34 = vadd.f32 1.0, %v5799_v37  ;;  %v7266_v37 = vpop.permute.xlu0 %1458 }
 0x2e5   :  { %v5801_v20 = vpop.eup %5800  ;;  %5820 = vrcp.f32 %v1396_v57 }
 0x2e6   :  { %v5803_v53 = vpop.eup %5802  ;;  %5822 = vrcp.f32 %v1395_v49  ;;  %v5286_v55 = vpack.c.bf16 %v5801_v20, %v7187_v61  ;;  %v7213_v61 = vld [vmem:[%s8036_s1 + $0x60] sm:$0xff] }
 0x2e7   :  { %v5805_v38 = vpop.eup %5804  ;;  %5824 = vrcp.f32 %v1397_v34  ;;  %v5276_v21 = vpack.c.bf16 %v5803_v53, %v7184_v52 }
 0x2e8   :  { %v5807_v39 = vpop.eup %5806  ;;  %5826 = vpow2.f32 %v1360_v63  ;;  %v1402_v18 = vadd.f32 1.0, %v5805_v38 }
 0x2e9   :  { %v5809_v1 = vpop.eup %5808  ;;  %5828 = vpow2.f32 %v1364_v47  ;;  %5277 = vmatprep.subr.bf16.mxu0 %v5276_v21  ;;  %v5284_v3 = vpack.c.bf16 %v5807_v39, %v7190_v62 }
 0x2ea   :  { %v5811_v4 = vpop.eup %5810  ;;  %5279 = vmatpush1.bf16.msra.mxu0 %v5278_v6  ;;  %5830 = vpow2.f32 %v1374_v60  ;;  %v1404_v10 = vadd.f32 1.0, %v5809_v1 }
 0x2eb   :  { %v5813_v5 = vpop.eup %5812  ;;  %5285 = vmatprep.subr.bf16.mxu1 %v5284_v3  ;;  %5832 = vpow2.f32 %v1378_v2 }
 0x2ec   :  { %v5815_v52 = vpop.eup %5814  ;;  %5287 = vmatpush1.bf16.msra.mxu1 %v5286_v55  ;;  %5834 = vpow2.f32 %v1376_v58  ;;  %v7271_v55 = vpop.permute.xlu1 %1463 }
 0x2ed   :  { %v5817_v7 = vpop.eup %5816  ;;  %5067 = vmatmul.mubr.msk.f32.vlgmr.msra.gmra.mrb[32].mxu0 %vm359_vm0, %v7213_v61  ;;  %5836 = vpow2.f32 %v1380_v32 }
 0x2ee   :  { %v5819_v62 = vpop.eup %5818  ;;  %1558 = vmatprep.mubr.f32.mxu0 %v6647_v43  ;;  %5838 = vrcp.f32 %v1402_v18 }
 0x2ef   :  { %v5821_v13 = vpop.eup %5820  ;;  %5071 = vmatmul.mubr.msk.f32.vlgmr.msra.gmra.mrb[32].mxu1 %vm359_vm0, %v7213_v61  ;;  %v5290_v14 = vpack.c.bf16 %v5819_v62, %v5811_v4  ;;  %5840 = vrcp.f32 %v1404_v10 }
 0x2f0   :  { %v5823_v15 = vpop.eup %5822  ;;  %1647 = vmatprep.mubr.f32.mxu1 %v6647_v43  ;;  %v5298_v16 = vpack.c.bf16 %v5821_v13, %v5813_v5 }
 0x2f1   :  { %v5825_v17 = vpop.eup %5824  ;;  %5068 = vmatmul.mubr.msk.f32.gmra.mrb[34].mxu0 %vm359_vm0, %v7221_v8  ;;  %v5288_v11 = vpack.c.bf16 %v5823_v15, %v5815_v52 }
 0x2f2   :  { %v5827_v35 = vpop.eup %5826  ;;  %v5296_v22 = vpack.c.bf16 %v5825_v17, %v5817_v7  ;;  %1564 = vmatprep.mubr.f32.mxu0 %v6647_v43 }
 0x2f3   :  { %v5829_v23 = vpop.eup %5828  ;;  %v1403_v26 = vadd.f32 1.0, %v5827_v35  ;;  %5072 = vmatmul.mubr.msk.f32.gmra.mrb[34].mxu1 %vm359_vm0, %v7221_v8  ;;  %5289 = vmatprep.subr.bf16.mxu0 %v5288_v11 }
 0x2f4   :  { %5297 = vmatprep.subr.bf16.mxu1 %v5296_v22  ;;  %5291 = vmatpush1.bf16.msra.mxu0 %v5290_v14  ;;  %v5831_v30 = vpop.eup %5830  ;;  %v1405_v19 = vadd.f32 1.0, %v5829_v23  ;;  %v7278_v14 = vpop.permute.xlu0 %1468 }
 0x2f5   :  { %5299 = vmatpush1.bf16.msra.mxu1 %v5298_v16  ;;  %1653 = vmatprep.mubr.f32.mxu1 %v6647_v43  ;;  %v1410_v0 = vadd.f32 1.0, %v5831_v30  ;;  %v5833_v12 = vpop.eup %5832  ;;  %5842 = vrcp.f32 %v1403_v26 }
 0x2f6   :  { %5069 = vmatmul.mubr.msk.f32.gmra.mrb[36].mxu0 %vm359_vm0, %v5061_v29  ;;  %v5835_v9 = vpop.eup %5834  ;;  %v1412_v50 = vadd.f32 1.0, %v5833_v12 }
 0x2f7   :  { %5073 = vmatmul.mubr.msk.f32.gmra.mrb[36].mxu1 %vm359_vm0, %v5061_v29  ;;  %1570 = vmatprep.mubr.f32.mxu0 %v6647_v43  ;;  %5844 = vrcp.f32 %v1410_v0  ;;  %v5837_v33 = vpop.eup %5836  ;;  %v1411_v56 = vadd.f32 1.0, %v5835_v9 }
 0x2f8   :  { %1659 = vmatprep.mubr.f32.mxu1 %v6647_v43  ;;  %5846 = vrcp.f32 %v1405_v19  ;;  %v1413_v36 = vadd.f32 1.0, %v5837_v33  ;;  %v5839_v25 = vpop.eup %5838 }
 0x2f9   :  { %5848 = vrcp.f32 %v1412_v50  ;;  %v5841_v40 = vpop.eup %5840 }
 0x2fa   :  { %5070 = vmatmul.mubr.msk.f32.gmra.mrb[38].mxu0 %vm359_vm0, %v5062_v28  ;;  %5850 = vrcp.f32 %v1411_v56 }
 0x2fb   :  { %5074 = vmatmul.mubr.msk.f32.gmra.mrb[38].mxu1 %vm359_vm0, %v5062_v28  ;;  %1730 = vmatprep.mubr.f32.mxu0 %v6647_v43  ;;  %5852 = vrcp.f32 %v1413_v36 }
 0x2fc   :  { %1819 = vmatprep.mubr.f32.mxu1 %v6647_v43 }
 0x2ff   :  { %v5843_v27 = vpop.eup %5842 }
 0x301   :  { %v5845_v31 = vpop.eup %5844 }
 0x302   :  { %v5847_v6 = vpop.eup %5846  ;;  %v5294_v24 = vpack.c.bf16 %v5845_v31, %v5839_v25 }
 0x303   :  { %v5849_v41 = vpop.eup %5848 }
 0x304   :  { %v5851_v44 = vpop.eup %5850  ;;  %v5302_v45 = vpack.c.bf16 %v5849_v41, %v5841_v40  ;;  %v7284_v40 = vpop.permute.xlu1 %1473 }
 0x305   :  { %v5853_v57 = vpop.eup %5852  ;;  %v5292_v51 = vpack.c.bf16 %v5851_v44, %v5843_v27 }
 0x306   :  { %v5300_v59 = vpack.c.bf16 %v5853_v57, %v5847_v6 }
 0x307   :  { %5293 = vmatprep.subr.bf16.mxu0 %v5292_v51 }
 0x308   :  { %5301 = vmatprep.subr.bf16.mxu1 %v5300_v59  ;;  %5295 = vmatpush1.bf16.msra.mxu0 %v5294_v24 }
 0x309   :  { %5303 = vmatpush1.bf16.msra.mxu1 %v5302_v45 }
 0x30b   :  { %5075 = vmatmul.mubr.msk.f32.vlgmr.msra.gmra.mrb[40].mxu0 %vm359_vm0, %v7213_v61 }
 0x30c   :  { %5079 = vmatmul.mubr.msk.f32.vlgmr.msra.gmra.mrb[40].mxu1 %vm359_vm0, %v7213_v61  ;;  %1736 = vmatprep.mubr.f32.mxu0 %v6647_v43 }
 0x30d   :  { %1825 = vmatprep.mubr.f32.mxu1 %v6647_v43 }
 0x30f   :  { %5076 = vmatmul.mubr.msk.f32.gmra.mrb[42].mxu0 %vm359_vm0, %v7221_v8 }
 0x310   :  { %5080 = vmatmul.mubr.msk.f32.gmra.mrb[42].mxu1 %vm359_vm0, %v7221_v8  ;;  %1742 = vmatprep.mubr.f32.mxu0 %v6647_v43 }
 0x311   :  { %1831 = vmatprep.mubr.f32.mxu1 %v6647_v43 }
 0x313   :  { %5077 = vmatmul.mubr.msk.f32.gmra.mrb[44].mxu0 %vm359_vm0, %v5061_v29 }
 0x314   :  { %5081 = vmatmul.mubr.msk.f32.gmra.mrb[44].mxu1 %vm359_vm0, %v5061_v29  ;;  %1748 = vmatprep.mubr.f32.mxu0 %v6647_v43 }
 0x315   :  { %1837 = vmatprep.mubr.f32.mxu1 %v6647_v43 }
 0x317   :  { %5078 = vmatmul.mubr.msk.f32.gmra.mrb[46].mxu0 %vm359_vm0, %v5062_v28 }
 0x318   :  { %5082 = vmatmul.mubr.msk.f32.gmra.mrb[46].mxu1 %vm359_vm0, %v5062_v28  ;;  %2110 = vmatprep.mubr.f32.mxu0 %v6647_v43 }
 0x319   :  { %2199 = vmatprep.mubr.f32.mxu1 %v6647_v43 }
 0x3c0   :  { %v1554_v49 = vpop.f32.mrb[32].mxu0 }
 0x3c1   :  { %v1555_v63 = vadd.f32 %v1554_v49, %v7266_v37  ;;  %v1556_v20 = vpop.f32.mrb[33].mxu0 }
 0x3c2   :  { %v1643_v34 = vpop.f32.mrb[32].mxu1  ;;  %v1557_v47 = vadd.f32 %v1556_v20, %v7266_v37 }
 0x3c3   :  { %v1844_v42 = vsub.f32 0.0, %v1555_v63  ;;  %v1644_v53 = vadd.f32 %v1643_v34, %v7266_v37  ;;  %v1645_v54 = vpop.f32.mrb[33].mxu1 }
 0x3c4   :  { %v1845_v38 = vsub.f32 0.0, %v1557_v47  ;;  %v1646_v60 = vadd.f32 %v1645_v54, %v7266_v37  ;;  %v1560_v46 = vpop.f32.mrb[34].mxu0 }
 0x3c5   :  { %v1876_v21 = vmul.f32 1.442695, %v1844_v42  ;;  %v1846_v39 = vsub.f32 0.0, %v1644_v53  ;;  %v1561_v1 = vadd.f32 %v1560_v46, %v7271_v55  ;;  %v1562_v2 = vpop.f32.mrb[35].mxu0 }
 0x3c6   :  { %v1878_v3 = vmul.f32 1.442695, %v1845_v38  ;;  %v1847_v4 = vsub.f32 0.0, %v1646_v60  ;;  %v1649_v58 = vpop.f32.mrb[34].mxu1  ;;  %v1563_v61 = vadd.f32 %v1562_v2, %v7271_v55 }
 0x3c7   :  { %5854 = vpow2.f32 %v1876_v21  ;;  %v1880_v5 = vmul.f32 1.442695, %v1846_v39  ;;  %v1852_v32 = vsub.f32 0.0, %v1561_v1  ;;  %v1650_v52 = vadd.f32 %v1649_v58, %v7271_v55  ;;  %v1651_v7 = vpop.f32.mrb[35].mxu1 }
 0x3c8   :  { %5856 = vpow2.f32 %v1878_v3  ;;  %v1882_v62 = vmul.f32 1.442695, %v1847_v4  ;;  %v1853_v8 = vsub.f32 0.0, %v1563_v61  ;;  %v1652_v13 = vadd.f32 %v1651_v7, %v7271_v55 }
 0x3c9   :  { %5858 = vpow2.f32 %v1880_v5  ;;  %v1892_v15 = vmul.f32 1.442695, %v1852_v32  ;;  %v1854_v16 = vsub.f32 0.0, %v1650_v52  ;;  %v1566_v17 = vpop.f32.mrb[36].mxu0 }
 0x3ca   :  { %5860 = vpow2.f32 %v1882_v62  ;;  %v1894_v18 = vmul.f32 1.442695, %v1853_v8  ;;  %v1855_v11 = vsub.f32 0.0, %v1652_v13  ;;  %v1567_v35 = vadd.f32 %v1566_v17, %v7278_v14  ;;  %v1655_v10 = vpop.f32.mrb[36].mxu1  ;;  %v1568_v22 = vpop.f32.mrb[37].mxu0 }
 0x3cb   :  { %5862 = vpow2.f32 %v1892_v15  ;;  %v1896_v23 = vmul.f32 1.442695, %v1854_v16  ;;  %v1656_v26 = vadd.f32 %v1655_v10, %v7278_v14  ;;  %v1569_v29 = vadd.f32 %v1568_v22, %v7278_v14  ;;  %v1657_v30 = vpop.f32.mrb[37].mxu1 }
 0x3cc   :  { %5864 = vpow2.f32 %v1894_v18  ;;  %v1898_v19 = vmul.f32 1.442695, %v1855_v11  ;;  %v1860_v0 = vsub.f32 0.0, %v1567_v35  ;;  %v1658_v12 = vadd.f32 %v1657_v30, %v7278_v14 }
 0x3cd   :  { %5866 = vpow2.f32 %v1896_v23  ;;  %v1862_v28 = vsub.f32 0.0, %v1656_v26  ;;  %v1861_v9 = vsub.f32 0.0, %v1569_v29  ;;  %v1572_v50 = vpop.f32.mrb[38].mxu0 }
 0x3ce   :  { %5868 = vpow2.f32 %v1898_v19  ;;  %v1908_v33 = vmul.f32 1.442695, %v1860_v0  ;;  %v1863_v56 = vsub.f32 0.0, %v1658_v12  ;;  %v1661_v36 = vpop.f32.mrb[38].mxu1  ;;  %v1574_v25 = vpop.f32.mrb[39].mxu0  ;;  %v1573_v41 = vadd.f32 %v1572_v50, %v7284_v40 }
 0x3cf   :  { %v1912_v27 = vmul.f32 1.442695, %v1862_v28  ;;  %v1910_v31 = vmul.f32 1.442695, %v1861_v9  ;;  %v1663_v6 = vpop.f32.mrb[39].mxu1  ;;  %v1662_v42 = vadd.f32 %v1661_v36, %v7284_v40  ;;  %v1575_v38 = vadd.f32 %v1574_v25, %v7284_v40 }
 0x3d0   :  { %5870 = vpow2.f32 %v1908_v33  ;;  %v1914_v24 = vmul.f32 1.442695, %v1863_v56  ;;  %v1868_v20 = vsub.f32 0.0, %v1573_v41  ;;  %v1664_v21 = vadd.f32 %v1663_v6, %v7284_v40 }
 0x3d1   :  { %v5855_v44 = vpop.eup %5854  ;;  %5872 = vpow2.f32 %v1912_v27  ;;  %v1870_v4 = vsub.f32 0.0, %v1662_v42  ;;  %v1869_v61 = vsub.f32 0.0, %v1575_v38 }
 0x3d2   :  { %v5857_v45 = vpop.eup %5856  ;;  %v1940_v57 = vadd.f32 1.0, %v5855_v44  ;;  %5874 = vpow2.f32 %v1910_v31  ;;  %v1924_v2 = vmul.f32 1.442695, %v1868_v20  ;;  %v1871_v52 = vsub.f32 0.0, %v1664_v21 }
 0x3d3   :  { %v5859_v51 = vpop.eup %5858  ;;  %v1941_v59 = vadd.f32 1.0, %v5857_v45  ;;  %5876 = vpow2.f32 %v1914_v24  ;;  %v1928_v15 = vmul.f32 1.442695, %v1870_v4  ;;  %v1926_v18 = vmul.f32 1.442695, %v1869_v61 }
 0x3d4   :  { %v5861_v49 = vpop.eup %5860  ;;  %5878 = vrcp.f32 %v1940_v57  ;;  %v1942_v63 = vadd.f32 1.0, %v5859_v51  ;;  %v1930_v35 = vmul.f32 1.442695, %v1871_v52 }
 0x3d5   :  { %v5863_v34 = vpop.eup %5862  ;;  %5880 = vrcp.f32 %v1941_v59  ;;  %v1943_v47 = vadd.f32 1.0, %v5861_v49 }
 0x3d6   :  { %v5865_v53 = vpop.eup %5864  ;;  %5882 = vrcp.f32 %v1942_v63  ;;  %v1948_v54 = vadd.f32 1.0, %v5863_v34 }
 0x3d7   :  { %v5867_v60 = vpop.eup %5866  ;;  %5884 = vrcp.f32 %v1943_v47  ;;  %v1949_v46 = vadd.f32 1.0, %v5865_v53 }
 0x3d8   :  { %v5869_v39 = vpop.eup %5868  ;;  %5886 = vrcp.f32 %v1948_v54  ;;  %v1950_v1 = vadd.f32 1.0, %v5867_v60 }
 0x3d9   :  { %5888 = vrcp.f32 %v1949_v46  ;;  %v1951_v3 = vadd.f32 1.0, %v5869_v39 }
 0x3da   :  { %v5871_v58 = vpop.eup %5870  ;;  %5890 = vrcp.f32 %v1950_v1 }
 0x3db   :  { %v5873_v5 = vpop.eup %5872  ;;  %5892 = vrcp.f32 %v1951_v3  ;;  %v1956_v32 = vadd.f32 1.0, %v5871_v58 }
 0x3dc   :  { %v5875_v7 = vpop.eup %5874  ;;  %v1958_v62 = vadd.f32 1.0, %v5873_v5  ;;  %5894 = vpow2.f32 %v1924_v2 }
 0x3dd   :  { %v5877_v8 = vpop.eup %5876  ;;  %5896 = vrcp.f32 %v1956_v32  ;;  %v1957_v13 = vadd.f32 1.0, %v5875_v7 }
 0x3de   :  { %v5879_v16 = vpop.eup %5878  ;;  %5898 = vrcp.f32 %v1958_v62  ;;  %v1959_v17 = vadd.f32 1.0, %v5877_v8  ;;  %v1732_v10 = vpop.f32.mrb[40].mxu0 }
 0x3df   :  { %v5881_v11 = vpop.eup %5880  ;;  %5900 = vrcp.f32 %v1957_v13  ;;  %v1733_v23 = vadd.f32 %v1732_v10, %v7266_v37  ;;  %v1821_v26 = vpop.f32.mrb[40].mxu1 }
 0x3e0   :  { %v7290_v22 = vpop.eup %5882  ;;  %5902 = vrcp.f32 %v1959_v17  ;;  %v1734_v29 = vpop.f32.mrb[41].mxu0  ;;  %v1822_v19 = vadd.f32 %v1821_v26, %v7266_v37 }
 0x3e1   :  { %v7293_v30 = vpop.eup %5884  ;;  %5904 = vpow2.f32 %v1928_v15  ;;  %v1735_v0 = vadd.f32 %v1734_v29, %v7266_v37  ;;  %v1823_v12 = vpop.f32.mrb[41].mxu1  ;;  %v1848_v9 = vsub.f32 0.0, %v1733_v23 }
 0x3e2   :  { %v5887_v28 = vpop.eup %5886  ;;  %5906 = vpow2.f32 %v1926_v18  ;;  %v1824_v50 = vadd.f32 %v1823_v12, %v7266_v37  ;;  %v1850_v56 = vsub.f32 0.0, %v1822_v19  ;;  %v1738_v25 = vpop.f32.mrb[42].mxu0 }
 0x3e3   :  { %v5889_v33 = vpop.eup %5888  ;;  %5908 = vpow2.f32 %v1930_v35  ;;  %v1849_v36 = vsub.f32 0.0, %v1735_v0  ;;  %v5306_v27 = vpack.c.bf16 %v5887_v28, %v5879_v16  ;;  %v1884_v6 = vmul.f32 1.442695, %v1848_v9  ;;  %v1827_v44 = vpop.f32.mrb[42].mxu1 }
 0x3e4   :  { %v7298_v31 = vpop.eup %5890  ;;  %v1851_v24 = vsub.f32 0.0, %v1824_v50  ;;  %v1739_v41 = vadd.f32 %v1738_v25, %v7271_v55  ;;  %v1740_v45 = vpop.f32.mrb[43].mxu0  ;;  %v5304_v57 = vpack.c.bf16 %v5889_v33, %v5881_v11  ;;  %v1888_v59 = vmul.f32 1.442695, %v1850_v56 }
 0x3e5   :  { %v5893_v51 = vpop.eup %5892  ;;  %v1886_v49 = vmul.f32 1.442695, %v1849_v36  ;;  %v1828_v37 = vadd.f32 %v1827_v44, %v7271_v55  ;;  %v1741_v63 = vadd.f32 %v1740_v45, %v7271_v55  ;;  %v1829_v20 = vpop.f32.mrb[43].mxu1  ;;  %5910 = vpow2.f32 %v1884_v6 }
 0x3e6   :  { %v5895_v34 = vpop.eup %5894  ;;  %v1890_v47 = vmul.f32 1.442695, %v1851_v24  ;;  %v1856_v42 = vsub.f32 0.0, %v1739_v41  ;;  %v1830_v53 = vadd.f32 %v1829_v20, %v7271_v55  ;;  %5305 = vmatprep.subr.bf16.mxu0 %v5304_v57  ;;  %5912 = vpow2.f32 %v1888_v59  ;;  %v1744_v21 = vpop.f32.mrb[44].mxu0 }
 0x3e7   :  { %v7304_v54 = vpop.eup %5896  ;;  %v1964_v38 = vadd.f32 1.0, %v5895_v34  ;;  %v1858_v60 = vsub.f32 0.0, %v1828_v37  ;;  %v1857_v46 = vsub.f32 0.0, %v1741_v63  ;;  %5307 = vmatpush1.bf16.msra.mxu0 %v5306_v27  ;;  %5914 = vpow2.f32 %v1886_v49  ;;  %v1833_v3 = vpop.f32.mrb[44].mxu1 }
 0x3e8   :  { %v7306_v39 = vpop.eup %5898  ;;  %v1900_v1 = vmul.f32 1.442695, %v1856_v42  ;;  %v1745_v2 = vadd.f32 %v1744_v21, %v7278_v14  ;;  %v1746_v4 = vpop.f32.mrb[45].mxu0  ;;  %v1859_v5 = vsub.f32 0.0, %v1830_v53  ;;  %v1834_v62 = vadd.f32 %v1833_v3, %v7278_v14 }
 0x3e9   :  { %v7309_v58 = vpop.eup %5900  ;;  %5916 = vrcp.f32 %v1964_v38  ;;  %v1904_v55 = vmul.f32 1.442695, %v1858_v60  ;;  %v1902_v61 = vmul.f32 1.442695, %v1857_v46  ;;  %v1835_v32 = vpop.f32.mrb[45].mxu1  ;;  %v5312_v15 = vpack.c.bf16 %v5893_v51, %v7293_v30 }
 0x3ea   :  { %v7311_v52 = vpop.eup %5902  ;;  %5918 = vpow2.f32 %v1890_v47  ;;  %v1864_v7 = vsub.f32 0.0, %v1745_v2  ;;  %v1750_v13 = vpop.f32.mrb[46].mxu0  ;;  %v1906_v23 = vmul.f32 1.442695, %v1859_v5  ;;  %v1866_v0 = vsub.f32 0.0, %v1834_v62 }
 0x3eb   :  { %v5905_v8 = vpop.eup %5904  ;;  %5920 = vpow2.f32 %v1900_v1  ;;  %v1839_v18 = vpop.f32.mrb[46].mxu1  ;;  %5313 = vmatprep.subr.bf16.mxu1 %v5312_v15  ;;  %v1747_v12 = vadd.f32 %v1746_v4, %v7278_v14  ;;  %v1836_v30 = vadd.f32 %v1835_v32, %v7278_v14  ;;  %v5314_v9 = vpack.c.bf16 %v7298_v31, %v7290_v22 }
 0x3ec   :  { %v5907_v16 = vpop.eup %5906  ;;  %v1966_v17 = vadd.f32 1.0, %v5905_v8  ;;  %5922 = vpow2.f32 %v1904_v55  ;;  %v1752_v11 = vpop.f32.mrb[47].mxu0  ;;  %v1916_v19 = vmul.f32 1.442695, %v1864_v7  ;;  %v1751_v56 = vadd.f32 %v1750_v13, %v7284_v40 }
 0x3ed   :  { %v5909_v35 = vpop.eup %5908  ;;  %v1965_v10 = vadd.f32 1.0, %v5907_v16  ;;  %5924 = vpow2.f32 %v1902_v61  ;;  %v1841_v26 = vpop.f32.mrb[47].mxu1  ;;  %v1920_v27 = vmul.f32 1.442695, %v1866_v0  ;;  %5315 = vmatpush1.bf16.msra.mxu1 %v5314_v9  ;;  %v1865_v41 = vsub.f32 0.0, %v1747_v12  ;;  %v7340_v16 = vld [vmem:[%s8036_s1 + $0x88] sm:$0xff] }
 0x3ee   :  { %5926 = vrcp.f32 %v1966_v17  ;;  %v1967_v29 = vadd.f32 1.0, %v5909_v35  ;;  %v1867_v14 = vsub.f32 0.0, %v1836_v30  ;;  %v1840_v45 = vadd.f32 %v1839_v18, %v7284_v40  ;;  %v5085_v12 = vld [vmem:[%s8036_s1 + $0x90] sm:$0xff] }
 0x3ef   :  { %5928 = vrcp.f32 %v1965_v10  ;;  %v5911_v28 = vpop.eup %5910  ;;  %v1872_v51 = vsub.f32 0.0, %v1751_v56  ;;  %v1753_v59 = vadd.f32 %v1752_v11, %v7284_v40  ;;  %v1842_v63 = vadd.f32 %v1841_v26, %v7284_v40 }
 0x3f0   :  { %5930 = vrcp.f32 %v1967_v29  ;;  %v5913_v50 = vpop.eup %5912  ;;  %v1944_v33 = vadd.f32 1.0, %v5911_v28  ;;  %v1918_v47 = vmul.f32 1.442695, %v1865_v41  ;;  %v1922_v38 = vmul.f32 1.442695, %v1867_v14 }
 0x3f1   :  { %5932 = vpow2.f32 %v1906_v23  ;;  %v5915_v36 = vpop.eup %5914  ;;  %v1946_v25 = vadd.f32 1.0, %v5913_v50  ;;  %v1932_v46 = vmul.f32 1.442695, %v1872_v51  ;;  %v1873_v21 = vsub.f32 0.0, %v1753_v59 }
 0x3f2   :  { %5934 = vpow2.f32 %v1916_v19  ;;  %v1945_v24 = vadd.f32 1.0, %v5915_v36  ;;  %v1875_v3 = vsub.f32 0.0, %v1842_v63 }
 0x3f3   :  { %v5917_v6 = vpop.eup %5916  ;;  %5936 = vrcp.f32 %v1944_v33  ;;  %v1934_v62 = vmul.f32 1.442695, %v1873_v21 }
 0x3f4   :  { %v5919_v44 = vpop.eup %5918  ;;  %5938 = vrcp.f32 %v1946_v25  ;;  %v5310_v22 = vpack.c.bf16 %v5917_v6, %v7304_v54  ;;  %v1874_v54 = vsub.f32 0.0, %v1840_v45  ;;  %v1938_v8 = vmul.f32 1.442695, %v1875_v3  ;;  %v5086_v25 = vld [vmem:[%s8036_s1 + $0x98] sm:$0xff]  ;;  %v7389_v3 = vpop.permute.xlu1 %2021 }
 0x3f5   :  { %v5921_v31 = vpop.eup %5920  ;;  %5940 = vrcp.f32 %v1945_v24  ;;  %v1947_v57 = vadd.f32 1.0, %v5919_v44 }
 0x3f6   :  { %v5923_v49 = vpop.eup %5922  ;;  %v1952_v37 = vadd.f32 1.0, %v5921_v31  ;;  %5942 = vpow2.f32 %v1920_v27  ;;  %v1936_v32 = vmul.f32 1.442695, %v1874_v54 }
 0x3f7   :  { %v5925_v20 = vpop.eup %5924  ;;  %5944 = vrcp.f32 %v1947_v57  ;;  %v1954_v34 = vadd.f32 1.0, %v5923_v49 }
 0x3f8   :  { %v5927_v42 = vpop.eup %5926  ;;  %5946 = vrcp.f32 %v1952_v37  ;;  %v1953_v53 = vadd.f32 1.0, %v5925_v20 }
 0x3f9   :  { %v5929_v60 = vpop.eup %5928  ;;  %5948 = vrcp.f32 %v1954_v34  ;;  %v5318_v1 = vpack.c.bf16 %v5927_v42, %v7306_v39  ;;  %v7330_v39 = vld [vmem:[%s8036_s1 + $0x80] sm:$0xff] }
 0x3fa   :  { %v5931_v2 = vpop.eup %5930  ;;  %5950 = vrcp.f32 %v1953_v53  ;;  %v5308_v40 = vpack.c.bf16 %v5929_v60, %v7309_v58 }
 0x3fb   :  { %v5933_v4 = vpop.eup %5932  ;;  %5952 = vpow2.f32 %v1918_v47  ;;  %v5316_v55 = vpack.c.bf16 %v5931_v2, %v7311_v52  ;;  %v7383_v47 = vpop.permute.xlu0 %2016 }
 0x3fc   :  { %v5935_v61 = vpop.eup %5934  ;;  %v1955_v5 = vadd.f32 1.0, %v5933_v4  ;;  %5954 = vpow2.f32 %v1922_v38  ;;  %5309 = vmatprep.subr.bf16.mxu0 %v5308_v40 }
 0x3fd   :  { %v5937_v7 = vpop.eup %5936  ;;  %5956 = vpow2.f32 %v1932_v46  ;;  %5317 = vmatprep.subr.bf16.mxu1 %v5316_v55  ;;  %5311 = vmatpush1.bf16.msra.mxu0 %v5310_v22  ;;  %v1960_v10 = vadd.f32 1.0, %v5935_v61 }
 0x3fe   :  { %v5939_v58 = vpop.eup %5938  ;;  %5958 = vrcp.f32 %v1955_v5  ;;  %5319 = vmatpush1.bf16.msra.mxu1 %v5318_v1 }
 0x3ff   :  { %v5941_v52 = vpop.eup %5940  ;;  %5960 = vpow2.f32 %v1936_v32 }
 0x400   :  { %v5943_v13 = vpop.eup %5942  ;;  %5091 = vmatmul.mubr.msk.f32.vlgmr.msra.gmra.mrb[48].mxu0 %vm359_vm0, %v7330_v39  ;;  %5962 = vpow2.f32 %v1934_v62 }
 0x401   :  { %v5945_v15 = vpop.eup %5944  ;;  %5095 = vmatmul.mubr.msk.f32.vlgmr.msra.gmra.mrb[48].mxu1 %vm359_vm0, %v7330_v39  ;;  %2116 = vmatprep.mubr.f32.mxu0 %v6647_v43  ;;  %5964 = vpow2.f32 %v1938_v8  ;;  %v1962_v29 = vadd.f32 1.0, %v5943_v13 }
 0x402   :  { %v5947_v17 = vpop.eup %5946  ;;  %2205 = vmatprep.mubr.f32.mxu1 %v6647_v43  ;;  %5966 = vrcp.f32 %v1960_v10 }
 0x403   :  { %v5949_v18 = vpop.eup %5948  ;;  %v5322_v11 = vpack.c.bf16 %v5947_v17, %v5937_v7  ;;  %5968 = vrcp.f32 %v1962_v29 }
 0x404   :  { %v5951_v35 = vpop.eup %5950  ;;  %5092 = vmatmul.mubr.msk.f32.gmra.mrb[50].mxu0 %vm359_vm0, %v7340_v16  ;;  %v5330_v23 = vpack.c.bf16 %v5949_v18, %v5939_v58  ;;  %v7395_v18 = vpop.permute.xlu0 %2026 }
 0x405   :  { %v5953_v26 = vpop.eup %5952  ;;  %5096 = vmatmul.mubr.msk.f32.gmra.mrb[50].mxu1 %vm359_vm0, %v7340_v16  ;;  %v5320_v19 = vpack.c.bf16 %v5951_v35, %v5941_v52  ;;  %2122 = vmatprep.mubr.f32.mxu0 %v6647_v43 }
 0x406   :  { %v5955_v0 = vpop.eup %5954  ;;  %2211 = vmatprep.mubr.f32.mxu1 %v6647_v43  ;;  %v1961_v30 = vadd.f32 1.0, %v5953_v26 }
 0x407   :  { %v5957_v28 = vpop.eup %5956  ;;  %5321 = vmatprep.subr.bf16.mxu0 %v5320_v19  ;;  %v1963_v50 = vadd.f32 1.0, %v5955_v0 }
 0x408   :  { %v5959_v9 = vpop.eup %5958  ;;  %v1968_v33 = vadd.f32 1.0, %v5957_v28  ;;  %5323 = vmatpush1.bf16.msra.mxu0 %v5322_v11 }
 0x409   :  { %v5328_v56 = vpack.c.bf16 %v5959_v9, %v5945_v15  ;;  %5093 = vmatmul.mubr.msk.f32.gmra.mrb[52].mxu0 %vm359_vm0, %v5085_v12  ;;  %5097 = vmatmul.mubr.msk.f32.gmra.mrb[52].mxu1 %vm359_vm0, %v5085_v12  ;;  %v5961_v36 = vpop.eup %5960 }
 0x40a   :  { %5970 = vrcp.f32 %v1968_v33  ;;  %2128 = vmatprep.mubr.f32.mxu0 %v6647_v43  ;;  %2217 = vmatprep.mubr.f32.mxu1 %v6647_v43  ;;  %v5963_v27 = vpop.eup %5962  ;;  %v1970_v6 = vadd.f32 1.0, %v5961_v36 }
 0x40b   :  { %5972 = vrcp.f32 %v1961_v30  ;;  %5329 = vmatprep.subr.bf16.mxu1 %v5328_v56  ;;  %v5965_v24 = vpop.eup %5964  ;;  %v1969_v41 = vadd.f32 1.0, %v5963_v27 }
 0x40c   :  { %5974 = vrcp.f32 %v1963_v50  ;;  %5331 = vmatpush1.bf16.msra.mxu1 %v5330_v23  ;;  %v1971_v44 = vadd.f32 1.0, %v5965_v24  ;;  %v5967_v14 = vpop.eup %5966 }
 0x40d   :  { %5976 = vrcp.f32 %v1970_v6  ;;  %5094 = vmatmul.mubr.msk.f32.gmra.mrb[54].mxu0 %vm359_vm0, %v5086_v25  ;;  %5098 = vmatmul.mubr.msk.f32.gmra.mrb[54].mxu1 %vm359_vm0, %v5086_v25  ;;  %v5969_v45 = vpop.eup %5968 }
 0x40e   :  { %5978 = vrcp.f32 %v1969_v41  ;;  %2288 = vmatprep.mubr.f32.mxu0 %v6647_v43  ;;  %2377 = vmatprep.mubr.f32.mxu1 %v6647_v43 }
 0x40f   :  { %5980 = vrcp.f32 %v1971_v44 }
 0x414   :  { %v5971_v22 = vpop.eup %5970 }
 0x415   :  { %v5973_v31 = vpop.eup %5972  ;;  %v5326_v57 = vpack.c.bf16 %v5971_v22, %v5967_v14  ;;  %v7401_v22 = vpop.permute.xlu1 %2031 }
 0x416   :  { %v5975_v51 = vpop.eup %5974 }
 0x417   :  { %v5977_v59 = vpop.eup %5976 }
 0x418   :  { %v5979_v49 = vpop.eup %5978  ;;  %v5334_v37 = vpack.c.bf16 %v5977_v59, %v5969_v45 }
 0x419   :  { %v5981_v63 = vpop.eup %5980  ;;  %v5324_v20 = vpack.c.bf16 %v5979_v49, %v5973_v31 }
 0x41a   :  { %v5332_v34 = vpack.c.bf16 %v5981_v63, %v5975_v51 }
 0x41b   :  { %5325 = vmatprep.subr.bf16.mxu0 %v5324_v20 }
 0x41c   :  { %5333 = vmatprep.subr.bf16.mxu1 %v5332_v34  ;;  %5327 = vmatpush1.bf16.msra.mxu0 %v5326_v57 }
 0x41d   :  { %5335 = vmatpush1.bf16.msra.mxu1 %v5334_v37 }
 0x41f   :  { %5099 = vmatmul.mubr.msk.f32.vlgmr.msra.gmra.mrb[56].mxu0 %vm359_vm0, %v7330_v39 }
 0x420   :  { %5103 = vmatmul.mubr.msk.f32.vlgmr.msra.gmra.mrb[56].mxu1 %vm359_vm0, %v7330_v39  ;;  %2294 = vmatprep.mubr.f32.mxu0 %v6647_v43 }
 0x421   :  { %2383 = vmatprep.mubr.f32.mxu1 %v6647_v43 }
 0x423   :  { %5100 = vmatmul.mubr.msk.f32.gmra.mrb[58].mxu0 %vm359_vm0, %v7340_v16 }
 0x424   :  { %5104 = vmatmul.mubr.msk.f32.gmra.mrb[58].mxu1 %vm359_vm0, %v7340_v16  ;;  %2300 = vmatprep.mubr.f32.mxu0 %v6647_v43 }
 0x425   :  { %2389 = vmatprep.mubr.f32.mxu1 %v6647_v43 }
 0x427   :  { %5101 = vmatmul.mubr.msk.f32.gmra.mrb[60].mxu0 %vm359_vm0, %v5085_v12 }
 0x428   :  { %5105 = vmatmul.mubr.msk.f32.gmra.mrb[60].mxu1 %vm359_vm0, %v5085_v12  ;;  %2306 = vmatprep.mubr.f32.mxu0 %v6647_v43 }
 0x429   :  { %2395 = vmatprep.mubr.f32.mxu1 %v6647_v43 }
 0x42b   :  { %5102 = vmatmul.mubr.msk.f32.gmra.mrb[62].mxu0 %vm359_vm0, %v5086_v25 }
 0x42c   :  { %5106 = vmatmul.mubr.msk.f32.gmra.mrb[62].mxu1 %vm359_vm0, %v5086_v25  ;;  %2668 = vmatprep.mubr.f32.mxu0 %v6647_v43 }
 0x42d   :  { %2757 = vmatprep.mubr.f32.mxu1 %v6647_v43 }
 0x4d3   :  { %v2112_v42 = vpop.f32.mrb[48].mxu0 }
 0x4d4   :  { %v2113_v53 = vadd.f32 %v2112_v42, %v7383_v47  ;;  %v2201_v38 = vpop.f32.mrb[48].mxu1  ;;  %v2114_v54 = vpop.f32.mrb[49].mxu0 }
 0x4d5   :  { %v2202_v60 = vadd.f32 %v2201_v38, %v7383_v47  ;;  %v2115_v46 = vadd.f32 %v2114_v54, %v7383_v47  ;;  %v2203_v21 = vpop.f32.mrb[49].mxu1 }
 0x4d6   :  { %v2402_v1 = vsub.f32 0.0, %v2113_v53  ;;  %v2204_v2 = vadd.f32 %v2203_v21, %v7383_v47 }
 0x4d7   :  { %v2404_v40 = vsub.f32 0.0, %v2202_v60  ;;  %v2403_v4 = vsub.f32 0.0, %v2115_v46  ;;  %v2118_v55 = vpop.f32.mrb[50].mxu0 }
 0x4d8   :  { %v2434_v61 = vmul.f32 1.442695, %v2402_v1  ;;  %v2405_v5 = vsub.f32 0.0, %v2204_v2  ;;  %v2119_v32 = vadd.f32 %v2118_v55, %v7389_v3  ;;  %v2207_v7 = vpop.f32.mrb[50].mxu1  ;;  %v2120_v62 = vpop.f32.mrb[51].mxu0 }
 0x4d9   :  { %v2438_v39 = vmul.f32 1.442695, %v2404_v40  ;;  %v2436_v58 = vmul.f32 1.442695, %v2403_v4  ;;  %v2208_v8 = vadd.f32 %v2207_v7, %v7389_v3  ;;  %v2121_v52 = vadd.f32 %v2120_v62, %v7389_v3  ;;  %v2209_v13 = vpop.f32.mrb[51].mxu1 }
 0x4da   :  { %5982 = vpow2.f32 %v2434_v61  ;;  %v2440_v15 = vmul.f32 1.442695, %v2405_v5  ;;  %v2410_v16 = vsub.f32 0.0, %v2119_v32  ;;  %v2210_v17 = vadd.f32 %v2209_v13, %v7389_v3 }
 0x4db   :  { %5984 = vpow2.f32 %v2438_v39  ;;  %v2412_v11 = vsub.f32 0.0, %v2208_v8  ;;  %v2411_v35 = vsub.f32 0.0, %v2121_v52 }
 0x4dc   :  { %5986 = vpow2.f32 %v2436_v58  ;;  %v2450_v10 = vmul.f32 1.442695, %v2410_v16  ;;  %v2413_v23 = vsub.f32 0.0, %v2210_v17  ;;  %v2124_v26 = vpop.f32.mrb[52].mxu0  ;;  %v2213_v29 = vpop.f32.mrb[52].mxu1 }
 0x4dd   :  { %5988 = vpow2.f32 %v2440_v15  ;;  %v2454_v19 = vmul.f32 1.442695, %v2412_v11  ;;  %v2452_v0 = vmul.f32 1.442695, %v2411_v35  ;;  %v2125_v12 = vadd.f32 %v2124_v26, %v7395_v18  ;;  %v2126_v28 = vpop.f32.mrb[53].mxu0  ;;  %v2215_v30 = vpop.f32.mrb[53].mxu1 }
 0x4de   :  { %5990 = vpow2.f32 %v2450_v10  ;;  %v2456_v9 = vmul.f32 1.442695, %v2413_v23  ;;  %v2214_v50 = vadd.f32 %v2213_v29, %v7395_v18  ;;  %v2127_v33 = vadd.f32 %v2126_v28, %v7395_v18 }
 0x4df   :  { %5992 = vpow2.f32 %v2454_v19  ;;  %v2418_v56 = vsub.f32 0.0, %v2125_v12  ;;  %v2216_v36 = vadd.f32 %v2215_v30, %v7395_v18 }
 0x4e0   :  { %5994 = vpow2.f32 %v2452_v0  ;;  %v2420_v25 = vsub.f32 0.0, %v2214_v50  ;;  %v2419_v27 = vsub.f32 0.0, %v2127_v33  ;;  %v2130_v6 = vpop.f32.mrb[54].mxu0  ;;  %v2219_v24 = vpop.f32.mrb[54].mxu1 }
 0x4e1   :  { %5996 = vpow2.f32 %v2456_v9  ;;  %v2466_v41 = vmul.f32 1.442695, %v2418_v56  ;;  %v2421_v44 = vsub.f32 0.0, %v2216_v36  ;;  %v2132_v14 = vpop.f32.mrb[55].mxu0  ;;  %v2221_v45 = vpop.f32.mrb[55].mxu1  ;;  %v2131_v59 = vadd.f32 %v2130_v6, %v7401_v22 }
 0x4e2   :  { %v2470_v31 = vmul.f32 1.442695, %v2420_v25  ;;  %v2468_v57 = vmul.f32 1.442695, %v2419_v27  ;;  %v2220_v46 = vadd.f32 %v2219_v24, %v7401_v22  ;;  %v2133_v2 = vadd.f32 %v2132_v14, %v7401_v22 }
 0x4e3   :  { %5998 = vpow2.f32 %v2466_v41  ;;  %v2472_v51 = vmul.f32 1.442695, %v2421_v44  ;;  %v2426_v38 = vsub.f32 0.0, %v2131_v59  ;;  %v2222_v55 = vadd.f32 %v2221_v45, %v7401_v22 }
 0x4e4   :  { %v5983_v49 = vpop.eup %5982  ;;  %6000 = vpow2.f32 %v2470_v31  ;;  %v2428_v62 = vsub.f32 0.0, %v2220_v46  ;;  %v2427_v58 = vsub.f32 0.0, %v2133_v2 }
 0x4e5   :  { %v5985_v37 = vpop.eup %5984  ;;  %v2498_v63 = vadd.f32 1.0, %v5983_v49  ;;  %6002 = vpow2.f32 %v2468_v57  ;;  %v2482_v32 = vmul.f32 1.442695, %v2426_v38  ;;  %v2429_v13 = vsub.f32 0.0, %v2222_v55 }
 0x4e6   :  { %v5987_v20 = vpop.eup %5986  ;;  %v2500_v34 = vadd.f32 1.0, %v5985_v37  ;;  %6004 = vpow2.f32 %v2472_v51  ;;  %v2486_v35 = vmul.f32 1.442695, %v2428_v62  ;;  %v2484_v26 = vmul.f32 1.442695, %v2427_v58 }
 0x4e7   :  { %v5989_v42 = vpop.eup %5988  ;;  %6006 = vrcp.f32 %v2498_v63  ;;  %v2499_v53 = vadd.f32 1.0, %v5987_v20  ;;  %v2488_v19 = vmul.f32 1.442695, %v2429_v13 }
 0x4e8   :  { %v5991_v54 = vpop.eup %5990  ;;  %6008 = vrcp.f32 %v2500_v34  ;;  %v2501_v60 = vadd.f32 1.0, %v5989_v42 }
 0x4e9   :  { %v5993_v21 = vpop.eup %5992  ;;  %6010 = vrcp.f32 %v2499_v53  ;;  %v2506_v1 = vadd.f32 1.0, %v5991_v54 }
 0x4ea   :  { %v5995_v40 = vpop.eup %5994  ;;  %6012 = vrcp.f32 %v2501_v60  ;;  %v2508_v4 = vadd.f32 1.0, %v5993_v21 }
 0x4eb   :  { %v5997_v61 = vpop.eup %5996  ;;  %6014 = vrcp.f32 %v2506_v1  ;;  %v2507_v5 = vadd.f32 1.0, %v5995_v40 }
 0x4ec   :  { %6016 = vrcp.f32 %v2508_v4  ;;  %v2509_v7 = vadd.f32 1.0, %v5997_v61 }
 0x4ed   :  { %v5999_v39 = vpop.eup %5998  ;;  %6018 = vrcp.f32 %v2507_v5 }
 0x4ee   :  { %v6001_v8 = vpop.eup %6000  ;;  %6020 = vrcp.f32 %v2509_v7  ;;  %v2514_v52 = vadd.f32 1.0, %v5999_v39 }
 0x4ef   :  { %v6003_v15 = vpop.eup %6002  ;;  %v2516_v16 = vadd.f32 1.0, %v6001_v8  ;;  %6022 = vpow2.f32 %v2482_v32 }
 0x4f0   :  { %v6005_v17 = vpop.eup %6004  ;;  %6024 = vrcp.f32 %v2514_v52  ;;  %v2515_v11 = vadd.f32 1.0, %v6003_v15 }
 0x4f1   :  { %v7407_v10 = vpop.eup %6006  ;;  %6026 = vrcp.f32 %v2516_v16  ;;  %v2517_v23 = vadd.f32 1.0, %v6005_v17 }
 0x4f2   :  { %v7409_v29 = vpop.eup %6008  ;;  %6028 = vrcp.f32 %v2515_v11  ;;  %v2290_v0 = vpop.f32.mrb[56].mxu0 }
 0x4f3   :  { %v7411_v12 = vpop.eup %6010  ;;  %6030 = vrcp.f32 %v2517_v23  ;;  %v2291_v28 = vadd.f32 %v2290_v0, %v7383_v47  ;;  %v2379_v30 = vpop.f32.mrb[56].mxu1 }
 0x4f4   :  { %v2292_v9 = vpop.f32.mrb[57].mxu0  ;;  %v7414_v50 = vpop.eup %6012  ;;  %6032 = vpow2.f32 %v2486_v35  ;;  %v2380_v33 = vadd.f32 %v2379_v30, %v7383_v47 }
 0x4f5   :  { %v2293_v56 = vadd.f32 %v2292_v9, %v7383_v47  ;;  %v2381_v36 = vpop.f32.mrb[57].mxu1  ;;  %v7418_v25 = vpop.eup %6014  ;;  %6034 = vpow2.f32 %v2484_v26  ;;  %v2406_v27 = vsub.f32 0.0, %v2291_v28 }
 0x4f6   :  { %v2382_v6 = vadd.f32 %v2381_v36, %v7383_v47  ;;  %v7421_v24 = vpop.eup %6016  ;;  %6036 = vpow2.f32 %v2488_v19  ;;  %v2408_v41 = vsub.f32 0.0, %v2380_v33  ;;  %v2296_v14 = vpop.f32.mrb[58].mxu0  ;;  %v5338_v45 = vpack.c.bf16 %v7418_v25, %v7407_v10 }
 0x4f7   :  { %v2407_v44 = vsub.f32 0.0, %v2293_v56  ;;  %v6019_v31 = vpop.eup %6018  ;;  %v2442_v57 = vmul.f32 1.442695, %v2406_v27  ;;  %v2297_v59 = vadd.f32 %v2296_v14, %v7389_v3  ;;  %v2385_v49 = vpop.f32.mrb[58].mxu1  ;;  %v5346_v63 = vpack.c.bf16 %v7421_v24, %v7409_v29 }
 0x4f8   :  { %v2409_v51 = vsub.f32 0.0, %v2382_v6  ;;  %v2298_v37 = vpop.f32.mrb[59].mxu0  ;;  %v7428_v47 = vpop.eup %6020  ;;  %v2446_v20 = vmul.f32 1.442695, %v2408_v41  ;;  %v2386_v42 = vadd.f32 %v2385_v49, %v7389_v3  ;;  %v5336_v35 = vpack.c.bf16 %v6019_v31, %v7411_v12 }
 0x4f9   :  { %v2444_v34 = vmul.f32 1.442695, %v2407_v44  ;;  %v2299_v53 = vadd.f32 %v2298_v37, %v7389_v3  ;;  %v2387_v38 = vpop.f32.mrb[59].mxu1  ;;  %v6023_v54 = vpop.eup %6022  ;;  %6038 = vpow2.f32 %v2442_v57  ;;  %v2414_v46 = vsub.f32 0.0, %v2297_v59 }
 0x4fa   :  { %v2448_v60 = vmul.f32 1.442695, %v2409_v51  ;;  %v2388_v21 = vadd.f32 %v2387_v38, %v7389_v3  ;;  %v7433_v1 = vpop.eup %6024  ;;  %v2522_v2 = vadd.f32 1.0, %v6023_v54  ;;  %6040 = vpow2.f32 %v2446_v20  ;;  %v2302_v55 = vpop.f32.mrb[60].mxu0  ;;  %5337 = vmatprep.subr.bf16.mxu0 %v5336_v35 }
 0x4fb   :  { %v2416_v40 = vsub.f32 0.0, %v2386_v42  ;;  %v2415_v4 = vsub.f32 0.0, %v2299_v53  ;;  %v7435_v61 = vpop.eup %6026  ;;  %6042 = vpow2.f32 %v2444_v34  ;;  %v2458_v5 = vmul.f32 1.442695, %v2414_v46  ;;  %v2391_v7 = vpop.f32.mrb[60].mxu1  ;;  %5339 = vmatpush1.bf16.msra.mxu0 %v5338_v45 }
 0x4fc   :  { %v2303_v32 = vadd.f32 %v2302_v55, %v7395_v18  ;;  %v2304_v62 = vpop.f32.mrb[61].mxu0  ;;  %v7438_v39 = vpop.eup %6028  ;;  %6044 = vrcp.f32 %v2522_v2  ;;  %v2417_v8 = vsub.f32 0.0, %v2388_v21  ;;  %v2392_v16 = vadd.f32 %v2391_v7, %v7395_v18 }
 0x4fd   :  { %v2462_v58 = vmul.f32 1.442695, %v2416_v40  ;;  %v2460_v3 = vmul.f32 1.442695, %v2415_v4  ;;  %v2393_v52 = vpop.f32.mrb[61].mxu1  ;;  %v7440_v13 = vpop.eup %6030  ;;  %6046 = vpow2.f32 %v2448_v60  ;;  %v2305_v25 = vadd.f32 %v2304_v62, %v7395_v18 }
 0x4fe   :  { %v2422_v15 = vsub.f32 0.0, %v2303_v32  ;;  %v6033_v17 = vpop.eup %6032  ;;  %6048 = vpow2.f32 %v2458_v5  ;;  %v2308_v11 = vpop.f32.mrb[62].mxu0  ;;  %v2464_v30 = vmul.f32 1.442695, %v2417_v8  ;;  %v2424_v36 = vsub.f32 0.0, %v2392_v16 }
 0x4ff   :  { %v6035_v10 = vpop.eup %6034  ;;  %v2524_v23 = vadd.f32 1.0, %v6033_v17  ;;  %6050 = vpow2.f32 %v2462_v58  ;;  %v2397_v26 = vpop.f32.mrb[62].mxu1  ;;  %v2394_v27 = vadd.f32 %v2393_v52, %v7395_v18  ;;  %v5344_v6 = vpack.c.bf16 %v7428_v47, %v7414_v50 }
 0x500   :  { %v2310_v19 = vpop.f32.mrb[63].mxu0  ;;  %v6037_v0 = vpop.eup %6036  ;;  %v2523_v28 = vadd.f32 1.0, %v6035_v10  ;;  %6052 = vpow2.f32 %v2460_v3  ;;  %v2474_v56 = vmul.f32 1.442695, %v2422_v15  ;;  %v2309_v14 = vadd.f32 %v2308_v11, %v7401_v22  ;;  %v7472_v10 = vld [vmem:[%s8036_s1 + $0xa8] sm:$0xff] }
 0x501   :  { %v2399_v9 = vpop.f32.mrb[63].mxu1  ;;  %6054 = vrcp.f32 %v2524_v23  ;;  %v2525_v33 = vadd.f32 1.0, %v6037_v0  ;;  %v2478_v51 = vmul.f32 1.442695, %v2424_v36  ;;  %5345 = vmatprep.subr.bf16.mxu1 %v5344_v6  ;;  %v2423_v49 = vsub.f32 0.0, %v2305_v25  ;;  %v5109_v25 = vld [vmem:[%s8036_s1 + $0xb0] sm:$0xff] }
 0x502   :  { %6056 = vrcp.f32 %v2523_v28  ;;  %5347 = vmatpush1.bf16.msra.mxu1 %v5346_v63  ;;  %v2425_v50 = vsub.f32 0.0, %v2394_v27  ;;  %v2398_v37 = vadd.f32 %v2397_v26, %v7401_v22  ;;  %v2430_v42 = vsub.f32 0.0, %v2309_v14 }
 0x503   :  { %v6039_v12 = vpop.eup %6038  ;;  %6058 = vrcp.f32 %v2525_v33  ;;  %v2311_v53 = vadd.f32 %v2310_v19, %v7401_v22  ;;  %v2400_v60 = vadd.f32 %v2399_v9, %v7401_v22  ;;  %v2476_v63 = vmul.f32 1.442695, %v2423_v49 }
 0x504   :  { %v6041_v41 = vpop.eup %6040  ;;  %v2502_v44 = vadd.f32 1.0, %v6039_v12  ;;  %6060 = vpow2.f32 %v2464_v30  ;;  %v2480_v2 = vmul.f32 1.442695, %v2425_v50  ;;  %v2490_v4 = vmul.f32 1.442695, %v2430_v42 }
 0x505   :  { %v6043_v31 = vpop.eup %6042  ;;  %v2504_v57 = vadd.f32 1.0, %v6041_v41  ;;  %6062 = vpow2.f32 %v2474_v56  ;;  %v2431_v55 = vsub.f32 0.0, %v2311_v53  ;;  %v2433_v7 = vsub.f32 0.0, %v2400_v60 }
 0x506   :  { %v6045_v45 = vpop.eup %6044  ;;  %6064 = vrcp.f32 %v2502_v44  ;;  %v2503_v59 = vadd.f32 1.0, %v6043_v31 }
 0x507   :  { %v6047_v18 = vpop.eup %6046  ;;  %6066 = vrcp.f32 %v2504_v57  ;;  %v5342_v47 = vpack.c.bf16 %v6045_v45, %v7433_v1  ;;  %v2432_v1 = vsub.f32 0.0, %v2398_v37  ;;  %v2492_v16 = vmul.f32 1.442695, %v2431_v55  ;;  %v5110_v57 = vld [vmem:[%s8036_s1 + $0xb8] sm:$0xff] }
 0x508   :  { %v6049_v20 = vpop.eup %6048  ;;  %6068 = vrcp.f32 %v2503_v59  ;;  %v2505_v34 = vadd.f32 1.0, %v6047_v18  ;;  %v2496_v17 = vmul.f32 1.442695, %v2433_v7  ;;  %v7521_v7 = vpop.permute.xlu1 %2579 }
 0x509   :  { %v6051_v38 = vpop.eup %6050  ;;  %v2510_v54 = vadd.f32 1.0, %v6049_v20  ;;  %6070 = vpow2.f32 %v2478_v51  ;;  %v2494_v52 = vmul.f32 1.442695, %v2432_v1 }
 0x50a   :  { %v6053_v29 = vpop.eup %6052  ;;  %6072 = vrcp.f32 %v2505_v34  ;;  %v2512_v24 = vadd.f32 1.0, %v6051_v38 }
 0x50b   :  { %v6055_v46 = vpop.eup %6054  ;;  %6074 = vrcp.f32 %v2510_v54  ;;  %v2511_v21 = vadd.f32 1.0, %v6053_v29 }
 0x50c   :  { %v6057_v40 = vpop.eup %6056  ;;  %6076 = vrcp.f32 %v2512_v24  ;;  %v5350_v5 = vpack.c.bf16 %v6055_v46, %v7435_v61  ;;  %v7462_v61 = vld [vmem:[%s8036_s1 + $0xa0] sm:$0xff] }
 0x50d   :  { %v6059_v32 = vpop.eup %6058  ;;  %6078 = vrcp.f32 %v2511_v21  ;;  %v5340_v22 = vpack.c.bf16 %v6057_v40, %v7438_v39 }
 0x50e   :  { %v6061_v62 = vpop.eup %6060  ;;  %6080 = vpow2.f32 %v2476_v63  ;;  %v5348_v58 = vpack.c.bf16 %v6059_v32, %v7440_v13  ;;  %v7515_v63 = vpop.permute.xlu0 %2574 }
 0x50f   :  { %v6063_v3 = vpop.eup %6062  ;;  %v2513_v8 = vadd.f32 1.0, %v6061_v62  ;;  %6082 = vpow2.f32 %v2480_v2  ;;  %5341 = vmatprep.subr.bf16.mxu0 %v5340_v22 }
 0x510   :  { %v6065_v15 = vpop.eup %6064  ;;  %6084 = vpow2.f32 %v2490_v4  ;;  %5349 = vmatprep.subr.bf16.mxu1 %v5348_v58  ;;  %5343 = vmatpush1.bf16.msra.mxu0 %v5342_v47  ;;  %v2518_v28 = vadd.f32 1.0, %v6063_v3 }
 0x511   :  { %v6067_v39 = vpop.eup %6066  ;;  %6086 = vrcp.f32 %v2513_v8  ;;  %5351 = vmatpush1.bf16.msra.mxu1 %v5350_v5 }
 0x512   :  { %v6069_v13 = vpop.eup %6068  ;;  %6088 = vpow2.f32 %v2494_v52 }
 0x513   :  { %v6071_v11 = vpop.eup %6070  ;;  %5115 = vmatmul.mubr.msk.f32.vlgmr.msra.gmra.mrb[64].mxu0 %vm359_vm0, %v7462_v61  ;;  %6090 = vpow2.f32 %v2492_v16 }
 0x514   :  { %v6073_v35 = vpop.eup %6072  ;;  %5119 = vmatmul.mubr.msk.f32.vlgmr.msra.gmra.mrb[64].mxu1 %vm359_vm0, %v7462_v61  ;;  %2674 = vmatprep.mubr.f32.mxu0 %v6647_v43  ;;  %6092 = vpow2.f32 %v2496_v17  ;;  %v2520_v33 = vadd.f32 1.0, %v6071_v11 }
 0x515   :  { %v6075_v23 = vpop.eup %6074  ;;  %2763 = vmatprep.mubr.f32.mxu1 %v6647_v43  ;;  %6094 = vrcp.f32 %v2518_v28 }
 0x516   :  { %v6077_v26 = vpop.eup %6076  ;;  %v5354_v19 = vpack.c.bf16 %v6075_v23, %v6065_v15  ;;  %6096 = vrcp.f32 %v2520_v33 }
 0x517   :  { %v6079_v0 = vpop.eup %6078  ;;  %5116 = vmatmul.mubr.msk.f32.gmra.mrb[66].mxu0 %vm359_vm0, %v7472_v10  ;;  %v5362_v30 = vpack.c.bf16 %v6077_v26, %v6067_v39  ;;  %v7527_v26 = vpop.permute.xlu0 %2584 }
 0x518   :  { %v6081_v9 = vpop.eup %6080  ;;  %5120 = vmatmul.mubr.msk.f32.gmra.mrb[66].mxu1 %vm359_vm0, %v7472_v10  ;;  %v5352_v56 = vpack.c.bf16 %v6079_v0, %v6069_v13  ;;  %2680 = vmatprep.mubr.f32.mxu0 %v6647_v43 }
 0x519   :  { %v6083_v36 = vpop.eup %6082  ;;  %2769 = vmatprep.mubr.f32.mxu1 %v6647_v43  ;;  %v2519_v27 = vadd.f32 1.0, %v6081_v9 }
 0x51a   :  { %v6085_v12 = vpop.eup %6084  ;;  %5353 = vmatprep.subr.bf16.mxu0 %v5352_v56  ;;  %v2521_v41 = vadd.f32 1.0, %v6083_v36 }
 0x51b   :  { %v6087_v6 = vpop.eup %6086  ;;  %v2526_v44 = vadd.f32 1.0, %v6085_v12  ;;  %5355 = vmatpush1.bf16.msra.mxu0 %v5354_v19 }
 0x51c   :  { %v5360_v14 = vpack.c.bf16 %v6087_v6, %v6073_v35  ;;  %5117 = vmatmul.mubr.msk.f32.gmra.mrb[68].mxu0 %vm359_vm0, %v5109_v25  ;;  %5121 = vmatmul.mubr.msk.f32.gmra.mrb[68].mxu1 %vm359_vm0, %v5109_v25  ;;  %v6089_v31 = vpop.eup %6088 }
 0x51d   :  { %6098 = vrcp.f32 %v2526_v44  ;;  %2686 = vmatprep.mubr.f32.mxu0 %v6647_v43  ;;  %2775 = vmatprep.mubr.f32.mxu1 %v6647_v43  ;;  %v6091_v51 = vpop.eup %6090  ;;  %v2528_v45 = vadd.f32 1.0, %v6089_v31 }
 0x51e   :  { %6100 = vrcp.f32 %v2519_v27  ;;  %5361 = vmatprep.subr.bf16.mxu1 %v5360_v14  ;;  %v6093_v59 = vpop.eup %6092  ;;  %v2527_v49 = vadd.f32 1.0, %v6091_v51 }
 0x51f   :  { %6102 = vrcp.f32 %v2521_v41  ;;  %5363 = vmatpush1.bf16.msra.mxu1 %v5362_v30  ;;  %v2529_v18 = vadd.f32 1.0, %v6093_v59  ;;  %v6095_v50 = vpop.eup %6094 }
 0x520   :  { %6104 = vrcp.f32 %v2528_v45  ;;  %5118 = vmatmul.mubr.msk.f32.gmra.mrb[70].mxu0 %vm359_vm0, %v5110_v57  ;;  %5122 = vmatmul.mubr.msk.f32.gmra.mrb[70].mxu1 %vm359_vm0, %v5110_v57  ;;  %v6097_v37 = vpop.eup %6096 }
 0x521   :  { %6106 = vrcp.f32 %v2527_v49  ;;  %2846 = vmatprep.mubr.f32.mxu0 %v6647_v43  ;;  %2935 = vmatprep.mubr.f32.mxu1 %v6647_v43 }
 0x522   :  { %6108 = vrcp.f32 %v2529_v18 }
 0x527   :  { %v6099_v47 = vpop.eup %6098 }
 0x528   :  { %v6101_v20 = vpop.eup %6100  ;;  %v5358_v34 = vpack.c.bf16 %v6099_v47, %v6095_v50  ;;  %v7533_v47 = vpop.permute.xlu1 %2589 }
 0x529   :  { %v6103_v42 = vpop.eup %6102 }
 0x52a   :  { %v6105_v53 = vpop.eup %6104 }
 0x52b   :  { %v6107_v38 = vpop.eup %6106  ;;  %v5366_v54 = vpack.c.bf16 %v6105_v53, %v6097_v37 }
 0x52c   :  { %v6109_v60 = vpop.eup %6108  ;;  %v5356_v29 = vpack.c.bf16 %v6107_v38, %v6101_v20 }
 0x52d   :  { %v5364_v24 = vpack.c.bf16 %v6109_v60, %v6103_v42 }
 0x52e   :  { %5357 = vmatprep.subr.bf16.mxu0 %v5356_v29 }
 0x52f   :  { %5365 = vmatprep.subr.bf16.mxu1 %v5364_v24  ;;  %5359 = vmatpush1.bf16.msra.mxu0 %v5358_v34 }
 0x530   :  { %5367 = vmatpush1.bf16.msra.mxu1 %v5366_v54 }
 0x532   :  { %5123 = vmatmul.mubr.msk.f32.vlgmr.msra.gmra.mrb[72].mxu0 %vm359_vm0, %v7462_v61 }
 0x533   :  { %5127 = vmatmul.mubr.msk.f32.vlgmr.msra.gmra.mrb[72].mxu1 %vm359_vm0, %v7462_v61  ;;  %2852 = vmatprep.mubr.f32.mxu0 %v6647_v43 }
 0x534   :  { %2941 = vmatprep.mubr.f32.mxu1 %v6647_v43 }
 0x536   :  { %5124 = vmatmul.mubr.msk.f32.gmra.mrb[74].mxu0 %vm359_vm0, %v7472_v10 }
 0x537   :  { %5128 = vmatmul.mubr.msk.f32.gmra.mrb[74].mxu1 %vm359_vm0, %v7472_v10  ;;  %2858 = vmatprep.mubr.f32.mxu0 %v6647_v43 }
 0x538   :  { %2947 = vmatprep.mubr.f32.mxu1 %v6647_v43 }
 0x53a   :  { %5125 = vmatmul.mubr.msk.f32.gmra.mrb[76].mxu0 %vm359_vm0, %v5109_v25 }
 0x53b   :  { %5129 = vmatmul.mubr.msk.f32.gmra.mrb[76].mxu1 %vm359_vm0, %v5109_v25  ;;  %2864 = vmatprep.mubr.f32.mxu0 %v6647_v43 }
 0x53c   :  { %2953 = vmatprep.mubr.f32.mxu1 %v6647_v43 }
 0x53e   :  { %5126 = vmatmul.mubr.msk.f32.gmra.mrb[78].mxu0 %vm359_vm0, %v5110_v57 }
 0x53f   :  { %5130 = vmatmul.mubr.msk.f32.gmra.mrb[78].mxu1 %vm359_vm0, %v5110_v57  ;;  %3226 = vmatprep.mubr.f32.mxu0 %v6647_v43 }
 0x540   :  { %3315 = vmatprep.mubr.f32.mxu1 %v6647_v43 }
 0x5e6   :  { %v2670_v46 = vpop.f32.mrb[64].mxu0 }
 0x5e7   :  { %v2671_v21 = vadd.f32 %v2670_v46, %v7515_v63  ;;  %v2759_v2 = vpop.f32.mrb[64].mxu1  ;;  %v2672_v1 = vpop.f32.mrb[65].mxu0 }
 0x5e8   :  { %v2760_v40 = vadd.f32 %v2759_v2, %v7515_v63  ;;  %v2673_v4 = vadd.f32 %v2672_v1, %v7515_v63  ;;  %v2761_v55 = vpop.f32.mrb[65].mxu1 }
 0x5e9   :  { %v2960_v5 = vsub.f32 0.0, %v2671_v21  ;;  %v2762_v32 = vadd.f32 %v2761_v55, %v7515_v63 }
 0x5ea   :  { %v2962_v22 = vsub.f32 0.0, %v2760_v40  ;;  %v2961_v62 = vsub.f32 0.0, %v2673_v4  ;;  %v2676_v58 = vpop.f32.mrb[66].mxu0 }
 0x5eb   :  { %v2992_v3 = vmul.f32 1.442695, %v2960_v5  ;;  %v2963_v8 = vsub.f32 0.0, %v2762_v32  ;;  %v2677_v52 = vadd.f32 %v2676_v58, %v7521_v7  ;;  %v2765_v15 = vpop.f32.mrb[66].mxu1  ;;  %v2678_v16 = vpop.f32.mrb[67].mxu0 }
 0x5ec   :  { %v2996_v61 = vmul.f32 1.442695, %v2962_v22  ;;  %v2994_v39 = vmul.f32 1.442695, %v2961_v62  ;;  %v2766_v17 = vadd.f32 %v2765_v15, %v7521_v7  ;;  %v2679_v13 = vadd.f32 %v2678_v16, %v7521_v7  ;;  %v2767_v11 = vpop.f32.mrb[67].mxu1 }
 0x5ed   :  { %6110 = vpow2.f32 %v2992_v3  ;;  %v2998_v35 = vmul.f32 1.442695, %v2963_v8  ;;  %v2968_v10 = vsub.f32 0.0, %v2677_v52  ;;  %v2768_v23 = vadd.f32 %v2767_v11, %v7521_v7 }
 0x5ee   :  { %6112 = vpow2.f32 %v2996_v61  ;;  %v2970_v19 = vsub.f32 0.0, %v2766_v17  ;;  %v2969_v0 = vsub.f32 0.0, %v2679_v13 }
 0x5ef   :  { %6114 = vpow2.f32 %v2994_v39  ;;  %v3008_v28 = vmul.f32 1.442695, %v2968_v10  ;;  %v2971_v30 = vsub.f32 0.0, %v2768_v23  ;;  %v2682_v9 = vpop.f32.mrb[68].mxu0  ;;  %v2771_v33 = vpop.f32.mrb[68].mxu1 }
 0x5f0   :  { %6116 = vpow2.f32 %v2998_v35  ;;  %v3012_v56 = vmul.f32 1.442695, %v2970_v19  ;;  %v3010_v36 = vmul.f32 1.442695, %v2969_v0  ;;  %v2683_v25 = vadd.f32 %v2682_v9, %v7527_v26  ;;  %v2684_v12 = vpop.f32.mrb[69].mxu0  ;;  %v2773_v27 = vpop.f32.mrb[69].mxu1 }
 0x5f1   :  { %6118 = vpow2.f32 %v3008_v28  ;;  %v3014_v6 = vmul.f32 1.442695, %v2971_v30  ;;  %v2772_v41 = vadd.f32 %v2771_v33, %v7527_v26  ;;  %v2685_v44 = vadd.f32 %v2684_v12, %v7527_v26 }
 0x5f2   :  { %6120 = vpow2.f32 %v3012_v56  ;;  %v2976_v14 = vsub.f32 0.0, %v2683_v25  ;;  %v2774_v31 = vadd.f32 %v2773_v27, %v7527_v26 }
 0x5f3   :  { %6122 = vpow2.f32 %v3010_v36  ;;  %v2978_v57 = vsub.f32 0.0, %v2772_v41  ;;  %v2977_v51 = vsub.f32 0.0, %v2685_v44  ;;  %v2688_v45 = vpop.f32.mrb[70].mxu0  ;;  %v2777_v59 = vpop.f32.mrb[70].mxu1 }
 0x5f4   :  { %6124 = vpow2.f32 %v3014_v6  ;;  %v3024_v49 = vmul.f32 1.442695, %v2976_v14  ;;  %v2979_v18 = vsub.f32 0.0, %v2774_v31  ;;  %v2690_v50 = vpop.f32.mrb[71].mxu0  ;;  %v2779_v37 = vpop.f32.mrb[71].mxu1  ;;  %v2689_v53 = vadd.f32 %v2688_v45, %v7533_v47 }
 0x5f5   :  { %v3028_v20 = vmul.f32 1.442695, %v2978_v57  ;;  %v3026_v34 = vmul.f32 1.442695, %v2977_v51  ;;  %v2778_v4 = vadd.f32 %v2777_v59, %v7533_v47  ;;  %v2691_v32 = vadd.f32 %v2690_v50, %v7533_v47 }
 0x5f6   :  { %6126 = vpow2.f32 %v3024_v49  ;;  %v3030_v42 = vmul.f32 1.442695, %v2979_v18  ;;  %v2984_v2 = vsub.f32 0.0, %v2689_v53  ;;  %v2780_v58 = vadd.f32 %v2779_v37, %v7533_v47 }
 0x5f7   :  { %v6111_v38 = vpop.eup %6110  ;;  %6128 = vpow2.f32 %v3028_v20  ;;  %v2986_v16 = vsub.f32 0.0, %v2778_v4  ;;  %v2985_v39 = vsub.f32 0.0, %v2691_v32 }
 0x5f8   :  { %v6113_v54 = vpop.eup %6112  ;;  %v3056_v60 = vadd.f32 1.0, %v6111_v38  ;;  %6130 = vpow2.f32 %v3026_v34  ;;  %v3040_v52 = vmul.f32 1.442695, %v2984_v2  ;;  %v2987_v11 = vsub.f32 0.0, %v2780_v58 }
 0x5f9   :  { %v6115_v29 = vpop.eup %6114  ;;  %v3058_v24 = vadd.f32 1.0, %v6113_v54  ;;  %6132 = vpow2.f32 %v3030_v42  ;;  %v3044_v0 = vmul.f32 1.442695, %v2986_v16  ;;  %v3042_v9 = vmul.f32 1.442695, %v2985_v39 }
 0x5fa   :  { %v6117_v46 = vpop.eup %6116  ;;  %6134 = vrcp.f32 %v3056_v60  ;;  %v3057_v21 = vadd.f32 1.0, %v6115_v29  ;;  %v3046_v56 = vmul.f32 1.442695, %v2987_v11 }
 0x5fb   :  { %v6119_v1 = vpop.eup %6118  ;;  %6136 = vrcp.f32 %v3058_v24  ;;  %v3059_v40 = vadd.f32 1.0, %v6117_v46 }
 0x5fc   :  { %v6121_v55 = vpop.eup %6120  ;;  %6138 = vrcp.f32 %v3057_v21  ;;  %v3064_v5 = vadd.f32 1.0, %v6119_v1 }
 0x5fd   :  { %v6123_v22 = vpop.eup %6122  ;;  %6140 = vrcp.f32 %v3059_v40  ;;  %v3066_v62 = vadd.f32 1.0, %v6121_v55 }
 0x5fe   :  { %v6125_v3 = vpop.eup %6124  ;;  %6142 = vrcp.f32 %v3064_v5  ;;  %v3065_v8 = vadd.f32 1.0, %v6123_v22 }
 0x5ff   :  { %6144 = vrcp.f32 %v3066_v62  ;;  %v3067_v15 = vadd.f32 1.0, %v6125_v3 }
 0x600   :  { %v6127_v61 = vpop.eup %6126  ;;  %6146 = vrcp.f32 %v3065_v8 }
 0x601   :  { %v6129_v17 = vpop.eup %6128  ;;  %6148 = vrcp.f32 %v3067_v15  ;;  %v3072_v13 = vadd.f32 1.0, %v6127_v61 }
 0x602   :  { %v6131_v35 = vpop.eup %6130  ;;  %v3074_v10 = vadd.f32 1.0, %v6129_v17  ;;  %6150 = vpow2.f32 %v3040_v52 }
 0x603   :  { %v6133_v23 = vpop.eup %6132  ;;  %6152 = vrcp.f32 %v3072_v13  ;;  %v3073_v19 = vadd.f32 1.0, %v6131_v35 }
 0x604   :  { %v7539_v28 = vpop.eup %6134  ;;  %6154 = vrcp.f32 %v3074_v10  ;;  %v3075_v30 = vadd.f32 1.0, %v6133_v23 }
 0x605   :  { %v7541_v33 = vpop.eup %6136  ;;  %6156 = vrcp.f32 %v3073_v19  ;;  %v2848_v36 = vpop.f32.mrb[72].mxu0 }
 0x606   :  { %v7543_v25 = vpop.eup %6138  ;;  %6158 = vrcp.f32 %v3075_v30  ;;  %v2849_v12 = vadd.f32 %v2848_v36, %v7515_v63  ;;  %v2937_v27 = vpop.f32.mrb[72].mxu1 }
 0x607   :  { %v2850_v6 = vpop.f32.mrb[73].mxu0  ;;  %v7546_v41 = vpop.eup %6140  ;;  %6160 = vpow2.f32 %v3044_v0  ;;  %v2938_v44 = vadd.f32 %v2937_v27, %v7515_v63 }
 0x608   :  { %v2851_v14 = vadd.f32 %v2850_v6, %v7515_v63  ;;  %v2939_v31 = vpop.f32.mrb[73].mxu1  ;;  %v7550_v57 = vpop.eup %6142  ;;  %6162 = vpow2.f32 %v3042_v9  ;;  %v2964_v51 = vsub.f32 0.0, %v2849_v12 }
 0x609   :  { %v2940_v45 = vadd.f32 %v2939_v31, %v7515_v63  ;;  %v7553_v59 = vpop.eup %6144  ;;  %6164 = vpow2.f32 %v3046_v56  ;;  %v2966_v49 = vsub.f32 0.0, %v2938_v44  ;;  %v2854_v50 = vpop.f32.mrb[74].mxu0  ;;  %v5370_v37 = vpack.c.bf16 %v7550_v57, %v7539_v28 }
 0x60a   :  { %v2965_v18 = vsub.f32 0.0, %v2851_v14  ;;  %v6147_v20 = vpop.eup %6146  ;;  %v3000_v34 = vmul.f32 1.442695, %v2964_v51  ;;  %v2855_v53 = vadd.f32 %v2854_v50, %v7521_v7  ;;  %v2943_v38 = vpop.f32.mrb[74].mxu1  ;;  %v5378_v60 = vpack.c.bf16 %v7553_v59, %v7541_v33 }
 0x60b   :  { %v2967_v42 = vsub.f32 0.0, %v2940_v45  ;;  %v2856_v54 = vpop.f32.mrb[75].mxu0  ;;  %v7560_v63 = vpop.eup %6148  ;;  %v3004_v29 = vmul.f32 1.442695, %v2966_v49  ;;  %v2944_v46 = vadd.f32 %v2943_v38, %v7521_v7  ;;  %v5368_v0 = vpack.c.bf16 %v6147_v20, %v7543_v25 }
 0x60c   :  { %v3002_v24 = vmul.f32 1.442695, %v2965_v18  ;;  %v2857_v21 = vadd.f32 %v2856_v54, %v7521_v7  ;;  %v2945_v2 = vpop.f32.mrb[75].mxu1  ;;  %v6151_v1 = vpop.eup %6150  ;;  %6166 = vpow2.f32 %v3000_v34  ;;  %v2972_v4 = vsub.f32 0.0, %v2855_v53 }
 0x60d   :  { %v3006_v40 = vmul.f32 1.442695, %v2967_v42  ;;  %v2946_v55 = vadd.f32 %v2945_v2, %v7521_v7  ;;  %v7565_v5 = vpop.eup %6152  ;;  %v3080_v32 = vadd.f32 1.0, %v6151_v1  ;;  %6168 = vpow2.f32 %v3004_v29  ;;  %v2860_v58 = vpop.f32.mrb[76].mxu0  ;;  %5369 = vmatprep.subr.bf16.mxu0 %v5368_v0 }
 0x60e   :  { %v2974_v22 = vsub.f32 0.0, %v2944_v46  ;;  %v2973_v62 = vsub.f32 0.0, %v2857_v21  ;;  %v7567_v3 = vpop.eup %6154  ;;  %6170 = vpow2.f32 %v3002_v24  ;;  %v3016_v8 = vmul.f32 1.442695, %v2972_v4  ;;  %v2949_v15 = vpop.f32.mrb[76].mxu1  ;;  %5371 = vmatpush1.bf16.msra.mxu0 %v5370_v37 }
 0x60f   :  { %v2861_v52 = vadd.f32 %v2860_v58, %v7527_v26  ;;  %v2862_v16 = vpop.f32.mrb[77].mxu0  ;;  %v7570_v61 = vpop.eup %6156  ;;  %6172 = vrcp.f32 %v3080_v32  ;;  %v2975_v17 = vsub.f32 0.0, %v2946_v55  ;;  %v2950_v10 = vadd.f32 %v2949_v15, %v7527_v26 }
 0x610   :  { %v3020_v39 = vmul.f32 1.442695, %v2974_v22  ;;  %v3018_v7 = vmul.f32 1.442695, %v2973_v62  ;;  %v2951_v13 = vpop.f32.mrb[77].mxu1  ;;  %v7572_v11 = vpop.eup %6158  ;;  %6174 = vpow2.f32 %v3006_v40  ;;  %v2863_v57 = vadd.f32 %v2862_v16, %v7527_v26 }
 0x611   :  { %v2980_v35 = vsub.f32 0.0, %v2861_v52  ;;  %v6161_v23 = vpop.eup %6160  ;;  %6176 = vpow2.f32 %v3016_v8  ;;  %v2866_v19 = vpop.f32.mrb[78].mxu0  ;;  %v3022_v27 = vmul.f32 1.442695, %v2975_v17  ;;  %v2982_v31 = vsub.f32 0.0, %v2950_v10 }
 0x612   :  { %v6163_v28 = vpop.eup %6162  ;;  %v3082_v30 = vadd.f32 1.0, %v6161_v23  ;;  %6178 = vpow2.f32 %v3020_v39  ;;  %v2955_v9 = vpop.f32.mrb[78].mxu1  ;;  %v2952_v51 = vadd.f32 %v2951_v13, %v7527_v26  ;;  %v5376_v45 = vpack.c.bf16 %v7560_v63, %v7546_v41 }
 0x613   :  { %v2868_v56 = vpop.f32.mrb[79].mxu0  ;;  %v6165_v36 = vpop.eup %6164  ;;  %v3081_v12 = vadd.f32 1.0, %v6163_v28  ;;  %6180 = vpow2.f32 %v3018_v7  ;;  %v3032_v14 = vmul.f32 1.442695, %v2980_v35  ;;  %v2867_v50 = vadd.f32 %v2866_v19, %v7533_v47  ;;  %v7604_v28 = vld [vmem:[%s8036_s1 + $0xc8] sm:$0xff] }
 0x614   :  { %v2957_v6 = vpop.f32.mrb[79].mxu1  ;;  %6182 = vrcp.f32 %v3082_v30  ;;  %v3083_v44 = vadd.f32 1.0, %v6165_v36  ;;  %v3036_v42 = vmul.f32 1.442695, %v2982_v31  ;;  %5377 = vmatprep.subr.bf16.mxu1 %v5376_v45  ;;  %v2981_v38 = vsub.f32 0.0, %v2863_v57  ;;  %v5133_v57 = vld [vmem:[%s8036_s1 + $0xd0] sm:$0xff] }
 0x615   :  { %6184 = vrcp.f32 %v3081_v12  ;;  %5379 = vmatpush1.bf16.msra.mxu1 %v5378_v60  ;;  %v2983_v41 = vsub.f32 0.0, %v2952_v51  ;;  %v2956_v54 = vadd.f32 %v2955_v9, %v7533_v47  ;;  %v2988_v46 = vsub.f32 0.0, %v2867_v50 }
 0x616   :  { %v6167_v25 = vpop.eup %6166  ;;  %6186 = vrcp.f32 %v3083_v44  ;;  %v2869_v21 = vadd.f32 %v2868_v56, %v7533_v47  ;;  %v2958_v40 = vadd.f32 %v2957_v6, %v7533_v47  ;;  %v3034_v60 = vmul.f32 1.442695, %v2981_v38 }
 0x617   :  { %v6169_v49 = vpop.eup %6168  ;;  %v3060_v18 = vadd.f32 1.0, %v6167_v25  ;;  %6188 = vpow2.f32 %v3022_v27  ;;  %v3038_v32 = vmul.f32 1.442695, %v2983_v41  ;;  %v3048_v62 = vmul.f32 1.442695, %v2988_v46 }
 0x618   :  { %v6171_v20 = vpop.eup %6170  ;;  %v3062_v34 = vadd.f32 1.0, %v6169_v49  ;;  %6190 = vpow2.f32 %v3032_v14  ;;  %v2989_v58 = vsub.f32 0.0, %v2869_v21  ;;  %v2991_v15 = vsub.f32 0.0, %v2958_v40 }
 0x619   :  { %v6173_v37 = vpop.eup %6172  ;;  %6192 = vrcp.f32 %v3060_v18  ;;  %v3061_v53 = vadd.f32 1.0, %v6171_v20 }
 0x61a   :  { %v6175_v26 = vpop.eup %6174  ;;  %6194 = vrcp.f32 %v3062_v34  ;;  %v5374_v63 = vpack.c.bf16 %v6173_v37, %v7565_v5  ;;  %v2990_v5 = vsub.f32 0.0, %v2956_v54  ;;  %v3050_v10 = vmul.f32 1.442695, %v2989_v58  ;;  %v5134_v34 = vld [vmem:[%s8036_s1 + $0xd8] sm:$0xff] }
 0x61b   :  { %v6177_v29 = vpop.eup %6176  ;;  %6196 = vrcp.f32 %v3061_v53  ;;  %v3063_v24 = vadd.f32 1.0, %v6175_v26  ;;  %v3054_v23 = vmul.f32 1.442695, %v2991_v15  ;;  %v7653_v15 = vpop.permute.xlu1 %3137 }
 0x61c   :  { %v6179_v2 = vpop.eup %6178  ;;  %v3068_v1 = vadd.f32 1.0, %v6177_v29  ;;  %6198 = vpow2.f32 %v3036_v42  ;;  %v3052_v13 = vmul.f32 1.442695, %v2990_v5 }
 0x61d   :  { %v6181_v33 = vpop.eup %6180  ;;  %6200 = vrcp.f32 %v3063_v24  ;;  %v3070_v59 = vadd.f32 1.0, %v6179_v2 }
 0x61e   :  { %v6183_v4 = vpop.eup %6182  ;;  %6202 = vrcp.f32 %v3068_v1  ;;  %v3069_v55 = vadd.f32 1.0, %v6181_v33 }
 0x61f   :  { %v6185_v22 = vpop.eup %6184  ;;  %6204 = vrcp.f32 %v3070_v59  ;;  %v5382_v8 = vpack.c.bf16 %v6183_v4, %v7567_v3  ;;  %v7594_v3 = vld [vmem:[%s8036_s1 + $0xc0] sm:$0xff] }
 0x620   :  { %v6187_v52 = vpop.eup %6186  ;;  %6206 = vrcp.f32 %v3069_v55  ;;  %v5372_v47 = vpack.c.bf16 %v6185_v22, %v7570_v61 }
 0x621   :  { %v6189_v16 = vpop.eup %6188  ;;  %6208 = vpow2.f32 %v3034_v60  ;;  %v5380_v39 = vpack.c.bf16 %v6187_v52, %v7572_v11  ;;  %v7647_v60 = vpop.permute.xlu0 %3132 }
 0x622   :  { %v6191_v7 = vpop.eup %6190  ;;  %v3071_v17 = vadd.f32 1.0, %v6189_v16  ;;  %6210 = vpow2.f32 %v3038_v32  ;;  %5373 = vmatprep.subr.bf16.mxu0 %v5372_v47 }
 0x623   :  { %v6193_v35 = vpop.eup %6192  ;;  %6212 = vpow2.f32 %v3048_v62  ;;  %5381 = vmatprep.subr.bf16.mxu1 %v5380_v39  ;;  %5375 = vmatpush1.bf16.msra.mxu0 %v5374_v63  ;;  %v3076_v12 = vadd.f32 1.0, %v6191_v7 }
 0x624   :  { %v6195_v61 = vpop.eup %6194  ;;  %6214 = vrcp.f32 %v3071_v17  ;;  %5383 = vmatpush1.bf16.msra.mxu1 %v5382_v8 }
 0x625   :  { %v6197_v11 = vpop.eup %6196  ;;  %6216 = vpow2.f32 %v3052_v13 }
 0x626   :  { %v6199_v19 = vpop.eup %6198  ;;  %5139 = vmatmul.mubr.msk.f32.vlgmr.msra.gmra.mrb[80].mxu0 %vm359_vm0, %v7594_v3  ;;  %6218 = vpow2.f32 %v3050_v10 }
 0x627   :  { %v6201_v0 = vpop.eup %6200  ;;  %5143 = vmatmul.mubr.msk.f32.vlgmr.msra.gmra.mrb[80].mxu1 %vm359_vm0, %v7594_v3  ;;  %3232 = vmatprep.mubr.f32.mxu0 %v6647_v43  ;;  %6220 = vpow2.f32 %v3054_v23  ;;  %v3078_v44 = vadd.f32 1.0, %v6199_v19 }
 0x628   :  { %v6203_v30 = vpop.eup %6202  ;;  %3321 = vmatprep.mubr.f32.mxu1 %v6647_v43  ;;  %6222 = vrcp.f32 %v3076_v12 }
 0x629   :  { %v6205_v9 = vpop.eup %6204  ;;  %v5386_v56 = vpack.c.bf16 %v6203_v30, %v6193_v35  ;;  %6224 = vrcp.f32 %v3078_v44 }
 0x62a   :  { %v6207_v36 = vpop.eup %6206  ;;  %5140 = vmatmul.mubr.msk.f32.gmra.mrb[82].mxu0 %vm359_vm0, %v7604_v28  ;;  %v5394_v27 = vpack.c.bf16 %v6205_v9, %v6195_v61  ;;  %v7659_v9 = vpop.permute.xlu0 %3142 }
 0x62b   :  { %v6209_v6 = vpop.eup %6208  ;;  %5144 = vmatmul.mubr.msk.f32.gmra.mrb[82].mxu1 %vm359_vm0, %v7604_v28  ;;  %v5384_v14 = vpack.c.bf16 %v6207_v36, %v6197_v11  ;;  %3238 = vmatprep.mubr.f32.mxu0 %v6647_v43 }
 0x62c   :  { %v6211_v31 = vpop.eup %6210  ;;  %3327 = vmatprep.mubr.f32.mxu1 %v6647_v43  ;;  %v3077_v51 = vadd.f32 1.0, %v6209_v6 }
 0x62d   :  { %v6213_v25 = vpop.eup %6212  ;;  %5385 = vmatprep.subr.bf16.mxu0 %v5384_v14  ;;  %v3079_v49 = vadd.f32 1.0, %v6211_v31 }
 0x62e   :  { %v6215_v45 = vpop.eup %6214  ;;  %v3084_v18 = vadd.f32 1.0, %v6213_v25  ;;  %5387 = vmatpush1.bf16.msra.mxu0 %v5386_v56 }
 0x62f   :  { %v5392_v50 = vpack.c.bf16 %v6215_v45, %v6201_v0  ;;  %5141 = vmatmul.mubr.msk.f32.gmra.mrb[84].mxu0 %vm359_vm0, %v5133_v57  ;;  %5145 = vmatmul.mubr.msk.f32.gmra.mrb[84].mxu1 %vm359_vm0, %v5133_v57  ;;  %v6217_v20 = vpop.eup %6216 }
 0x630   :  { %6226 = vrcp.f32 %v3084_v18  ;;  %3244 = vmatprep.mubr.f32.mxu0 %v6647_v43  ;;  %3333 = vmatprep.mubr.f32.mxu1 %v6647_v43  ;;  %v6219_v42 = vpop.eup %6218  ;;  %v3086_v37 = vadd.f32 1.0, %v6217_v20 }
 0x631   :  { %6228 = vrcp.f32 %v3077_v51  ;;  %5393 = vmatprep.subr.bf16.mxu1 %v5392_v50  ;;  %v6221_v53 = vpop.eup %6220  ;;  %v3085_v38 = vadd.f32 1.0, %v6219_v42 }
 0x632   :  { %6230 = vrcp.f32 %v3079_v49  ;;  %5395 = vmatpush1.bf16.msra.mxu1 %v5394_v27  ;;  %v3087_v26 = vadd.f32 1.0, %v6221_v53  ;;  %v6223_v41 = vpop.eup %6222 }
 0x633   :  { %6232 = vrcp.f32 %v3086_v37  ;;  %5142 = vmatmul.mubr.msk.f32.gmra.mrb[86].mxu0 %vm359_vm0, %v5134_v34  ;;  %5146 = vmatmul.mubr.msk.f32.gmra.mrb[86].mxu1 %vm359_vm0, %v5134_v34  ;;  %v6225_v54 = vpop.eup %6224 }
 0x634   :  { %6234 = vrcp.f32 %v3085_v38  ;;  %3404 = vmatprep.mubr.f32.mxu0 %v6647_v43  ;;  %3493 = vmatprep.mubr.f32.mxu1 %v6647_v43 }
 0x635   :  { %6236 = vrcp.f32 %v3087_v26 }
 0x63a   :  { %v6227_v63 = vpop.eup %6226 }
 0x63b   :  { %v6229_v29 = vpop.eup %6228  ;;  %v5390_v24 = vpack.c.bf16 %v6227_v63, %v6223_v41  ;;  %v7665_v63 = vpop.permute.xlu1 %3147 }
 0x63c   :  { %v6231_v46 = vpop.eup %6230 }
 0x63d   :  { %v6233_v21 = vpop.eup %6232 }
 0x63e   :  { %v6235_v2 = vpop.eup %6234  ;;  %v5398_v1 = vpack.c.bf16 %v6233_v21, %v6225_v54 }
 0x63f   :  { %v6237_v40 = vpop.eup %6236  ;;  %v5388_v33 = vpack.c.bf16 %v6235_v2, %v6229_v29 }
 0x640   :  { %v5396_v59 = vpack.c.bf16 %v6237_v40, %v6231_v46 }
 0x641   :  { %5389 = vmatprep.subr.bf16.mxu0 %v5388_v33 }
 0x642   :  { %5397 = vmatprep.subr.bf16.mxu1 %v5396_v59  ;;  %5391 = vmatpush1.bf16.msra.mxu0 %v5390_v24 }
 0x643   :  { %5399 = vmatpush1.bf16.msra.mxu1 %v5398_v1 }
 0x645   :  { %5147 = vmatmul.mubr.msk.f32.vlgmr.msra.gmra.mrb[88].mxu0 %vm359_vm0, %v7594_v3 }
 0x646   :  { %5151 = vmatmul.mubr.msk.f32.vlgmr.msra.gmra.mrb[88].mxu1 %vm359_vm0, %v7594_v3  ;;  %3410 = vmatprep.mubr.f32.mxu0 %v6647_v43 }
 0x647   :  { %3499 = vmatprep.mubr.f32.mxu1 %v6647_v43 }
 0x649   :  { %5148 = vmatmul.mubr.msk.f32.gmra.mrb[90].mxu0 %vm359_vm0, %v7604_v28 }
 0x64a   :  { %5152 = vmatmul.mubr.msk.f32.gmra.mrb[90].mxu1 %vm359_vm0, %v7604_v28  ;;  %3416 = vmatprep.mubr.f32.mxu0 %v6647_v43 }
 0x64b   :  { %3505 = vmatprep.mubr.f32.mxu1 %v6647_v43 }
 0x64d   :  { %5149 = vmatmul.mubr.msk.f32.gmra.mrb[92].mxu0 %vm359_vm0, %v5133_v57 }
 0x64e   :  { %5153 = vmatmul.mubr.msk.f32.gmra.mrb[92].mxu1 %vm359_vm0, %v5133_v57  ;;  %3422 = vmatprep.mubr.f32.mxu0 %v6647_v43 }
 0x64f   :  { %3511 = vmatprep.mubr.f32.mxu1 %v6647_v43 }
 0x651   :  { %5150 = vmatmul.mubr.msk.f32.gmra.mrb[94].mxu0 %vm359_vm0, %v5134_v34 }
 0x652   :  { %5154 = vmatmul.mubr.msk.f32.gmra.mrb[94].mxu1 %vm359_vm0, %v5134_v34  ;;  %3784 = vmatprep.mubr.f32.mxu0 %v6647_v43 }
 0x653   :  { %3873 = vmatprep.mubr.f32.mxu1 %v6647_v43 }
 0x6f9   :  { %v3228_v4 = vpop.f32.mrb[80].mxu0 }
 0x6fa   :  { %v3229_v55 = vadd.f32 %v3228_v4, %v7647_v60  ;;  %v3317_v32 = vpop.f32.mrb[80].mxu1  ;;  %v3230_v5 = vpop.f32.mrb[81].mxu0 }
 0x6fb   :  { %v3318_v22 = vadd.f32 %v3317_v32, %v7647_v60  ;;  %v3231_v62 = vadd.f32 %v3230_v5, %v7647_v60  ;;  %v3319_v58 = vpop.f32.mrb[81].mxu1 }
 0x6fc   :  { %v3518_v8 = vsub.f32 0.0, %v3229_v55  ;;  %v3320_v52 = vadd.f32 %v3319_v58, %v7647_v60 }
 0x6fd   :  { %v3520_v47 = vsub.f32 0.0, %v3318_v22  ;;  %v3519_v16 = vsub.f32 0.0, %v3231_v62  ;;  %v3234_v39 = vpop.f32.mrb[82].mxu0 }
 0x6fe   :  { %v3550_v7 = vmul.f32 1.442695, %v3518_v8  ;;  %v3521_v17 = vsub.f32 0.0, %v3320_v52  ;;  %v3235_v13 = vadd.f32 %v3234_v39, %v7653_v15  ;;  %v3323_v35 = vpop.f32.mrb[82].mxu1  ;;  %v3236_v10 = vpop.f32.mrb[83].mxu0 }
 0x6ff   :  { %v3554_v3 = vmul.f32 1.442695, %v3520_v47  ;;  %v3552_v61 = vmul.f32 1.442695, %v3519_v16  ;;  %v3324_v23 = vadd.f32 %v3323_v35, %v7653_v15  ;;  %v3237_v11 = vadd.f32 %v3236_v10, %v7653_v15  ;;  %v3325_v19 = vpop.f32.mrb[83].mxu1 }
 0x700   :  { %6238 = vpow2.f32 %v3550_v7  ;;  %v3556_v0 = vmul.f32 1.442695, %v3521_v17  ;;  %v3526_v28 = vsub.f32 0.0, %v3235_v13  ;;  %v3326_v30 = vadd.f32 %v3325_v19, %v7653_v15 }
 0x701   :  { %6240 = vpow2.f32 %v3554_v3  ;;  %v3528_v56 = vsub.f32 0.0, %v3324_v23  ;;  %v3527_v36 = vsub.f32 0.0, %v3237_v11 }
 0x702   :  { %6242 = vpow2.f32 %v3552_v61  ;;  %v3566_v12 = vmul.f32 1.442695, %v3526_v28  ;;  %v3529_v27 = vsub.f32 0.0, %v3326_v30  ;;  %v3240_v6 = vpop.f32.mrb[84].mxu0  ;;  %v3329_v44 = vpop.f32.mrb[84].mxu1 }
 0x703   :  { %6244 = vpow2.f32 %v3556_v0  ;;  %v3570_v14 = vmul.f32 1.442695, %v3528_v56  ;;  %v3568_v31 = vmul.f32 1.442695, %v3527_v36  ;;  %v3241_v57 = vadd.f32 %v3240_v6, %v7659_v9  ;;  %v3242_v25 = vpop.f32.mrb[85].mxu0  ;;  %v3331_v51 = vpop.f32.mrb[85].mxu1 }
 0x704   :  { %6246 = vpow2.f32 %v3566_v12  ;;  %v3572_v45 = vmul.f32 1.442695, %v3529_v27  ;;  %v3330_v49 = vadd.f32 %v3329_v44, %v7659_v9  ;;  %v3243_v18 = vadd.f32 %v3242_v25, %v7659_v9 }
 0x705   :  { %6248 = vpow2.f32 %v3570_v14  ;;  %v3534_v50 = vsub.f32 0.0, %v3241_v57  ;;  %v3332_v20 = vadd.f32 %v3331_v51, %v7659_v9 }
 0x706   :  { %6250 = vpow2.f32 %v3568_v31  ;;  %v3536_v34 = vsub.f32 0.0, %v3330_v49  ;;  %v3535_v42 = vsub.f32 0.0, %v3243_v18  ;;  %v3246_v37 = vpop.f32.mrb[86].mxu0  ;;  %v3335_v53 = vpop.f32.mrb[86].mxu1 }
 0x707   :  { %6252 = vpow2.f32 %v3572_v45  ;;  %v3582_v38 = vmul.f32 1.442695, %v3534_v50  ;;  %v3537_v26 = vsub.f32 0.0, %v3332_v20  ;;  %v3248_v41 = vpop.f32.mrb[87].mxu0  ;;  %v3337_v54 = vpop.f32.mrb[87].mxu1  ;;  %v3247_v21 = vadd.f32 %v3246_v37, %v7665_v63 }
 0x708   :  { %v3586_v29 = vmul.f32 1.442695, %v3536_v34  ;;  %v3584_v24 = vmul.f32 1.442695, %v3535_v42  ;;  %v3336_v62 = vadd.f32 %v3335_v53, %v7665_v63  ;;  %v3249_v52 = vadd.f32 %v3248_v41, %v7665_v63 }
 0x709   :  { %6254 = vpow2.f32 %v3582_v38  ;;  %v3588_v46 = vmul.f32 1.442695, %v3537_v26  ;;  %v3542_v32 = vsub.f32 0.0, %v3247_v21  ;;  %v3338_v39 = vadd.f32 %v3337_v54, %v7665_v63 }
 0x70a   :  { %v6239_v2 = vpop.eup %6238  ;;  %6256 = vpow2.f32 %v3586_v29  ;;  %v3544_v10 = vsub.f32 0.0, %v3336_v62  ;;  %v3543_v61 = vsub.f32 0.0, %v3249_v52 }
 0x70b   :  { %v6241_v1 = vpop.eup %6240  ;;  %v3614_v40 = vadd.f32 1.0, %v6239_v2  ;;  %6258 = vpow2.f32 %v3584_v24  ;;  %v3598_v13 = vmul.f32 1.442695, %v3542_v32  ;;  %v3545_v19 = vsub.f32 0.0, %v3338_v39 }
 0x70c   :  { %v6243_v33 = vpop.eup %6242  ;;  %v3616_v59 = vadd.f32 1.0, %v6241_v1  ;;  %6260 = vpow2.f32 %v3588_v46  ;;  %v3602_v36 = vmul.f32 1.442695, %v3544_v10  ;;  %v3600_v6 = vmul.f32 1.442695, %v3543_v61 }
 0x70d   :  { %v6245_v4 = vpop.eup %6244  ;;  %6262 = vrcp.f32 %v3614_v40  ;;  %v3615_v55 = vadd.f32 1.0, %v6243_v33  ;;  %v3604_v14 = vmul.f32 1.442695, %v3545_v19 }
 0x70e   :  { %v6247_v5 = vpop.eup %6246  ;;  %6264 = vrcp.f32 %v3616_v59  ;;  %v3617_v22 = vadd.f32 1.0, %v6245_v4 }
 0x70f   :  { %v6249_v58 = vpop.eup %6248  ;;  %6266 = vrcp.f32 %v3615_v55  ;;  %v3622_v8 = vadd.f32 1.0, %v6247_v5 }
 0x710   :  { %v6251_v47 = vpop.eup %6250  ;;  %6268 = vrcp.f32 %v3617_v22  ;;  %v3624_v16 = vadd.f32 1.0, %v6249_v58 }
 0x711   :  { %v6253_v7 = vpop.eup %6252  ;;  %6270 = vrcp.f32 %v3622_v8  ;;  %v3623_v17 = vadd.f32 1.0, %v6251_v47 }
 0x712   :  { %6272 = vrcp.f32 %v3624_v16  ;;  %v3625_v35 = vadd.f32 1.0, %v6253_v7 }
 0x713   :  { %v6255_v3 = vpop.eup %6254  ;;  %6274 = vrcp.f32 %v3623_v17 }
 0x714   :  { %v6257_v23 = vpop.eup %6256  ;;  %6276 = vrcp.f32 %v3625_v35  ;;  %v3630_v11 = vadd.f32 1.0, %v6255_v3 }
 0x715   :  { %v6259_v0 = vpop.eup %6258  ;;  %v3632_v28 = vadd.f32 1.0, %v6257_v23  ;;  %6278 = vpow2.f32 %v3598_v13 }
 0x716   :  { %v6261_v30 = vpop.eup %6260  ;;  %6280 = vrcp.f32 %v3630_v11  ;;  %v3631_v56 = vadd.f32 1.0, %v6259_v0 }
 0x717   :  { %v7671_v12 = vpop.eup %6262  ;;  %6282 = vrcp.f32 %v3632_v28  ;;  %v3633_v27 = vadd.f32 1.0, %v6261_v30 }
 0x718   :  { %v7673_v44 = vpop.eup %6264  ;;  %6284 = vrcp.f32 %v3631_v56  ;;  %v3406_v31 = vpop.f32.mrb[88].mxu0 }
 0x719   :  { %v7675_v57 = vpop.eup %6266  ;;  %6286 = vrcp.f32 %v3633_v27  ;;  %v3407_v25 = vadd.f32 %v3406_v31, %v7647_v60  ;;  %v3495_v51 = vpop.f32.mrb[88].mxu1 }
 0x71a   :  { %v3408_v45 = vpop.f32.mrb[89].mxu0  ;;  %v7678_v49 = vpop.eup %6268  ;;  %6288 = vpow2.f32 %v3602_v36  ;;  %v3496_v18 = vadd.f32 %v3495_v51, %v7647_v60 }
 0x71b   :  { %v3409_v50 = vadd.f32 %v3408_v45, %v7647_v60  ;;  %v3497_v20 = vpop.f32.mrb[89].mxu1  ;;  %v7682_v34 = vpop.eup %6270  ;;  %6290 = vpow2.f32 %v3600_v6  ;;  %v3522_v42 = vsub.f32 0.0, %v3407_v25 }
 0x71c   :  { %v3498_v37 = vadd.f32 %v3497_v20, %v7647_v60  ;;  %v7685_v53 = vpop.eup %6272  ;;  %6292 = vpow2.f32 %v3604_v14  ;;  %v3524_v38 = vsub.f32 0.0, %v3496_v18  ;;  %v3412_v41 = vpop.f32.mrb[90].mxu0  ;;  %v5402_v54 = vpack.c.bf16 %v7682_v34, %v7671_v12 }
 0x71d   :  { %v3523_v26 = vsub.f32 0.0, %v3409_v50  ;;  %v6275_v29 = vpop.eup %6274  ;;  %v3558_v24 = vmul.f32 1.442695, %v3522_v42  ;;  %v3413_v21 = vadd.f32 %v3412_v41, %v7653_v15  ;;  %v3501_v2 = vpop.f32.mrb[90].mxu1  ;;  %v5410_v40 = vpack.c.bf16 %v7685_v53, %v7673_v44 }
 0x71e   :  { %v3525_v46 = vsub.f32 0.0, %v3498_v37  ;;  %v3414_v1 = vpop.f32.mrb[91].mxu0  ;;  %v7692_v60 = vpop.eup %6276  ;;  %v3562_v33 = vmul.f32 1.442695, %v3524_v38  ;;  %v3502_v4 = vadd.f32 %v3501_v2, %v7653_v15  ;;  %v5400_v36 = vpack.c.bf16 %v6275_v29, %v7675_v57 }
 0x71f   :  { %v3560_v59 = vmul.f32 1.442695, %v3523_v26  ;;  %v3415_v55 = vadd.f32 %v3414_v1, %v7653_v15  ;;  %v3503_v32 = vpop.f32.mrb[91].mxu1  ;;  %v6279_v5 = vpop.eup %6278  ;;  %6294 = vpow2.f32 %v3558_v24  ;;  %v3530_v62 = vsub.f32 0.0, %v3413_v21 }
 0x720   :  { %v3564_v22 = vmul.f32 1.442695, %v3525_v46  ;;  %v3504_v58 = vadd.f32 %v3503_v32, %v7653_v15  ;;  %v7697_v8 = vpop.eup %6280  ;;  %v3638_v52 = vadd.f32 1.0, %v6279_v5  ;;  %6296 = vpow2.f32 %v3562_v33  ;;  %v3418_v39 = vpop.f32.mrb[92].mxu0  ;;  %5401 = vmatprep.subr.bf16.mxu0 %v5400_v36 }
 0x721   :  { %v3532_v47 = vsub.f32 0.0, %v3502_v4  ;;  %v3531_v16 = vsub.f32 0.0, %v3415_v55  ;;  %v7699_v7 = vpop.eup %6282  ;;  %6298 = vpow2.f32 %v3560_v59  ;;  %v3574_v17 = vmul.f32 1.442695, %v3530_v62  ;;  %v3507_v35 = vpop.f32.mrb[92].mxu1  ;;  %5403 = vmatpush1.bf16.msra.mxu0 %v5402_v54 }
 0x722   :  { %v3419_v13 = vadd.f32 %v3418_v39, %v7659_v9  ;;  %v3420_v10 = vpop.f32.mrb[93].mxu0  ;;  %v7702_v3 = vpop.eup %6284  ;;  %6300 = vrcp.f32 %v3638_v52  ;;  %v3533_v23 = vsub.f32 0.0, %v3504_v58  ;;  %v3508_v28 = vadd.f32 %v3507_v35, %v7659_v9 }
 0x723   :  { %v3578_v61 = vmul.f32 1.442695, %v3532_v47  ;;  %v3576_v15 = vmul.f32 1.442695, %v3531_v16  ;;  %v3509_v11 = vpop.f32.mrb[93].mxu1  ;;  %v7704_v19 = vpop.eup %6286  ;;  %6302 = vpow2.f32 %v3564_v22  ;;  %v3421_v34 = vadd.f32 %v3420_v10, %v7659_v9 }
 0x724   :  { %v3538_v0 = vsub.f32 0.0, %v3419_v13  ;;  %v6289_v30 = vpop.eup %6288  ;;  %6304 = vpow2.f32 %v3574_v17  ;;  %v3424_v56 = vpop.f32.mrb[94].mxu0  ;;  %v3580_v51 = vmul.f32 1.442695, %v3533_v23  ;;  %v3540_v20 = vsub.f32 0.0, %v3508_v28 }
 0x725   :  { %v6291_v12 = vpop.eup %6290  ;;  %v3640_v27 = vadd.f32 1.0, %v6289_v30  ;;  %6306 = vpow2.f32 %v3578_v61  ;;  %v3513_v6 = vpop.f32.mrb[94].mxu1  ;;  %v3510_v42 = vadd.f32 %v3509_v11, %v7659_v9  ;;  %v5408_v37 = vpack.c.bf16 %v7692_v60, %v7678_v49 }
 0x726   :  { %v3426_v14 = vpop.f32.mrb[95].mxu0  ;;  %v6293_v31 = vpop.eup %6292  ;;  %v3639_v25 = vadd.f32 1.0, %v6291_v12  ;;  %6308 = vpow2.f32 %v3576_v15  ;;  %v3590_v50 = vmul.f32 1.442695, %v3538_v0  ;;  %v3425_v41 = vadd.f32 %v3424_v56, %v7665_v63  ;;  %v7736_v12 = vld [vmem:[%s8036_s1 + $0xe8] sm:$0xff] }
 0x727   :  { %v3515_v45 = vpop.f32.mrb[95].mxu1  ;;  %6310 = vrcp.f32 %v3640_v27  ;;  %v3641_v18 = vadd.f32 1.0, %v6293_v31  ;;  %v3594_v46 = vmul.f32 1.442695, %v3540_v20  ;;  %5409 = vmatprep.subr.bf16.mxu1 %v5408_v37  ;;  %v3539_v2 = vsub.f32 0.0, %v3421_v34  ;;  %v5157_v34 = vld [vmem:[%s8036_s1 + $0xf0] sm:$0xff] }
 0x728   :  { %6312 = vrcp.f32 %v3639_v25  ;;  %5411 = vmatpush1.bf16.msra.mxu1 %v5410_v40  ;;  %v3541_v49 = vsub.f32 0.0, %v3510_v42  ;;  %v3514_v1 = vadd.f32 %v3513_v6, %v7665_v63  ;;  %v3546_v4 = vsub.f32 0.0, %v3425_v41 }
 0x729   :  { %v6295_v57 = vpop.eup %6294  ;;  %6314 = vrcp.f32 %v3641_v18  ;;  %v3427_v55 = vadd.f32 %v3426_v14, %v7665_v63  ;;  %v3516_v22 = vadd.f32 %v3515_v45, %v7665_v63  ;;  %v3592_v40 = vmul.f32 1.442695, %v3539_v2 }
 0x72a   :  { %v6297_v38 = vpop.eup %6296  ;;  %v3618_v26 = vadd.f32 1.0, %v6295_v57  ;;  %6316 = vpow2.f32 %v3580_v51  ;;  %v3596_v52 = vmul.f32 1.442695, %v3541_v49  ;;  %v3606_v16 = vmul.f32 1.442695, %v3546_v4 }
 0x72b   :  { %v6299_v29 = vpop.eup %6298  ;;  %v3620_v24 = vadd.f32 1.0, %v6297_v38  ;;  %6318 = vpow2.f32 %v3590_v50  ;;  %v3547_v39 = vsub.f32 0.0, %v3427_v55  ;;  %v3549_v35 = vsub.f32 0.0, %v3516_v22 }
 0x72c   :  { %v6301_v54 = vpop.eup %6300  ;;  %6320 = vrcp.f32 %v3618_v26  ;;  %v3619_v21 = vadd.f32 1.0, %v6299_v29 }
 0x72d   :  { %v6303_v9 = vpop.eup %6302  ;;  %6322 = vrcp.f32 %v3620_v24  ;;  %v5406_v60 = vpack.c.bf16 %v6301_v54, %v7697_v8  ;;  %v3548_v8 = vsub.f32 0.0, %v3514_v1  ;;  %v3608_v28 = vmul.f32 1.442695, %v3547_v39  ;;  %v5158_v24 = vld [vmem:[%s8036_s1 + $0xf8] sm:$0xff] }
 0x72e   :  { %v6305_v33 = vpop.eup %6304  ;;  %6324 = vrcp.f32 %v3619_v21  ;;  %v3621_v59 = vadd.f32 1.0, %v6303_v9  ;;  %v3612_v30 = vmul.f32 1.442695, %v3549_v35  ;;  %v7785_v35 = vpop.permute.xlu1 %3695 }
 0x72f   :  { %v6307_v32 = vpop.eup %6306  ;;  %v3626_v5 = vadd.f32 1.0, %v6305_v33  ;;  %6326 = vpow2.f32 %v3594_v46  ;;  %v3610_v11 = vmul.f32 1.442695, %v3548_v8 }
 0x730   :  { %v6309_v44 = vpop.eup %6308  ;;  %6328 = vrcp.f32 %v3621_v59  ;;  %v3628_v53 = vadd.f32 1.0, %v6307_v32 }
 0x731   :  { %v6311_v62 = vpop.eup %6310  ;;  %6330 = vrcp.f32 %v3626_v5  ;;  %v3627_v58 = vadd.f32 1.0, %v6309_v44 }
 0x732   :  { %v6313_v47 = vpop.eup %6312  ;;  %6332 = vrcp.f32 %v3628_v53  ;;  %v5414_v17 = vpack.c.bf16 %v6311_v62, %v7699_v7  ;;  %v7726_v7 = vld [vmem:[%s8036_s1 + $0xe0] sm:$0xff] }
 0x733   :  { %v6315_v13 = vpop.eup %6314  ;;  %6334 = vrcp.f32 %v3627_v58  ;;  %v5404_v63 = vpack.c.bf16 %v6313_v47, %v7702_v3 }
 0x734   :  { %v6317_v10 = vpop.eup %6316  ;;  %6336 = vpow2.f32 %v3592_v40  ;;  %v5412_v61 = vpack.c.bf16 %v6315_v13, %v7704_v19  ;;  %v7779_v40 = vpop.permute.xlu0 %3690 }
 0x735   :  { %v6319_v15 = vpop.eup %6318  ;;  %v3629_v23 = vadd.f32 1.0, %v6317_v10  ;;  %6338 = vpow2.f32 %v3596_v52  ;;  %5405 = vmatprep.subr.bf16.mxu0 %v5404_v63 }
 0x736   :  { %v6321_v0 = vpop.eup %6320  ;;  %6340 = vpow2.f32 %v3606_v16  ;;  %5413 = vmatprep.subr.bf16.mxu1 %v5412_v61  ;;  %5407 = vmatpush1.bf16.msra.mxu0 %v5406_v60  ;;  %v3634_v25 = vadd.f32 1.0, %v6319_v15 }
 0x737   :  { %v6323_v3 = vpop.eup %6322  ;;  %6342 = vrcp.f32 %v3629_v23  ;;  %5415 = vmatpush1.bf16.msra.mxu1 %v5414_v17 }
 0x738   :  { %v6325_v19 = vpop.eup %6324  ;;  %6344 = vpow2.f32 %v3610_v11 }
 0x739   :  { %v6327_v56 = vpop.eup %6326  ;;  %5163 = vmatmul.mubr.msk.f32.vlgmr.msra.gmra.mrb[96].mxu0 %vm359_vm0, %v7726_v7  ;;  %6346 = vpow2.f32 %v3608_v28 }
 0x73a   :  { %v6329_v36 = vpop.eup %6328  ;;  %5167 = vmatmul.mubr.msk.f32.vlgmr.msra.gmra.mrb[96].mxu1 %vm359_vm0, %v7726_v7  ;;  %3790 = vmatprep.mubr.f32.mxu0 %v6647_v43  ;;  %6348 = vpow2.f32 %v3612_v30  ;;  %v3636_v18 = vadd.f32 1.0, %v6327_v56 }
 0x73b   :  { %v6331_v27 = vpop.eup %6330  ;;  %3879 = vmatprep.mubr.f32.mxu1 %v6647_v43  ;;  %6350 = vrcp.f32 %v3634_v25 }
 0x73c   :  { %v6333_v6 = vpop.eup %6332  ;;  %v5418_v14 = vpack.c.bf16 %v6331_v27, %v6321_v0  ;;  %6352 = vrcp.f32 %v3636_v18 }
 0x73d   :  { %v6335_v31 = vpop.eup %6334  ;;  %5164 = vmatmul.mubr.msk.f32.gmra.mrb[98].mxu0 %vm359_vm0, %v7736_v12  ;;  %v5426_v51 = vpack.c.bf16 %v6333_v6, %v6323_v3  ;;  %v7791_v6 = vpop.permute.xlu0 %3700 }
 0x73e   :  { %v6337_v45 = vpop.eup %6336  ;;  %5168 = vmatmul.mubr.msk.f32.gmra.mrb[98].mxu1 %vm359_vm0, %v7736_v12  ;;  %v5416_v50 = vpack.c.bf16 %v6335_v31, %v6325_v19  ;;  %3796 = vmatprep.mubr.f32.mxu0 %v6647_v43 }
 0x73f   :  { %v6339_v20 = vpop.eup %6338  ;;  %3885 = vmatprep.mubr.f32.mxu1 %v6647_v43  ;;  %v3635_v42 = vadd.f32 1.0, %v6337_v45 }
 0x740   :  { %v6341_v57 = vpop.eup %6340  ;;  %5417 = vmatprep.subr.bf16.mxu0 %v5416_v50  ;;  %v3637_v38 = vadd.f32 1.0, %v6339_v20 }
 0x741   :  { %v6343_v37 = vpop.eup %6342  ;;  %v3642_v26 = vadd.f32 1.0, %v6341_v57  ;;  %5419 = vmatpush1.bf16.msra.mxu0 %v5418_v14 }
 0x742   :  { %v5424_v41 = vpack.c.bf16 %v6343_v37, %v6329_v36  ;;  %5165 = vmatmul.mubr.msk.f32.gmra.mrb[100].mxu0 %vm359_vm0, %v5157_v34  ;;  %5169 = vmatmul.mubr.msk.f32.gmra.mrb[100].mxu1 %vm359_vm0, %v5157_v34  ;;  %v6345_v29 = vpop.eup %6344 }
 0x743   :  { %6354 = vrcp.f32 %v3642_v26  ;;  %3802 = vmatprep.mubr.f32.mxu0 %v6647_v43  ;;  %3891 = vmatprep.mubr.f32.mxu1 %v6647_v43  ;;  %v6347_v46 = vpop.eup %6346  ;;  %v3644_v54 = vadd.f32 1.0, %v6345_v29 }
 0x744   :  { %6356 = vrcp.f32 %v3635_v42  ;;  %5425 = vmatprep.subr.bf16.mxu1 %v5424_v41  ;;  %v6349_v21 = vpop.eup %6348  ;;  %v3643_v2 = vadd.f32 1.0, %v6347_v46 }
 0x745   :  { %6358 = vrcp.f32 %v3637_v38  ;;  %5427 = vmatpush1.bf16.msra.mxu1 %v5426_v51  ;;  %v3645_v9 = vadd.f32 1.0, %v6349_v21  ;;  %v6351_v49 = vpop.eup %6350 }
 0x746   :  { %6360 = vrcp.f32 %v3644_v54  ;;  %5166 = vmatmul.mubr.msk.f32.gmra.mrb[102].mxu0 %vm359_vm0, %v5158_v24  ;;  %5170 = vmatmul.mubr.msk.f32.gmra.mrb[102].mxu1 %vm359_vm0, %v5158_v24  ;;  %v6353_v1 = vpop.eup %6352 }
 0x747   :  { %6362 = vrcp.f32 %v3643_v2  ;;  %3962 = vmatprep.mubr.f32.mxu0 %v6647_v43  ;;  %4051 = vmatprep.mubr.f32.mxu1 %v6647_v43 }
 0x748   :  { %6364 = vrcp.f32 %v3645_v9 }
 0x74d   :  { %v6355_v60 = vpop.eup %6354 }
 0x74e   :  { %v6357_v33 = vpop.eup %6356  ;;  %v5422_v59 = vpack.c.bf16 %v6355_v60, %v6351_v49  ;;  %v7797_v60 = vpop.permute.xlu1 %3705 }
 0x74f   :  { %v6359_v4 = vpop.eup %6358 }
 0x750   :  { %v6361_v55 = vpop.eup %6360 }
 0x751   :  { %v6363_v32 = vpop.eup %6362  ;;  %v5430_v5 = vpack.c.bf16 %v6361_v55, %v6353_v1 }
 0x752   :  { %v6365_v22 = vpop.eup %6364  ;;  %v5420_v44 = vpack.c.bf16 %v6363_v32, %v6357_v33 }
 0x753   :  { %v5428_v53 = vpack.c.bf16 %v6365_v22, %v6359_v4 }
 0x754   :  { %5421 = vmatprep.subr.bf16.mxu0 %v5420_v44 }
 0x755   :  { %5429 = vmatprep.subr.bf16.mxu1 %v5428_v53  ;;  %5423 = vmatpush1.bf16.msra.mxu0 %v5422_v59 }
 0x756   :  { %5431 = vmatpush1.bf16.msra.mxu1 %v5430_v5 }
 0x758   :  { %5171 = vmatmul.mubr.msk.f32.vlgmr.msra.gmra.mrb[104].mxu0 %vm359_vm0, %v7726_v7 }
 0x759   :  { %5175 = vmatmul.mubr.msk.f32.vlgmr.msra.gmra.mrb[104].mxu1 %vm359_vm0, %v7726_v7  ;;  %3968 = vmatprep.mubr.f32.mxu0 %v6647_v43 }
 0x75a   :  { %4057 = vmatprep.mubr.f32.mxu1 %v6647_v43 }
 0x75c   :  { %5172 = vmatmul.mubr.msk.f32.gmra.mrb[106].mxu0 %vm359_vm0, %v7736_v12 }
 0x75d   :  { %5176 = vmatmul.mubr.msk.f32.gmra.mrb[106].mxu1 %vm359_vm0, %v7736_v12  ;;  %3974 = vmatprep.mubr.f32.mxu0 %v6647_v43 }
 0x75e   :  { %4063 = vmatprep.mubr.f32.mxu1 %v6647_v43 }
 0x760   :  { %5173 = vmatmul.mubr.msk.f32.gmra.mrb[108].mxu0 %vm359_vm0, %v5157_v34 }
 0x761   :  { %5177 = vmatmul.mubr.msk.f32.gmra.mrb[108].mxu1 %vm359_vm0, %v5157_v34  ;;  %3980 = vmatprep.mubr.f32.mxu0 %v6647_v43 }
 0x762   :  { %4069 = vmatprep.mubr.f32.mxu1 %v6647_v43 }
 0x764   :  { %5174 = vmatmul.mubr.msk.f32.gmra.mrb[110].mxu0 %vm359_vm0, %v5158_v24 }
 0x765   :  { %5178 = vmatmul.mubr.msk.f32.gmra.mrb[110].mxu1 %vm359_vm0, %v5158_v24  ;;  %4342 = vmatprep.mubr.f32.mxu0 %v6647_v43 }
 0x766   :  { %4431 = vmatprep.mubr.f32.mxu1 %v6647_v43 }
 0x80c   :  { %v3786_v62 = vpop.f32.mrb[96].mxu0 }
 0x80d   :  { %v3787_v58 = vadd.f32 %v3786_v62, %v7779_v40  ;;  %v3875_v52 = vpop.f32.mrb[96].mxu1  ;;  %v3788_v8 = vpop.f32.mrb[97].mxu0 }
 0x80e   :  { %v3876_v47 = vadd.f32 %v3875_v52, %v7779_v40  ;;  %v3789_v16 = vadd.f32 %v3788_v8, %v7779_v40  ;;  %v3877_v39 = vpop.f32.mrb[97].mxu1 }
 0x80f   :  { %v4076_v17 = vsub.f32 0.0, %v3787_v58  ;;  %v3878_v13 = vadd.f32 %v3877_v39, %v7779_v40 }
 0x810   :  { %v4078_v63 = vsub.f32 0.0, %v3876_v47  ;;  %v4077_v10 = vsub.f32 0.0, %v3789_v16  ;;  %v3792_v61 = vpop.f32.mrb[98].mxu0 }
 0x811   :  { %v4108_v15 = vmul.f32 1.442695, %v4076_v17  ;;  %v4079_v23 = vsub.f32 0.0, %v3878_v13  ;;  %v3793_v11 = vadd.f32 %v3792_v61, %v7785_v35  ;;  %v3881_v0 = vpop.f32.mrb[98].mxu1  ;;  %v3794_v28 = vpop.f32.mrb[99].mxu0 }
 0x812   :  { %v4112_v7 = vmul.f32 1.442695, %v4078_v63  ;;  %v4110_v3 = vmul.f32 1.442695, %v4077_v10  ;;  %v3882_v30 = vadd.f32 %v3881_v0, %v7785_v35  ;;  %v3795_v19 = vadd.f32 %v3794_v28, %v7785_v35  ;;  %v3883_v56 = vpop.f32.mrb[99].mxu1 }
 0x813   :  { %6366 = vpow2.f32 %v4108_v15  ;;  %v4114_v36 = vmul.f32 1.442695, %v4079_v23  ;;  %v4084_v12 = vsub.f32 0.0, %v3793_v11  ;;  %v3884_v27 = vadd.f32 %v3883_v56, %v7785_v35 }
 0x814   :  { %6368 = vpow2.f32 %v4112_v7  ;;  %v4086_v14 = vsub.f32 0.0, %v3882_v30  ;;  %v4085_v31 = vsub.f32 0.0, %v3795_v19 }
 0x815   :  { %6370 = vpow2.f32 %v4110_v3  ;;  %v4124_v25 = vmul.f32 1.442695, %v4084_v12  ;;  %v4087_v51 = vsub.f32 0.0, %v3884_v27  ;;  %v3798_v45 = vpop.f32.mrb[100].mxu0  ;;  %v3887_v18 = vpop.f32.mrb[100].mxu1 }
 0x816   :  { %6372 = vpow2.f32 %v4114_v36  ;;  %v4128_v50 = vmul.f32 1.442695, %v4086_v14  ;;  %v4126_v20 = vmul.f32 1.442695, %v4085_v31  ;;  %v3799_v34 = vadd.f32 %v3798_v45, %v7791_v6  ;;  %v3800_v57 = vpop.f32.mrb[101].mxu0  ;;  %v3889_v42 = vpop.f32.mrb[101].mxu1 }
 0x817   :  { %6374 = vpow2.f32 %v4124_v25  ;;  %v4130_v37 = vmul.f32 1.442695, %v4087_v51  ;;  %v3888_v38 = vadd.f32 %v3887_v18, %v7791_v6  ;;  %v3801_v26 = vadd.f32 %v3800_v57, %v7791_v6 }
 0x818   :  { %6376 = vpow2.f32 %v4128_v50  ;;  %v4092_v41 = vsub.f32 0.0, %v3799_v34  ;;  %v3890_v29 = vadd.f32 %v3889_v42, %v7791_v6 }
 0x819   :  { %6378 = vpow2.f32 %v4126_v20  ;;  %v4094_v24 = vsub.f32 0.0, %v3888_v38  ;;  %v4093_v46 = vsub.f32 0.0, %v3801_v26  ;;  %v3804_v54 = vpop.f32.mrb[102].mxu0  ;;  %v3893_v21 = vpop.f32.mrb[102].mxu1 }
 0x81a   :  { %6380 = vpow2.f32 %v4130_v37  ;;  %v4140_v2 = vmul.f32 1.442695, %v4092_v41  ;;  %v4095_v9 = vsub.f32 0.0, %v3890_v29  ;;  %v3806_v49 = vpop.f32.mrb[103].mxu0  ;;  %v3895_v1 = vpop.f32.mrb[103].mxu1  ;;  %v3805_v55 = vadd.f32 %v3804_v54, %v7797_v60 }
 0x81b   :  { %v4144_v33 = vmul.f32 1.442695, %v4094_v24  ;;  %v4142_v59 = vmul.f32 1.442695, %v4093_v46  ;;  %v3894_v16 = vadd.f32 %v3893_v21, %v7797_v60  ;;  %v3807_v13 = vadd.f32 %v3806_v49, %v7797_v60 }
 0x81c   :  { %6382 = vpow2.f32 %v4140_v2  ;;  %v4146_v4 = vmul.f32 1.442695, %v4095_v9  ;;  %v4100_v52 = vsub.f32 0.0, %v3805_v55  ;;  %v3896_v61 = vadd.f32 %v3895_v1, %v7797_v60 }
 0x81d   :  { %v6367_v32 = vpop.eup %6366  ;;  %6384 = vpow2.f32 %v4144_v33  ;;  %v4102_v28 = vsub.f32 0.0, %v3894_v16  ;;  %v4101_v3 = vsub.f32 0.0, %v3807_v13 }
 0x81e   :  { %v6369_v5 = vpop.eup %6368  ;;  %v4172_v22 = vadd.f32 1.0, %v6367_v32  ;;  %6386 = vpow2.f32 %v4142_v59  ;;  %v4156_v11 = vmul.f32 1.442695, %v4100_v52  ;;  %v4103_v56 = vsub.f32 0.0, %v3896_v61 }
 0x81f   :  { %v6371_v44 = vpop.eup %6370  ;;  %v4174_v53 = vadd.f32 1.0, %v6369_v5  ;;  %6388 = vpow2.f32 %v4146_v4  ;;  %v4160_v31 = vmul.f32 1.442695, %v4102_v28  ;;  %v4158_v45 = vmul.f32 1.442695, %v4101_v3 }
 0x820   :  { %v6373_v62 = vpop.eup %6372  ;;  %6390 = vrcp.f32 %v4172_v22  ;;  %v4173_v58 = vadd.f32 1.0, %v6371_v44  ;;  %v4162_v50 = vmul.f32 1.442695, %v4103_v56 }
 0x821   :  { %v6375_v8 = vpop.eup %6374  ;;  %6392 = vrcp.f32 %v4174_v53  ;;  %v4175_v47 = vadd.f32 1.0, %v6373_v62 }
 0x822   :  { %v6377_v39 = vpop.eup %6376  ;;  %6394 = vrcp.f32 %v4173_v58  ;;  %v4180_v17 = vadd.f32 1.0, %v6375_v8 }
 0x823   :  { %v6379_v63 = vpop.eup %6378  ;;  %6396 = vrcp.f32 %v4175_v47  ;;  %v4182_v10 = vadd.f32 1.0, %v6377_v39 }
 0x824   :  { %v6381_v15 = vpop.eup %6380  ;;  %6398 = vrcp.f32 %v4180_v17  ;;  %v4181_v23 = vadd.f32 1.0, %v6379_v63 }
 0x825   :  { %6400 = vrcp.f32 %v4182_v10  ;;  %v4183_v0 = vadd.f32 1.0, %v6381_v15 }
 0x826   :  { %v6383_v7 = vpop.eup %6382  ;;  %6402 = vrcp.f32 %v4181_v23 }
 0x827   :  { %v6385_v30 = vpop.eup %6384  ;;  %6404 = vrcp.f32 %v4183_v0  ;;  %v4188_v19 = vadd.f32 1.0, %v6383_v7 }
 0x828   :  { %v6387_v36 = vpop.eup %6386  ;;  %v4190_v12 = vadd.f32 1.0, %v6385_v30  ;;  %6406 = vpow2.f32 %v4156_v11 }
 0x829   :  { %v6389_v27 = vpop.eup %6388  ;;  %6408 = vrcp.f32 %v4188_v19  ;;  %v4189_v14 = vadd.f32 1.0, %v6387_v36 }
 0x82a   :  { %v7803_v25 = vpop.eup %6390  ;;  %6410 = vrcp.f32 %v4190_v12  ;;  %v4191_v51 = vadd.f32 1.0, %v6389_v27 }
 0x82b   :  { %v7805_v18 = vpop.eup %6392  ;;  %6412 = vrcp.f32 %v4189_v14  ;;  %v3964_v20 = vpop.f32.mrb[104].mxu0 }
 0x82c   :  { %v7807_v34 = vpop.eup %6394  ;;  %6414 = vrcp.f32 %v4191_v51  ;;  %v3965_v57 = vadd.f32 %v3964_v20, %v7779_v40  ;;  %v4053_v42 = vpop.f32.mrb[104].mxu1 }
 0x82d   :  { %v3966_v37 = vpop.f32.mrb[105].mxu0  ;;  %v7810_v38 = vpop.eup %6396  ;;  %6416 = vpow2.f32 %v4160_v31  ;;  %v4054_v26 = vadd.f32 %v4053_v42, %v7779_v40 }
 0x82e   :  { %v3967_v41 = vadd.f32 %v3966_v37, %v7779_v40  ;;  %v4055_v29 = vpop.f32.mrb[105].mxu1  ;;  %v7814_v24 = vpop.eup %6398  ;;  %6418 = vpow2.f32 %v4158_v45  ;;  %v4080_v46 = vsub.f32 0.0, %v3965_v57 }
 0x82f   :  { %v4056_v54 = vadd.f32 %v4055_v29, %v7779_v40  ;;  %v7817_v21 = vpop.eup %6400  ;;  %6420 = vpow2.f32 %v4162_v50  ;;  %v4082_v2 = vsub.f32 0.0, %v4054_v26  ;;  %v3970_v49 = vpop.f32.mrb[106].mxu0  ;;  %v5434_v1 = vpack.c.bf16 %v7814_v24, %v7803_v25 }
 0x830   :  { %v4081_v9 = vsub.f32 0.0, %v3967_v41  ;;  %v6403_v33 = vpop.eup %6402  ;;  %v4116_v59 = vmul.f32 1.442695, %v4080_v46  ;;  %v3971_v55 = vadd.f32 %v3970_v49, %v7785_v35  ;;  %v4059_v32 = vpop.f32.mrb[106].mxu1  ;;  %v5442_v22 = vpack.c.bf16 %v7817_v21, %v7805_v18 }
 0x831   :  { %v4083_v4 = vsub.f32 0.0, %v4056_v54  ;;  %v3972_v5 = vpop.f32.mrb[107].mxu0  ;;  %v7824_v40 = vpop.eup %6404  ;;  %v4120_v44 = vmul.f32 1.442695, %v4082_v2  ;;  %v4060_v62 = vadd.f32 %v4059_v32, %v7785_v35  ;;  %v5432_v31 = vpack.c.bf16 %v6403_v33, %v7807_v34 }
 0x832   :  { %v4118_v53 = vmul.f32 1.442695, %v4081_v9  ;;  %v3973_v58 = vadd.f32 %v3972_v5, %v7785_v35  ;;  %v4061_v52 = vpop.f32.mrb[107].mxu1  ;;  %v6407_v8 = vpop.eup %6406  ;;  %6422 = vpow2.f32 %v4116_v59  ;;  %v4088_v16 = vsub.f32 0.0, %v3971_v55 }
 0x833   :  { %v4122_v47 = vmul.f32 1.442695, %v4083_v4  ;;  %v4062_v39 = vadd.f32 %v4061_v52, %v7785_v35  ;;  %v7829_v17 = vpop.eup %6408  ;;  %v4196_v13 = vadd.f32 1.0, %v6407_v8  ;;  %6424 = vpow2.f32 %v4120_v44  ;;  %v3976_v61 = vpop.f32.mrb[108].mxu0  ;;  %5433 = vmatprep.subr.bf16.mxu0 %v5432_v31 }
 0x834   :  { %v4090_v63 = vsub.f32 0.0, %v4060_v62  ;;  %v4089_v10 = vsub.f32 0.0, %v3973_v58  ;;  %v7831_v15 = vpop.eup %6410  ;;  %6426 = vpow2.f32 %v4118_v53  ;;  %v4132_v23 = vmul.f32 1.442695, %v4088_v16  ;;  %v4065_v0 = vpop.f32.mrb[108].mxu1  ;;  %5435 = vmatpush1.bf16.msra.mxu0 %v5434_v1 }
 0x835   :  { %v3977_v11 = vadd.f32 %v3976_v61, %v7791_v6  ;;  %v3978_v28 = vpop.f32.mrb[109].mxu0  ;;  %v7834_v7 = vpop.eup %6412  ;;  %6428 = vrcp.f32 %v4196_v13  ;;  %v4091_v30 = vsub.f32 0.0, %v4062_v39  ;;  %v4066_v12 = vadd.f32 %v4065_v0, %v7791_v6 }
 0x836   :  { %v4136_v3 = vmul.f32 1.442695, %v4090_v63  ;;  %v4134_v35 = vmul.f32 1.442695, %v4089_v10  ;;  %v4067_v19 = vpop.f32.mrb[109].mxu1  ;;  %v7836_v56 = vpop.eup %6414  ;;  %6430 = vpow2.f32 %v4122_v47  ;;  %v3979_v24 = vadd.f32 %v3978_v28, %v7791_v6 }
 0x837   :  { %v4096_v36 = vsub.f32 0.0, %v3977_v11  ;;  %v6417_v27 = vpop.eup %6416  ;;  %6432 = vpow2.f32 %v4132_v23  ;;  %v3982_v14 = vpop.f32.mrb[110].mxu0  ;;  %v4138_v42 = vmul.f32 1.442695, %v4091_v30  ;;  %v4098_v29 = vsub.f32 0.0, %v4066_v12 }
 0x838   :  { %v6419_v25 = vpop.eup %6418  ;;  %v4198_v51 = vadd.f32 1.0, %v6417_v27  ;;  %6434 = vpow2.f32 %v4136_v3  ;;  %v4071_v45 = vpop.f32.mrb[110].mxu1  ;;  %v4068_v46 = vadd.f32 %v4067_v19, %v7791_v6  ;;  %v5440_v54 = vpack.c.bf16 %v7824_v40, %v7810_v38 }
 0x839   :  { %v3984_v50 = vpop.f32.mrb[111].mxu0  ;;  %v6421_v20 = vpop.eup %6420  ;;  %v4197_v57 = vadd.f32 1.0, %v6419_v25  ;;  %6436 = vpow2.f32 %v4134_v35  ;;  %v4148_v41 = vmul.f32 1.442695, %v4096_v36  ;;  %v3983_v49 = vadd.f32 %v3982_v14, %v7797_v60  ;;  %v7868_v25 = vld [vmem:[%s8036_s1 + $0x108] sm:$0xff] }
 0x83a   :  { %v4073_v37 = vpop.f32.mrb[111].mxu1  ;;  %6438 = vrcp.f32 %v4198_v51  ;;  %v4199_v26 = vadd.f32 1.0, %v6421_v20  ;;  %v4152_v4 = vmul.f32 1.442695, %v4098_v29  ;;  %5441 = vmatprep.subr.bf16.mxu1 %v5440_v54  ;;  %v4097_v32 = vsub.f32 0.0, %v3979_v24  ;;  %v5181_v24 = vld [vmem:[%s8036_s1 + $0x110] sm:$0xff] }
 0x83b   :  { %6440 = vrcp.f32 %v4197_v57  ;;  %5443 = vmatpush1.bf16.msra.mxu1 %v5442_v22  ;;  %v4099_v38 = vsub.f32 0.0, %v4068_v46  ;;  %v4072_v5 = vadd.f32 %v4071_v45, %v7797_v60  ;;  %v4104_v62 = vsub.f32 0.0, %v3983_v49 }
 0x83c   :  { %v6423_v34 = vpop.eup %6422  ;;  %6442 = vrcp.f32 %v4199_v26  ;;  %v3985_v58 = vadd.f32 %v3984_v50, %v7797_v60  ;;  %v4074_v47 = vadd.f32 %v4073_v37, %v7797_v60  ;;  %v4150_v22 = vmul.f32 1.442695, %v4097_v32 }
 0x83d   :  { %v6425_v2 = vpop.eup %6424  ;;  %v4176_v9 = vadd.f32 1.0, %v6423_v34  ;;  %6444 = vpow2.f32 %v4138_v42  ;;  %v4154_v13 = vmul.f32 1.442695, %v4099_v38  ;;  %v4164_v10 = vmul.f32 1.442695, %v4104_v62 }
 0x83e   :  { %v6427_v33 = vpop.eup %6426  ;;  %v4178_v59 = vadd.f32 1.0, %v6425_v2  ;;  %6446 = vpow2.f32 %v4148_v41  ;;  %v4105_v61 = vsub.f32 0.0, %v3985_v58  ;;  %v4107_v0 = vsub.f32 0.0, %v4074_v47 }
 0x83f   :  { %v6429_v1 = vpop.eup %6428  ;;  %6448 = vrcp.f32 %v4176_v9  ;;  %v4177_v55 = vadd.f32 1.0, %v6427_v33 }
 0x840   :  { %v6431_v6 = vpop.eup %6430  ;;  %6450 = vrcp.f32 %v4178_v59  ;;  %v5438_v40 = vpack.c.bf16 %v6429_v1, %v7829_v17  ;;  %v4106_v17 = vsub.f32 0.0, %v4072_v5  ;;  %v4166_v12 = vmul.f32 1.442695, %v4105_v61  ;;  %v5182_v59 = vld [vmem:[%s8036_s1 + $0x118] sm:$0xff] }
 0x841   :  { %v6433_v44 = vpop.eup %6432  ;;  %6452 = vrcp.f32 %v4177_v55  ;;  %v4179_v53 = vadd.f32 1.0, %v6431_v6  ;;  %v4170_v27 = vmul.f32 1.442695, %v4107_v0 }
 0x842   :  { %v6435_v52 = vpop.eup %6434  ;;  %v4184_v8 = vadd.f32 1.0, %v6433_v44  ;;  %6454 = vpow2.f32 %v4152_v4  ;;  %v4168_v19 = vmul.f32 1.442695, %v4106_v17 }
 0x843   :  { %v6437_v18 = vpop.eup %6436  ;;  %6456 = vrcp.f32 %v4179_v53  ;;  %v4186_v21 = vadd.f32 1.0, %v6435_v52 }
 0x844   :  { %v6439_v16 = vpop.eup %6438  ;;  %6458 = vrcp.f32 %v4184_v8  ;;  %v4185_v39 = vadd.f32 1.0, %v6437_v18 }
 0x845   :  { %v6441_v63 = vpop.eup %6440  ;;  %6460 = vrcp.f32 %v4186_v21  ;;  %v5446_v23 = vpack.c.bf16 %v6439_v16, %v7831_v15  ;;  %v7858_v15 = vld [vmem:[%s8036_s1 + $0x100] sm:$0xff]  ;;  %s6649_s1 = smov [#allocation2]  }
 0x846   :  { %v6443_v11 = vpop.eup %6442  ;;  %6462 = vrcp.f32 %v4185_v39  ;;  %v5436_v60 = vpack.c.bf16 %v6441_v63, %v7834_v7  ;;  %s5003_s27 = sshll.u32 %s6649_s1, 4  ;;  %s5004_s27 = int_to_ptr.vmem [resolvable:$true] %s5003_s27 }
 0x847   :  { %v6445_v28 = vpop.eup %6444  ;;  %6464 = vpow2.f32 %v4150_v22  ;;  %v5444_v3 = vpack.c.bf16 %v6443_v11, %v7836_v56  ;;  %v7909_v22 = vpop.permute.xlu0 %4248  ;;  %s6622_s28 = scalar_lea.vmem %s5004_s27, 128  ;;  %p6627_p1 = scmp.lt.s32.totalorder %s5004_s27, %s5004_s27 }
 0x848   :  { %v6447_v35 = vpop.eup %6446  ;;  %v4187_v30 = vadd.f32 1.0, %v6445_v28  ;;  %6466 = vpow2.f32 %v4154_v13  ;;  %5437 = vmatprep.subr.bf16.mxu0 %v5436_v60  ;;  %p6623_p0 = scmp.ne.s32.totalorder %s5004_s27, %s6622_s28  ;;  %p6628_p2 = scmp.lt.s32.totalorder %s6622_s28, %s6622_s28 }
 0x849   :  { %v6449_v36 = vpop.eup %6448  ;;  %6468 = vpow2.f32 %v4164_v10  ;;  %5445 = vmatprep.subr.bf16.mxu1 %v5444_v3  ;;  %5439 = vmatpush1.bf16.msra.mxu0 %v5438_v40  ;;  %v4192_v57 = vadd.f32 1.0, %v6447_v35 }
 0x84a   :  { %v6451_v7 = vpop.eup %6450  ;;  %6470 = vrcp.f32 %v4187_v30  ;;  %5447 = vmatpush1.bf16.msra.mxu1 %v5446_v23  ;;  %p6629_p3 = por %p6628_p2, %p6627_p1 }
 0x84b   :  { %v6453_v56 = vpop.eup %6452  ;;  %6472 = vpow2.f32 %v4168_v19 }
 0x84c   :  { %v6455_v14 = vpop.eup %6454  ;;  %5187 = vmatmul.mubr.msk.f32.vlgmr.msra.gmra.mrb[112].mxu0 %vm359_vm0, %v7858_v15  ;;  %6474 = vpow2.f32 %v4166_v12  ;;  %p6630_p4 = pnand %p6629_p3, %p6623_p0 }
 0x84d   :  { %v6457_v31 = vpop.eup %6456  ;;  %5191 = vmatmul.mubr.msk.f32.vlgmr.msra.gmra.mrb[112].mxu1 %vm359_vm0, %v7858_v15  ;;  %4348 = vmatprep.mubr.f32.mxu0 %v6647_v43  ;;  %6476 = vpow2.f32 %v4170_v27  ;;  %v4194_v26 = vadd.f32 1.0, %v6455_v14 }
 0x84e   :  { %v6459_v51 = vpop.eup %6458  ;;  %4437 = vmatprep.mubr.f32.mxu1 %v6647_v43  ;;  %6478 = vrcp.f32 %v4192_v57 }
 0x84f   :  { %v6461_v45 = vpop.eup %6460  ;;  %v5450_v50 = vpack.c.bf16 %v6459_v51, %v6449_v36  ;;  %6480 = vrcp.f32 %v4194_v26  ;;  %v7921_v51 = vpop.permute.xlu0 %4258 }
 0x850   :  { %v6463_v20 = vpop.eup %6462  ;;  %5188 = vmatmul.mubr.msk.f32.gmra.mrb[114].mxu0 %vm359_vm0, %v7868_v25  ;;  %v5458_v42 = vpack.c.bf16 %v6461_v45, %v6451_v7 }
 0x851   :  { %v6465_v37 = vpop.eup %6464  ;;  %5192 = vmatmul.mubr.msk.f32.gmra.mrb[114].mxu1 %vm359_vm0, %v7868_v25  ;;  %v5448_v41 = vpack.c.bf16 %v6463_v20, %v6453_v56  ;;  %4354 = vmatprep.mubr.f32.mxu0 %v6647_v43 }
 0x852   :  { %v6467_v29 = vpop.eup %6466  ;;  %4443 = vmatprep.mubr.f32.mxu1 %v6647_v43  ;;  %v4193_v46 = vadd.f32 1.0, %v6465_v37 }
 0x853   :  { %v6469_v34 = vpop.eup %6468  ;;  %5449 = vmatprep.subr.bf16.mxu0 %v5448_v41  ;;  %v4195_v2 = vadd.f32 1.0, %v6467_v29 }
 0x854   :  { %v6471_v54 = vpop.eup %6470  ;;  %v4200_v9 = vadd.f32 1.0, %v6469_v34  ;;  %5451 = vmatpush1.bf16.msra.mxu0 %v5450_v50 }
 0x855   :  { %v5456_v49 = vpack.c.bf16 %v6471_v54, %v6457_v31  ;;  %5189 = vmatmul.mubr.msk.f32.gmra.mrb[116].mxu0 %vm359_vm0, %v5181_v24  ;;  %5193 = vmatmul.mubr.msk.f32.gmra.mrb[116].mxu1 %vm359_vm0, %v5181_v24  ;;  %v6473_v33 = vpop.eup %6472 }
 0x856   :  { %6482 = vrcp.f32 %v4200_v9  ;;  %4360 = vmatprep.mubr.f32.mxu0 %v6647_v43  ;;  %4449 = vmatprep.mubr.f32.mxu1 %v6647_v43  ;;  %v6475_v4 = vpop.eup %6474  ;;  %v4202_v1 = vadd.f32 1.0, %v6473_v33 }
 0x857   :  { %6484 = vrcp.f32 %v4193_v46  ;;  %5457 = vmatprep.subr.bf16.mxu1 %v5456_v49  ;;  %v6477_v55 = vpop.eup %6476  ;;  %v4201_v32 = vadd.f32 1.0, %v6475_v4 }
 0x858   :  { %6486 = vrcp.f32 %v4195_v2  ;;  %5459 = vmatpush1.bf16.msra.mxu1 %v5458_v42  ;;  %v4203_v6 = vadd.f32 1.0, %v6477_v55  ;;  %v6479_v38 = vpop.eup %6478 }
 0x859   :  { %6488 = vrcp.f32 %v4202_v1  ;;  %5190 = vmatmul.mubr.msk.f32.gmra.mrb[118].mxu0 %vm359_vm0, %v5182_v59  ;;  %5194 = vmatmul.mubr.msk.f32.gmra.mrb[118].mxu1 %vm359_vm0, %v5182_v59  ;;  %v6481_v5 = vpop.eup %6480 }
 0x85a   :  { %6490 = vrcp.f32 %v4201_v32  ;;  %4520 = vmatprep.mubr.f32.mxu0 %v6647_v43  ;;  %4609 = vmatprep.mubr.f32.mxu1 %v6647_v43 }
 0x85b   :  { %6492 = vrcp.f32 %v4203_v6 }
 0x860   :  { %v6483_v40 = vpop.eup %6482 }
 0x861   :  { %v6485_v44 = vpop.eup %6484  ;;  %v5454_v53 = vpack.c.bf16 %v6483_v40, %v6479_v38 }
 0x862   :  { %v6487_v62 = vpop.eup %6486 }
 0x863   :  { %v6489_v58 = vpop.eup %6488 }
 0x864   :  { %v6491_v52 = vpop.eup %6490  ;;  %v5462_v8 = vpack.c.bf16 %v6489_v58, %v6481_v5 }
 0x865   :  { %v6493_v47 = vpop.eup %6492  ;;  %v5452_v18 = vpack.c.bf16 %v6491_v52, %v6485_v44 }
 0x866   :  { %v5460_v21 = vpack.c.bf16 %v6493_v47, %v6487_v62 }
 0x867   :  { %5453 = vmatprep.subr.bf16.mxu0 %v5452_v18 }
 0x868   :  { %5461 = vmatprep.subr.bf16.mxu1 %v5460_v21  ;;  %5455 = vmatpush1.bf16.msra.mxu0 %v5454_v53 }
 0x869   :  { %5463 = vmatpush1.bf16.msra.mxu1 %v5462_v8 }
 0x86b   :  { %5195 = vmatmul.mubr.msk.f32.vlgmr.msra.gmra.mrb[120].mxu0 %vm359_vm0, %v7858_v15 }
 0x86c   :  { %5199 = vmatmul.mubr.msk.f32.vlgmr.msra.gmra.mrb[120].mxu1 %vm359_vm0, %v7858_v15  ;;  %4526 = vmatprep.mubr.f32.mxu0 %v6647_v43 }
 0x86d   :  { %4615 = vmatprep.mubr.f32.mxu1 %v6647_v43 }
 0x86f   :  { %5196 = vmatmul.mubr.msk.f32.gmra.mrb[122].mxu0 %vm359_vm0, %v7868_v25 }
 0x870   :  { %5200 = vmatmul.mubr.msk.f32.gmra.mrb[122].mxu1 %vm359_vm0, %v7868_v25  ;;  %4532 = vmatprep.mubr.f32.mxu0 %v6647_v43 }
 0x871   :  { %4621 = vmatprep.mubr.f32.mxu1 %v6647_v43 }
 0x873   :  { %5197 = vmatmul.mubr.msk.f32.gmra.mrb[124].mxu0 %vm359_vm0, %v5181_v24 }
 0x874   :  { %5201 = vmatmul.mubr.msk.f32.gmra.mrb[124].mxu1 %vm359_vm0, %v5181_v24  ;;  %4538 = vmatprep.mubr.f32.mxu0 %v6647_v43 }
 0x875   :  { %4627 = vmatprep.mubr.f32.mxu1 %v6647_v43  ;;  %v7915_v43 = vpop.permute.xlu1 %4253 }
 0x877   :  { %5198 = vmatmul.mubr.msk.f32.gmra.mrb[126].mxu0 %vm359_vm0, %v5182_v59 }
 0x878   :  { %5202 = vmatmul.mubr.msk.f32.gmra.mrb[126].mxu1 %vm359_vm0, %v5182_v59 }
 0x879   :  { %v7927_v5 = vpop.permute.xlu1 %4263 }
 0x91f   :  { %v4344_v16 = vpop.f32.mrb[112].mxu0 }
 0x920   :  { %v4345_v39 = vadd.f32 %v4344_v16, %v7909_v22  ;;  %v4433_v13 = vpop.f32.mrb[112].mxu1  ;;  %v4346_v17 = vpop.f32.mrb[113].mxu0 }
 0x921   :  { %v4434_v63 = vadd.f32 %v4433_v13, %v7909_v22  ;;  %v4347_v10 = vadd.f32 %v4346_v17, %v7909_v22  ;;  %v4435_v61 = vpop.f32.mrb[113].mxu1 }
 0x922   :  { %v4634_v23 = vsub.f32 0.0, %v4345_v39  ;;  %v4436_v11 = vadd.f32 %v4435_v61, %v7909_v22 }
 0x923   :  { %v4636_v0 = vsub.f32 0.0, %v4434_v63  ;;  %v4635_v60 = vsub.f32 0.0, %v4347_v10  ;;  %v4350_v28 = vpop.f32.mrb[114].mxu0 }
 0x924   :  { %v4666_v3 = vmul.f32 1.442695, %v4634_v23  ;;  %v4637_v35 = vsub.f32 0.0, %v4436_v11  ;;  %v4351_v30 = vadd.f32 %v4350_v28, %v7915_v43  ;;  %v4439_v19 = vpop.f32.mrb[114].mxu1  ;;  %v4352_v36 = vpop.f32.mrb[115].mxu0 }
 0x925   :  { %v4670_v12 = vmul.f32 1.442695, %v4636_v0  ;;  %v4668_v15 = vmul.f32 1.442695, %v4635_v60  ;;  %v4440_v7 = vadd.f32 %v4439_v19, %v7915_v43  ;;  %v4353_v27 = vadd.f32 %v4352_v36, %v7915_v43  ;;  %v4441_v56 = vpop.f32.mrb[115].mxu1 }
 0x926   :  { %6494 = vpow2.f32 %v4666_v3  ;;  %v4672_v14 = vmul.f32 1.442695, %v4637_v35  ;;  %v4642_v31 = vsub.f32 0.0, %v4351_v30  ;;  %v4442_v25 = vadd.f32 %v4441_v56, %v7915_v43 }
 0x927   :  { %6496 = vpow2.f32 %v4670_v12  ;;  %v4644_v45 = vsub.f32 0.0, %v4440_v7  ;;  %v4643_v50 = vsub.f32 0.0, %v4353_v27 }
 0x928   :  { %6498 = vpow2.f32 %v4668_v15  ;;  %v4682_v20 = vmul.f32 1.442695, %v4642_v31  ;;  %v4645_v57 = vsub.f32 0.0, %v4442_v25  ;;  %v4356_v42 = vpop.f32.mrb[116].mxu0  ;;  %v4445_v37 = vpop.f32.mrb[116].mxu1 }
 0x929   :  { %6500 = vpow2.f32 %v4672_v14  ;;  %v4686_v26 = vmul.f32 1.442695, %v4644_v45  ;;  %v4684_v41 = vmul.f32 1.442695, %v4643_v50  ;;  %v4357_v29 = vadd.f32 %v4356_v42, %v7921_v51  ;;  %v4358_v24 = vpop.f32.mrb[117].mxu0  ;;  %v4447_v34 = vpop.f32.mrb[117].mxu1 }
 0x92a   :  { %6502 = vpow2.f32 %v4682_v20  ;;  %v4688_v46 = vmul.f32 1.442695, %v4645_v57  ;;  %v4446_v54 = vadd.f32 %v4445_v37, %v7921_v51  ;;  %v4359_v2 = vadd.f32 %v4358_v24, %v7921_v51  ;;  %v7933_v37 = vpop.permute.xlu0 %4803 }
 0x92b   :  { %6504 = vpow2.f32 %v4686_v26  ;;  %v4650_v9 = vsub.f32 0.0, %v4357_v29  ;;  %v4448_v49 = vadd.f32 %v4447_v34, %v7921_v51 }
 0x92c   :  { %6506 = vpow2.f32 %v4684_v41  ;;  %v4652_v33 = vsub.f32 0.0, %v4446_v54  ;;  %v4651_v59 = vsub.f32 0.0, %v4359_v2  ;;  %v4362_v4 = vpop.f32.mrb[118].mxu0  ;;  %v4451_v1 = vpop.f32.mrb[118].mxu1 }
 0x92d   :  { %6508 = vpow2.f32 %v4688_v46  ;;  %v4698_v55 = vmul.f32 1.442695, %v4650_v9  ;;  %v4653_v32 = vsub.f32 0.0, %v4448_v49  ;;  %v4364_v6 = vpop.f32.mrb[119].mxu0  ;;  %v4453_v38 = vpop.f32.mrb[119].mxu1  ;;  %v4363_v62 = vadd.f32 %v4362_v4, %v7927_v5 }
 0x92e   :  { %v4702_v40 = vmul.f32 1.442695, %v4652_v33  ;;  %v4700_v44 = vmul.f32 1.442695, %v4651_v59  ;;  %v4452_v63 = vadd.f32 %v4451_v1, %v7927_v5  ;;  %v4365_v23 = vadd.f32 %v4364_v6, %v7927_v5 }
 0x92f   :  { %6510 = vpow2.f32 %v4698_v55  ;;  %v4704_v53 = vmul.f32 1.442695, %v4653_v32  ;;  %v4658_v39 = vsub.f32 0.0, %v4363_v62  ;;  %v4454_v60 = vadd.f32 %v4453_v38, %v7927_v5  ;;  %v7941_v55 = vpop.permute.xlu1 %4808 }
 0x930   :  { %v6495_v58 = vpop.eup %6494  ;;  %6512 = vpow2.f32 %v4702_v40  ;;  %v4660_v19 = vsub.f32 0.0, %v4452_v63  ;;  %v4659_v12 = vsub.f32 0.0, %v4365_v23 }
 0x931   :  { %v6497_v52 = vpop.eup %6496  ;;  %v4730_v8 = vadd.f32 1.0, %v6495_v58  ;;  %6514 = vpow2.f32 %v4700_v44  ;;  %v4714_v35 = vmul.f32 1.442695, %v4658_v39  ;;  %v4661_v27 = vsub.f32 0.0, %v4454_v60 }
 0x932   :  { %v6499_v47 = vpop.eup %6498  ;;  %v4732_v18 = vadd.f32 1.0, %v6497_v52  ;;  %6516 = vpow2.f32 %v4704_v53  ;;  %v4718_v45 = vmul.f32 1.442695, %v4660_v19  ;;  %v4716_v57 = vmul.f32 1.442695, %v4659_v12 }
 0x933   :  { %v6501_v21 = vpop.eup %6500  ;;  %6518 = vrcp.f32 %v4730_v8  ;;  %v4731_v16 = vadd.f32 1.0, %v6499_v47  ;;  %v4720_v26 = vmul.f32 1.442695, %v4661_v27 }
 0x934   :  { %v6503_v13 = vpop.eup %6502  ;;  %6520 = vrcp.f32 %v4732_v18  ;;  %v4733_v17 = vadd.f32 1.0, %v6501_v21 }
 0x935   :  { %v6505_v10 = vpop.eup %6504  ;;  %6522 = vrcp.f32 %v4731_v16  ;;  %v4738_v61 = vadd.f32 1.0, %v6503_v13 }
 0x936   :  { %v6507_v11 = vpop.eup %6506  ;;  %6524 = vrcp.f32 %v4733_v17  ;;  %v4740_v0 = vadd.f32 1.0, %v6505_v10 }
 0x937   :  { %v6509_v28 = vpop.eup %6508  ;;  %6526 = vrcp.f32 %v4738_v61  ;;  %v4739_v3 = vadd.f32 1.0, %v6507_v11 }
 0x938   :  { %6528 = vrcp.f32 %v4740_v0  ;;  %v4741_v30 = vadd.f32 1.0, %v6509_v28 }
 0x939   :  { %v6511_v36 = vpop.eup %6510  ;;  %6530 = vrcp.f32 %v4739_v3  ;;  %v7950_v3 = vpop.permute.xlu0 %4813 }
 0x93a   :  { %v6513_v15 = vpop.eup %6512  ;;  %6532 = vrcp.f32 %v4741_v30  ;;  %v4746_v7 = vadd.f32 1.0, %v6511_v36 }
 0x93b   :  { %v6515_v56 = vpop.eup %6514  ;;  %v4748_v14 = vadd.f32 1.0, %v6513_v15  ;;  %6534 = vpow2.f32 %v4714_v35 }
 0x93c   :  { %v6517_v31 = vpop.eup %6516  ;;  %6536 = vrcp.f32 %v4746_v7  ;;  %v4747_v25 = vadd.f32 1.0, %v6515_v56 }
 0x93d   :  { %v6519_v50 = vpop.eup %6518  ;;  %6538 = vrcp.f32 %v4748_v14  ;;  %v4749_v20 = vadd.f32 1.0, %v6517_v31 }
 0x93e   :  { %v6521_v42 = vpop.eup %6520  ;;  %6540 = vrcp.f32 %v4747_v25  ;;  %v4522_v41 = vpop.f32.mrb[120].mxu0  ;;  %v4821_v24 = vmul.f32 %v6519_v50, %v7933_v37 }
 0x93f   :  { %v6523_v29 = vpop.eup %6522  ;;  %v4823_v34 = vmul.f32 %v6521_v42, %v7933_v37  ;;  %6542 = vrcp.f32 %v4749_v20  ;;  %v4523_v46 = vadd.f32 %v4522_v41, %v7909_v22  ;;  %v4611_v54 = vpop.f32.mrb[120].mxu1 }
 0x940   :  { %v4524_v2 = vpop.f32.mrb[121].mxu0  ;;  %v6525_v9 = vpop.eup %6524  ;;  %v4822_v49 = vmul.f32 %v6523_v29, %v7933_v37  ;;  %6544 = vpow2.f32 %v4718_v45  ;;  %v4612_v33 = vadd.f32 %v4611_v54, %v7909_v22 }
 0x941   :  { %v4525_v59 = vadd.f32 %v4524_v2, %v7909_v22  ;;  %v4613_v4 = vpop.f32.mrb[121].mxu1  ;;  %v6527_v1 = vpop.eup %6526  ;;  %v4824_v32 = vmul.f32 %v6525_v9, %v7933_v37  ;;  %6546 = vpow2.f32 %v4716_v57  ;;  %v4638_v6 = vsub.f32 0.0, %v4523_v46 }
 0x942   :  { %v4614_v38 = vadd.f32 %v4613_v4, %v7909_v22  ;;  %v6529_v40 = vpop.eup %6528  ;;  %v4829_v44 = vmul.f32 %v6527_v1, %v7941_v55  ;;  %6548 = vpow2.f32 %v4720_v26  ;;  %v4640_v53 = vsub.f32 0.0, %v4612_v33  ;;  %v4528_v58 = vpop.f32.mrb[122].mxu0 }
 0x943   :  { %v4639_v62 = vsub.f32 0.0, %v4525_v59  ;;  %v6531_v52 = vpop.eup %6530  ;;  %v4831_v8 = vmul.f32 %v6529_v40, %v7941_v55  ;;  %v4674_v47 = vmul.f32 1.442695, %v4638_v6  ;;  %v4529_v21 = vadd.f32 %v4528_v58, %v7915_v43  ;;  %v4617_v16 = vpop.f32.mrb[122].mxu1 }
 0x944   :  { %v4641_v18 = vsub.f32 0.0, %v4614_v38  ;;  %v4530_v39 = vpop.f32.mrb[123].mxu0  ;;  %v6533_v13 = vpop.eup %6532  ;;  %v4853_v17 = vadd.f32 %v4829_v44, %v4821_v24  ;;  %v4830_v22 = vmul.f32 %v6531_v52, %v7941_v55  ;;  %v4678_v63 = vmul.f32 1.442695, %v4640_v53 }
 0x945   :  { %v4676_v10 = vmul.f32 1.442695, %v4639_v62  ;;  %v4619_v61 = vpop.f32.mrb[123].mxu1  ;;  %v6535_v23 = vpop.eup %6534  ;;  %v4871_v11 = vadd.f32 %v4831_v8, %v4823_v34  ;;  %v4832_v0 = vmul.f32 %v6533_v13, %v7941_v55  ;;  %6550 = vpow2.f32 %v4674_v47 }
 0x946   :  { %v4680_v60 = vmul.f32 1.442695, %v4641_v18  ;;  %v6537_v28 = vpop.eup %6536  ;;  %v4862_v35 = vadd.f32 %v4830_v22, %v4822_v49  ;;  %v4754_v30 = vadd.f32 1.0, %v6535_v23  ;;  %6552 = vpow2.f32 %v4678_v63  ;;  %v4534_v36 = vpop.f32.mrb[124].mxu0 }
 0x947   :  { %v4646_v19 = vsub.f32 0.0, %v4529_v21  ;;  %v6539_v12 = vpop.eup %6538  ;;  %v4880_v15 = vadd.f32 %v4832_v0, %v4824_v32  ;;  %v4837_v7 = vmul.f32 %v6537_v28, %v7950_v3  ;;  %6554 = vpow2.f32 %v4676_v10  ;;  %v4623_v56 = vpop.f32.mrb[124].mxu1 }
 0x948   :  { %v4618_v27 = vadd.f32 %v4617_v16, %v7915_v43  ;;  %v4536_v14 = vpop.f32.mrb[125].mxu0  ;;  %v6541_v31 = vpop.eup %6540  ;;  %v4839_v25 = vmul.f32 %v6539_v12, %v7950_v3  ;;  %6556 = vrcp.f32 %v4754_v30  ;;  %v4531_v50 = vadd.f32 %v4530_v39, %v7915_v43 }
 0x949   :  { %v4690_v45 = vmul.f32 1.442695, %v4646_v19  ;;  %v4625_v20 = vpop.f32.mrb[125].mxu1  ;;  %v6543_v57 = vpop.eup %6542  ;;  %v4854_v42 = vadd.f32 %v4853_v17, %v4837_v7  ;;  %v4838_v26 = vmul.f32 %v6541_v31, %v7950_v3  ;;  %6558 = vpow2.f32 %v4680_v60 }
 0x94a   :  { %v4648_v41 = vsub.f32 0.0, %v4618_v27  ;;  %v6545_v29 = vpop.eup %6544  ;;  %v7957_v24 = vadd.f32 %v4871_v11, %v4839_v25  ;;  %v4840_v34 = vmul.f32 %v6543_v57, %v7950_v3  ;;  %v4647_v46 = vsub.f32 0.0, %v4531_v50  ;;  %v4540_v54 = vpop.f32.mrb[126].mxu0 }
 0x94b   :  { %6560 = vpow2.f32 %v4690_v45  ;;  %v6547_v2 = vpop.eup %6546  ;;  %v7960_v9 = vadd.f32 %v4862_v35, %v4838_v26  ;;  %v4756_v49 = vadd.f32 1.0, %v6545_v29  ;;  %v4620_v59 = vadd.f32 %v4619_v61, %v7915_v43  ;;  %v4629_v4 = vpop.f32.mrb[126].mxu1 }
 0x94c   :  { %v4694_v33 = vmul.f32 1.442695, %v4648_v41  ;;  %v4542_v1 = vpop.f32.mrb[127].mxu0  ;;  %v6549_v32 = vpop.eup %6548  ;;  %v7963_v6 = vadd.f32 %v4880_v15, %v4840_v34  ;;  %v4755_v38 = vadd.f32 1.0, %v6547_v2  ;;  %v4692_v40 = vmul.f32 1.442695, %v4647_v46 }
 0x94d   :  { %v4535_v44 = vadd.f32 %v4534_v36, %v7921_v51  ;;  %v4631_v53 = vpop.f32.mrb[127].mxu1  ;;  %6562 = vrcp.f32 %v4756_v49  ;;  %v4757_v62 = vadd.f32 1.0, %v6549_v32  ;;  %v4649_v58 = vsub.f32 0.0, %v4620_v59  ;;  %v7970_v23 = vpop.permute.xlu1 %4818 }
 0x94e   :  { %v4624_v52 = vadd.f32 %v4623_v56, %v7921_v51  ;;  %6564 = vrcp.f32 %v4755_v38  ;;  %v4537_v47 = vadd.f32 %v4536_v14, %v7921_v51  ;;  %v4626_v21 = vadd.f32 %v4625_v20, %v7921_v51 }
 0x94f   :  { %v4654_v8 = vsub.f32 0.0, %v4535_v44  ;;  %v6551_v43 = vpop.eup %6550  ;;  %6566 = vrcp.f32 %v4757_v62  ;;  %v4541_v13 = vadd.f32 %v4540_v54, %v7927_v5  ;;  %v4696_v63 = vmul.f32 1.442695, %v4649_v58 }
 0x950   :  { %v4656_v18 = vsub.f32 0.0, %v4624_v52  ;;  %v6553_v16 = vpop.eup %6552  ;;  %v4734_v39 = vadd.f32 1.0, %v6551_v43  ;;  %6568 = vpow2.f32 %v4694_v33  ;;  %v4655_v60 = vsub.f32 0.0, %v4537_v47 }
 0x951   :  { %v6555_v17 = vpop.eup %6554  ;;  %v4736_v22 = vadd.f32 1.0, %v6553_v16  ;;  %6570 = vpow2.f32 %v4692_v40  ;;  %v4706_v10 = vmul.f32 1.442695, %v4654_v8  ;;  %v4657_v35 = vsub.f32 0.0, %v4626_v21 }
 0x952   :  { %v6557_v61 = vpop.eup %6556  ;;  %6572 = vrcp.f32 %v4734_v39  ;;  %v4735_v11 = vadd.f32 1.0, %v6555_v17  ;;  %v4710_v0 = vmul.f32 1.442695, %v4656_v18  ;;  %v4630_v30 = vadd.f32 %v4629_v4, %v7927_v5 }
 0x953   :  { %v6559_v28 = vpop.eup %6558  ;;  %v4845_v51 = vmul.f32 %v6557_v61, %v7970_v23  ;;  %6574 = vrcp.f32 %v4736_v22  ;;  %v4662_v12 = vsub.f32 0.0, %v4541_v13  ;;  %v4543_v15 = vadd.f32 %v4542_v1, %v7927_v5 }
 0x954   :  { %6576 = vrcp.f32 %v4735_v11  ;;  %v4737_v36 = vadd.f32 1.0, %v6559_v28  ;;  %v4664_v56 = vsub.f32 0.0, %v4630_v30  ;;  %v4708_v14 = vmul.f32 1.442695, %v4655_v60 }
 0x955   :  { %v6561_v19 = vpop.eup %6560  ;;  %v4855_v7 = vadd.f32 %v4854_v42, %v4845_v51  ;;  %6578 = vpow2.f32 %v4696_v63  ;;  %v4663_v31 = vsub.f32 0.0, %v4543_v15  ;;  %v4632_v25 = vadd.f32 %v4631_v53, %v7927_v5 }
 0x956   :  { %v4742_v27 = vadd.f32 1.0, %v6561_v19  ;;  %6580 = vrcp.f32 %v4737_v36  ;;  %v4712_v50 = vmul.f32 1.442695, %v4657_v35  ;;  %v6648_v57 = vmov 1966171168  }
 0x957   :  { %v6563_v45 = vpop.eup %6562  ;;  %v4856_v20 = vrot.slane %v4855_v7, 4  ;;  %v4951_v26 = vunpack.c.l.s4 %v6648_v57  ;;  %v4722_v34 = vmul.f32 1.442695, %v4662_v12  ;;  %v4726_v42 = vmul.f32 1.442695, %v4664_v56  ;;  %v7988_v57 = vpop.permute.xlu0 %4927 }
 0x958   :  { %6582 = vrcp.f32 %v4742_v27  ;;  %v6565_v41 = vpop.eup %6564  ;;  %v4847_v29 = vmul.f32 %v6563_v45, %v7970_v23  ;;  %v4665_v2 = vsub.f32 0.0, %v4632_v25  ;;  %v4724_v4 = vmul.f32 1.442695, %v4663_v31 }
 0x959   :  { %6584 = vpow2.f32 %v4706_v10  ;;  %v6567_v46 = vpop.eup %6566  ;;  %v4846_v54 = vmul.f32 %v6565_v41, %v7970_v23  ;;  %v4857_v49 = vadd.f32 %v4856_v20, %v4855_v7  ;;  %v4952_v13 = vunpack.c.0.s8 %v4951_v26 }
 0x95a   :  { %6586 = vpow2.f32 %v4710_v0  ;;  %v6569_v33 = vpop.eup %6568  ;;  %v4873_v5 = vadd.f32 %v7957_v24, %v4847_v29  ;;  %v4848_v59 = vmul.f32 %v6567_v46, %v7970_v23  ;;  %v4728_v8 = vmul.f32 1.442695, %v4665_v2 }
 0x95b   :  { %6588 = vpow2.f32 %v4708_v14  ;;  %v6571_v1 = vpop.eup %6570  ;;  %v4864_v32 = vadd.f32 %v7960_v9, %v4846_v54  ;;  %v4744_v38 = vadd.f32 1.0, %v6569_v33  ;;  %v4858_v40 = vrot.slane %v4857_v49, 2 }
 0x95c   :  { %6590 = vpow2.f32 %v4712_v50  ;;  %v6573_v44 = vpop.eup %6572  ;;  %v4882_v53 = vadd.f32 %v7963_v6, %v4848_v59  ;;  %v4743_v62 = vadd.f32 1.0, %v6571_v1  ;;  %v4874_v58 = vrot.slane %v4873_v5, 4 }
 0x95d   :  { %6592 = vpow2.f32 %v4722_v34  ;;  %v6575_v52 = vpop.eup %6574  ;;  %v4859_v24 = vadd.f32 %v4858_v40, %v4857_v49  ;;  %v4865_v47 = vrot.slane %v4864_v32, 4  ;;  %v4825_v61 = vmul.f32 %v6573_v44, %v7933_v37 }
 0x95e   :  { %6594 = vrcp.f32 %v4744_v38  ;;  %v6577_v43 = vpop.eup %6576  ;;  %v4875_v18 = vadd.f32 %v4874_v58, %v4873_v5  ;;  %v4883_v21 = vrot.slane %v4882_v53, 4  ;;  %v7985_v12 = vsub.s32 %v4952_v13, %v6807_v48 }
 0x95f   :  { %6596 = vrcp.f32 %v4743_v62  ;;  %v6579_v16 = vpop.eup %6578  ;;  %v4860_v9 = vrot.slane %v4859_v24, 1  ;;  %v4866_v39 = vadd.f32 %v4865_v47, %v4864_v32  ;;  %v4827_v25 = vmul.f32 %v6575_v52, %v7933_v37 }
 0x960   :  { %6598 = vpow2.f32 %v4726_v42  ;;  %v6581_v17 = vpop.eup %6580  ;;  %v4745_v22 = vadd.f32 1.0, %v6579_v16  ;;  %v4876_v6 = vrot.slane %v4875_v18, 2  ;;  %v4884_v63 = vadd.f32 %v4883_v21, %v4882_v53 }
 0x961   :  { %6600 = vpow2.f32 %v4724_v4  ;;  %v4867_v11 = vrot.slane %v4866_v39, 2  ;;  %v4861_v19 = vadd.f32 %v4860_v9, %v4859_v24  ;;  %v4826_v59 = vmul.f32 %v6577_v43, %v7933_v37 }
 0x962   :  { %v6583_v10 = vpop.eup %6582  ;;  %6602 = vpow2.f32 %v4728_v8  ;;  %v4877_v28 = vadd.f32 %v4876_v6, %v4875_v18  ;;  %v4885_v51 = vrot.slane %v4884_v63, 2  ;;  %v4828_v43 = vmul.f32 %v6581_v17, %v7933_v37 }
 0x963   :  { %v6585_v0 = vpop.eup %6584  ;;  %v4833_v60 = vmul.f32 %v6583_v10, %v7941_v55  ;;  %6604 = vrcp.f32 %v4745_v22  ;;  %v4868_v36 = vadd.f32 %v4867_v11, %v4866_v39  ;;  %v4930_v46 = vadd.f32 %v7988_v57, %v4861_v19 }
 0x964   :  { %v6587_v35 = vpop.eup %6586  ;;  %v4750_v30 = vadd.f32 1.0, %v6585_v0  ;;  %v4878_v56 = vrot.slane %v4877_v28, 1  ;;  %v4886_v14 = vadd.f32 %v4885_v51, %v4884_v63 }
 0x965   :  { %v6589_v15 = vpop.eup %6588  ;;  %v4889_v7 = vadd.f32 %v4833_v60, %v4825_v61  ;;  %v4752_v27 = vadd.f32 1.0, %v6587_v35  ;;  %v4869_v50 = vrot.slane %v4868_v36, 1 }
 0x966   :  { %v6591_v31 = vpop.eup %6590  ;;  %6606 = vrcp.f32 %v4750_v30  ;;  %v4751_v45 = vadd.f32 1.0, %v6589_v15  ;;  %v4879_v41 = vadd.f32 %v4878_v56, %v4877_v28  ;;  %v4887_v29 = vrot.slane %v4886_v14, 1 }
 0x967   :  { %v6593_v20 = vpop.eup %6592  ;;  %6608 = vrcp.f32 %v4752_v27  ;;  %v4753_v26 = vadd.f32 1.0, %v6591_v31  ;;  %v4870_v42 = vadd.f32 %v4869_v50, %v4868_v36 }
 0x968   :  { %v6595_v48 = vpop.eup %6594  ;;  %6610 = vrcp.f32 %v4751_v45  ;;  %v4758_v34 = vadd.f32 1.0, %v6593_v20  ;;  %v4888_v49 = vadd.f32 %v4887_v29, %v4886_v14  ;;  %v4932_v33 = vadd.f32 %v7988_v57, %v4879_v41 }
 0x969   :  { %v6597_v54 = vpop.eup %6596  ;;  %v4835_v2 = vmul.f32 %v6595_v48, %v7941_v55  ;;  %6612 = vrcp.f32 %v4753_v26  ;;  %v4931_v1 = vadd.f32 %v7988_v57, %v4870_v42 }
 0x96a   :  { %v6599_v5 = vpop.eup %6598  ;;  %v4834_v4 = vmul.f32 %v6597_v54, %v7941_v55  ;;  %6614 = vrcp.f32 %v4758_v34  ;;  %v4933_v44 = vadd.f32 %v7988_v57, %v4888_v49 }
 0x96b   :  { %v6601_v32 = vpop.eup %6600  ;;  %v4907_v38 = vadd.f32 %v4835_v2, %v4827_v25  ;;  %v4760_v40 = vadd.f32 1.0, %v6599_v5  ;;  %v4946_v52 = vcombine.low %v4930_v46, %v4931_v1 }
 0x96c   :  { %v6603_v53 = vpop.eup %6602  ;;  %v4898_v62 = vadd.f32 %v4834_v4, %v4826_v59  ;;  %v4759_v58 = vadd.f32 1.0, %v6601_v32  ;;  %v4947_v47 = vcombine.low %v4932_v33, %v4933_v44 }
 0x96d   :  { %v6605_v8 = vpop.eup %6604  ;;  %6616 = vrcp.f32 %v4760_v40  ;;  %v4761_v24 = vadd.f32 1.0, %v6603_v53  ;;  %v8000_v21 = vrot.slane %v4946_v52, %v7985_v12 }
 0x96e   :  { %v4836_v18 = vmul.f32 %v6605_v8, %v7941_v55  ;;  %6618 = vrcp.f32 %v4759_v58  ;;  %v8003_v16 = vrot.slane %v4947_v47, %v7985_v12 }
 0x96f   :  { %6620 = vrcp.f32 %v4761_v24 }
 0x970   :  { %v6607_v9 = vpop.eup %6606  ;;  %v4916_v39 = vadd.f32 %v4836_v18, %v4828_v43  ;;  %v4978_v6 = vcombine.low %v8000_v21, %v8003_v16 }
 0x971   :  { %v6609_v13 = vpop.eup %6608  ;;  %v4841_v22 = vmul.f32 %v6607_v9, %v7950_v3 }
 0x972   :  { %v6611_v63 = vpop.eup %6610  ;;  %v4843_v37 = vmul.f32 %v6609_v13, %v7950_v3  ;;  %v4986_v18 = vrot.slane %v4978_v6, %v7985_v12 }
 0x973   :  { %v6613_v55 = vpop.eup %6612  ;;  %v4890_v17 = vadd.f32 %v4889_v7, %v4841_v22  ;;  %v4842_v10 = vmul.f32 %v6611_v63, %v7950_v3 }
 0x974   :  { %v6615_v61 = vpop.eup %6614  ;;  %v4908_v11 = vadd.f32 %v4907_v38, %v4843_v37  ;;  %v4844_v0 = vmul.f32 %v6613_v55, %v7950_v3 }
 0x975   :  { %v4899_v60 = vadd.f32 %v4898_v62, %v4842_v10  ;;  %v4849_v28 = vmul.f32 %v6615_v61, %v7970_v23 }
 0x976   :  { %v4917_v51 = vadd.f32 %v4916_v39, %v4844_v0 }
 0x977   :  { %v6617_v35 = vpop.eup %6616  ;;  %v4891_v30 = vadd.f32 %v4890_v17, %v4849_v28 }
 0x978   :  { %v6619_v19 = vpop.eup %6618  ;;  %v4851_v36 = vmul.f32 %v6617_v35, %v7970_v23 }
 0x979   :  { %v6621_v15 = vpop.eup %6620  ;;  %v4850_v27 = vmul.f32 %v6619_v19, %v7970_v23  ;;  %v4892_v56 = vrot.slane %v4891_v30, 4 }
 0x97a   :  { %v4909_v7 = vadd.f32 %v4908_v11, %v4851_v36  ;;  %v4852_v14 = vmul.f32 %v6621_v15, %v7970_v23 }
 0x97b   :  { %v4900_v31 = vadd.f32 %v4899_v60, %v4850_v27  ;;  %v4893_v25 = vadd.f32 %v4892_v56, %v4891_v30 }
 0x97c   :  { %v4918_v45 = vadd.f32 %v4917_v51, %v4852_v14  ;;  %v4910_v3 = vrot.slane %v4909_v7, 4 }
 0x97d   :  { %v4894_v50 = vrot.slane %v4893_v25, 2  ;;  %v4901_v20 = vrot.slane %v4900_v31, 4 }
 0x97e   :  { %v4911_v26 = vadd.f32 %v4910_v3, %v4909_v7  ;;  %v4919_v41 = vrot.slane %v4918_v45, 4 }
 0x97f   :  { %v4895_v29 = vadd.f32 %v4894_v50, %v4893_v25  ;;  %v4902_v48 = vadd.f32 %v4901_v20, %v4900_v31 }
 0x980   :  { %v4912_v34 = vrot.slane %v4911_v26, 2  ;;  %v4920_v42 = vadd.f32 %v4919_v41, %v4918_v45 }
 0x981   :  { %v4896_v46 = vrot.slane %v4895_v29, 1  ;;  %v4903_v54 = vrot.slane %v4902_v48, 2 }
 0x982   :  { %v4913_v2 = vadd.f32 %v4912_v34, %v4911_v26  ;;  %v4921_v49 = vrot.slane %v4920_v42, 2 }
 0x983   :  { %v4897_v33 = vadd.f32 %v4896_v46, %v4895_v29  ;;  %v4904_v5 = vadd.f32 %v4903_v54, %v4902_v48 }
 0x984   :  { %v4914_v59 = vrot.slane %v4913_v2, 1  ;;  %v4922_v23 = vadd.f32 %v4921_v49, %v4920_v42 }
 0x985   :  { %v4905_v4 = vrot.slane %v4904_v5, 1  ;;  %v4934_v40 = vadd.f32 %v7988_v57, %v4897_v33 }
 0x986   :  { %v4915_v1 = vadd.f32 %v4914_v59, %v4913_v2  ;;  %v4923_v32 = vrot.slane %v4922_v23, 1 }
 0x987   :  { %v4906_v38 = vadd.f32 %v4905_v4, %v4904_v5 }
 0x988   :  { %v4924_v44 = vadd.f32 %v4923_v32, %v4922_v23  ;;  %v4936_v53 = vadd.f32 %v7988_v57, %v4915_v1 }
 0x989   :  { %v4935_v62 = vadd.f32 %v7988_v57, %v4906_v38 }
 0x98a   :  { %v4937_v58 = vadd.f32 %v7988_v57, %v4924_v44 }
 0x98b   :  { %v4948_v52 = vcombine.low %v4934_v40, %v4935_v62 }
 0x98c   :  { %v4949_v8 = vcombine.low %v4936_v53, %v4937_v58 }
 0x98d   :  { %v4970_v24 = vrot.slane %v4948_v52, %v7985_v12 }
 0x98e   :  { %v4977_v47 = vrot.slane %v4949_v8, %v7985_v12 }
 0x990   :  { %v4979_v43 = vcombine.low %v4970_v24, %v4977_v47 }
 0x992   :  { %v4993_v21 = vrot.slane %v4979_v43, %v7985_v12 }
 0x994   :  { %v4994_v16 = vcombine.low %v4986_v18, %v4993_v21 }
 0x996   :  { %4996 = vst [vmem:[#allocation2] sm:$0xff] %v4994_v16 }
 0x997   :  { %6633 = shalt.err (!%p6630_p4)
}
 0x998   :  { %s6634_s4 = scalar_lea.hbm %s8038_s3, 128 }
 0x999   :  { %p6635_p5 = scmp.ne.s32.totalorder %s8038_s3, %s6634_s4  ;;  %p6638_p6 = scmp.lt.u32.totalorder %s6634_s4, %s8038_s3 }
 0x99b   :  { %p6640_p7 = pnand %p6638_p6, %p6635_p5 }
 0x99d   :  { %6643 = shalt.err (!%p6640_p7)
}
 0x99e   :  { %5006 = dma.vmem_to_hbm [thread:$0]  %s5004_s27, 128, %s8038_s3, [#allocation3]  }
 0x99f   :  { %6644 = dma.done.wait [#allocation3], 128  }
 0x9a0   :  { %6645 = vsyncadd [#allocation3], 4294967168 }
 0x9a1   :  { %5010 = vsyncpa [#allocation3], 1 }

</bundles_post_ra>
